<compile_context>
chip_gen: v6e
topology: v6e:2x2x1
jax: 0.10.0
libtpu: 0.0.40
codegen_flags: <defaults>
</compile_context>

<pallas_src>
import jax
import jax.numpy as jnp
import numpy as np
from jax.experimental import pallas as pl
from jax.experimental.pallas import tpu as pltpu


def _down_block_kernel(x_ref, w1_ref, sh1_ref, w2_ref, sh2_ref, out_ref):
    # x_ref:   (nb, Hp, 2, Wp, 2*Cin)  pooling-window-exposed input (see wrapper)
    # w*_ref:  (9*Cin, Cout) / (9*Cout, Cout) bf16, BN scale pre-folded
    # sh*_ref: (1, Cout) f32 fused BN/bias shift
    nb, Hp, _, Wp, two_cin = x_ref.shape
    cin = two_cin // 2
    cout = out_ref.shape[-1]

    # ---- MaxPool2d(2): leading-dim max (row pair) + lane-half max (col pair) ----
    row_max = jnp.maximum(x_ref[:, :, 0, :, :], x_ref[:, :, 1, :, :])   # (nb,Hp,Wp,2Cin)
    pooled = jnp.maximum(row_max[..., :cin], row_max[..., cin:])        # (nb,Hp,Wp,Cin)

    def conv3x3_bn_relu(h, w_ref, sh_ref, c):
        # Zero padding built functionally -> no persistent scratch to re-zero.
        zr = jnp.zeros((nb, 1, Wp, c), jnp.float32)
        h = jnp.concatenate([zr, h, zr], axis=1)                  # (nb, Hp+2, Wp, c)
        zc = jnp.zeros((nb, Hp + 2, 1, c), jnp.float32)
        h = jnp.concatenate([zc, h, zc], axis=2)                  # (nb, Hp+2, Wp+2, c)
        # im2col: fuse the 9 taps into a single (M, 9c) x (9c, Cout) MXU matmul.
        taps = [h[:, kh:kh + Hp, kw:kw + Wp, :]
                for kh in range(3) for kw in range(3)]
        patches = jnp.concatenate(taps, axis=-1)                  # (nb, Hp, Wp, 9c)
        patches = patches.reshape(nb * Hp * Wp, 9 * c).astype(jnp.bfloat16)
        acc = jnp.dot(patches, w_ref[...], preferred_element_type=jnp.float32)
        # BN scale already folded into the weights; shift + ReLU in f32 on the VPU.
        return jnp.maximum(acc + sh_ref[...], 0.0)                # (M, Cout) f32

    h1 = conv3x3_bn_relu(pooled, w1_ref, sh1_ref, cin).reshape(nb, Hp, Wp, cout)
    h2 = conv3x3_bn_relu(h1, w2_ref, sh2_ref, cout)
    out_ref[...] = h2.reshape(nb, Hp, Wp, cout)


def down_block_forward(x_nchw, params, *, block_batch=None):
    """UNet Down block, eval mode. x: (N, Cin, H, W) f32 -> (N, Cout, H//2, W//2) f32."""
    N, Cin, H, W = x_nchw.shape
    assert H % 2 == 0 and W % 2 == 0, "MaxPool2d(2) expects even H, W"
    Hp, Wp = H // 2, W // 2
    (w1, b1, g1, be1, m1, v1, w2, b2, g2, be2, m2, v2) = params
    Cout = w1.shape[0]
    eps = 1e-5

    # glue: NCHW -> NHWC, then a FREE row-major regroup that puts the 2x2 pooling
    # window on a leading dim (row pair) and the lane dim (column pair folded into
    # channels).  One dense block per batch item; no pre-strided HBM copies.
    x = jnp.transpose(x_nchw, (0, 2, 3, 1))
    xr = x.reshape(N, Hp, 2, Wp, 2 * Cin)

    # glue: fold eval-mode BN (running stats) + conv bias.  Scale goes INTO the
    # conv weights; only the shift stays in-kernel.
    s1 = g1 / jnp.sqrt(v1 + eps)
    sh1 = (s1 * (b1 - m1) + be1).reshape(1, Cout)
    s2 = g2 / jnp.sqrt(v2 + eps)
    sh2 = (s2 * (b2 - m2) + be2).reshape(1, Cout)
    # torch (Cout, Cin, kh, kw) -> (kh, kw, Cin, Cout) -> (9*Cin, Cout), bf16 MXU operands.
    w1f = (jnp.transpose(w1, (2, 3, 1, 0)) * s1).reshape(9 * Cin, Cout).astype(jnp.bfloat16)
    w2f = (jnp.transpose(w2, (2, 3, 1, 0)) * s2).reshape(9 * Cout, Cout).astype(jnp.bfloat16)

    # Batch items per grid step: target M = nb*Hp*Wp >= ~256 rows per MXU pass,
    # while keeping multiple parallel grid steps (v7x has two TensorCores).
    if block_batch is None:
        target = max(1, -(-256 // (Hp * Wp)))     # ceil(256 / (Hp*Wp))
        nb = 1
        for d in range(1, N + 1):
            if N % d == 0 and d <= target:
                nb = d
    else:
        nb = block_batch
    assert N % nb == 0
    grid = (N // nb,)

    out_nhwc = pl.pallas_call(
        _down_block_kernel,
        out_shape=jax.ShapeDtypeStruct((N, Hp, Wp, Cout), jnp.float32),
        grid_spec=pltpu.PrefetchScalarGridSpec(
            num_scalar_prefetch=0,
            grid=grid,
            in_specs=[
                pl.BlockSpec((nb, Hp, 2, Wp, 2 * Cin), lambda n: (n, 0, 0, 0, 0)),
                pl.BlockSpec((9 * Cin, Cout), lambda n: (0, 0)),
                pl.BlockSpec((1, Cout), lambda n: (0, 0)),
                pl.BlockSpec((9 * Cout, Cout), lambda n: (0, 0)),
                pl.BlockSpec((1, Cout), lambda n: (0, 0)),
            ],
            out_specs=pl.BlockSpec((nb, Hp, Wp, Cout), lambda n: (n, 0, 0, 0)),
        ),
        # NOTE: at full UNet feature-map sizes add a spatial grid axis (halo'd Hp
        # tiles) and set vmem_limit_bytes explicitly for v7x's 64 MiB VMEM.
        compiler_params=pltpu.CompilerParams(dimension_semantics=("parallel",)),
    )(xr, w1f, sh1, w2f, sh2)

    return jnp.transpose(out_nhwc, (0, 3, 1, 2))  # back to NCHW


def _reference(x_nchw, params, *, mxu_bf16=False):
    """Pure-JAX reference (eval-mode BN).  mxu_bf16=True mirrors the kernel's
    bf16 matmul operands (f32 accumulation) for a tight numerical check."""
    N, Cin, H, W = x_nchw.shape
    (w1, b1, g1, be1, m1, v1, w2, b2, g2, be2, m2, v2) = params
    eps = 1e-5
    Hp, Wp = H // 2, W // 2
    x = jnp.transpose(x_nchw, (0, 2, 3, 1))
    pooled = jnp.max(x.reshape(N, Hp, 2, Wp, 2, Cin), axis=(2, 4))
    prec = None if mxu_bf16 else jax.lax.Precision.HIGHEST

    def conv_bn_relu(h, w_torch, scale, shift):
        wt = jnp.transpose(w_torch, (2, 3, 1, 0)) * scale   # fold BN scale
        hp_ = jnp.pad(h, ((0, 0), (1, 1), (1, 1), (0, 0)))
        if mxu_bf16:
            wt = wt.astype(jnp.bfloat16)
            hp_ = hp_.astype(jnp.bfloat16)
        out = jnp.zeros((N, Hp, Wp, wt.shape[-1]), jnp.float32)
        for kh in range(3):
            for kw in range(3):
                out = out + jnp.einsum('nhwc,co->nhwo',
                                       hp_[:, kh:kh + Hp, kw:kw + Wp, :], wt[kh, kw],
                                       preferred_element_type=jnp.float32,
                                       precision=prec)
        return jnp.maximum(out + shift, 0.0)

    s1 = g1 / jnp.sqrt(v1 + eps); sh1 = s1 * (b1 - m1) + be1
    s2 = g2 / jnp.sqrt(v2 + eps); sh2 = s2 * (b2 - m2) + be2
    h1 = conv_bn_relu(pooled, w1, s1, sh1)
    h2 = conv_bn_relu(h1, w2, s2, sh2)
    return jnp.transpose(h2, (0, 3, 1, 2))


if __name__ == "__main__":
    key = jax.random.PRNGKey(0)
    # down1 stage of UNetWithAncillary: Down(64, 128), small spatial extent.
    N, Cin, Cout, H, W = 2, 64, 128, 32, 32

    ks = jax.random.split(key, 13)
    x = jax.random.normal(ks[0], (N, Cin, H, W), jnp.float32)
    # Deterministic synthetic parameters (PyTorch layer shapes), fan-in scaled.
    w1 = jax.random.normal(ks[1], (Cout, Cin, 3, 3), jnp.float32) / np.sqrt(9 * Cin)
    b1 = 0.1 * jax.random.normal(ks[2], (Cout,), jnp.float32)
    g1 = 1.0 + 0.1 * jax.random.normal(ks[3], (Cout,), jnp.float32)
    be1 = 0.1 * jax.random.normal(ks[4], (Cout,), jnp.float32)
    m1 = 0.1 * jax.random.normal(ks[5], (Cout,), jnp.float32)
    v1 = 1.0 + 0.1 * jax.nn.softplus(jax.random.normal(ks[6], (Cout,), jnp.float32))
    w2 = jax.random.normal(ks[7], (Cout, Cout, 3, 3), jnp.float32) / np.sqrt(9 * Cout)
    b2 = 0.1 * jax.random.normal(ks[8], (Cout,), jnp.float32)
    g2 = 1.0 + 0.1 * jax.random.normal(ks[9], (Cout,), jnp.float32)
    be2 = 0.1 * jax.random.normal(ks[10], (Cout,), jnp.float32)
    m2 = 0.1 * jax.random.normal(ks[11], (Cout,), jnp.float32)
    v2 = 1.0 + 0.1 * jax.nn.softplus(jax.random.normal(ks[12], (Cout,), jnp.float32))
    params = (w1, b1, g1, be1, m1, v1, w2, b2, g2, be2, m2, v2)

    out = jax.block_until_ready(down_block_forward(x, params))
    assert out.shape == (N, Cout, H // 2, W // 2)

    # Tight check vs. a reference that mirrors the kernel's bf16 MXU operands.
    ref_bf16 = jax.block_until_ready(_reference(x, params, mxu_bf16=True))
    np.testing.assert_allclose(np.asarray(out), np.asarray(ref_bf16), atol=5e-3, rtol=5e-3)
    # Loose check vs. the pure-f32 reference (difference is bf16 operand rounding only).
    ref_f32 = jax.block_until_ready(_reference(x, params, mxu_bf16=False))
    np.testing.assert_allclose(np.asarray(out), np.asarray(ref_f32), atol=5e-2, rtol=5e-2)

    print("KERNEL_OK")
</pallas_src>

<mosaic_0001>
module attributes {stable_mosaic.version = 11 : i64} {
  func.func @_down_block_kernel(%arg0: i32, %arg1: memref<1x16x2x16x128xf32, #tpu.memory_space<vmem>>, %arg2: memref<576x128xbf16, #tpu.memory_space<vmem>>, %arg3: memref<1x128xf32, #tpu.memory_space<vmem>>, %arg4: memref<1152x128xbf16, #tpu.memory_space<vmem>>, %arg5: memref<1x128xf32, #tpu.memory_space<vmem>>, %arg6: memref<1x16x16x128xf32, #tpu.memory_space<vmem>>) attributes {dimension_semantics = [#tpu.dimension_semantics<parallel>], iteration_bounds = array<i64: 2>, scalar_prefetch = 0 : i64, scratch_operands = 0 : i64, tpu.core_type = #tpu.core_type<tc>, window_params = [{transform_indices = @transform_0, window_bounds = array<i64: 1, 16, 2, 16, 128>}, {pipeline_mode = #tpu.pipeline_mode<synchronous>, transform_indices = @transform_1, window_bounds = array<i64: 576, 128>}, {pipeline_mode = #tpu.pipeline_mode<synchronous>, transform_indices = @transform_2, window_bounds = array<i64: 1, 128>}, {pipeline_mode = #tpu.pipeline_mode<synchronous>, transform_indices = @transform_3, window_bounds = array<i64: 1152, 128>}, {pipeline_mode = #tpu.pipeline_mode<synchronous>, transform_indices = @transform_4, window_bounds = array<i64: 1, 128>}, {transform_indices = @transform_5, window_bounds = array<i64: 1, 16, 16, 128>}]} {
    %c0 = arith.constant 0 : index
    %c0_0 = arith.constant 0 : index
    %c0_1 = arith.constant 0 : index
    %c0_2 = arith.constant 0 : index
    %c0_3 = arith.constant 0 : index
    %0 = vector.load %arg1[%c0, %c0_0, %c0_1, %c0_2, %c0_3] : memref<1x16x2x16x128xf32, #tpu.memory_space<vmem>>, vector<1x16x1x16x128xf32>
    %1 = vector.shape_cast %0 : vector<1x16x1x16x128xf32> to vector<1x16x16x128xf32>
    %c0_4 = arith.constant 0 : index
    %c0_5 = arith.constant 0 : index
    %c1 = arith.constant 1 : index
    %c0_6 = arith.constant 0 : index
    %c0_7 = arith.constant 0 : index
    %2 = vector.load %arg1[%c0_4, %c0_5, %c1, %c0_6, %c0_7] : memref<1x16x2x16x128xf32, #tpu.memory_space<vmem>>, vector<1x16x1x16x128xf32>
    %3 = vector.shape_cast %2 : vector<1x16x1x16x128xf32> to vector<1x16x16x128xf32>
    %4 = arith.maximumf %1, %3 : vector<1x16x16x128xf32>
    %5 = vector.extract_strided_slice %4 {offsets = [0, 0, 0, 0], sizes = [1, 16, 16, 64], strides = [1, 1, 1, 1]} : vector<1x16x16x128xf32> to vector<1x16x16x64xf32>
    %6 = vector.extract_strided_slice %4 {offsets = [0, 0, 0, 64], sizes = [1, 16, 16, 64], strides = [1, 1, 1, 1]} : vector<1x16x16x128xf32> to vector<1x16x16x64xf32>
    %7 = arith.maximumf %5, %6 : vector<1x16x16x64xf32>
    %cst = arith.constant 0.000000e+00 : f32
    %8 = vector.broadcast %cst : f32 to vector<1x1x16x64xf32>
    %9 = tpu.concatenate %8, %7, %8 in 1 : vector<1x1x16x64xf32>, vector<1x16x16x64xf32>, vector<1x1x16x64xf32> -> vector<1x18x16x64xf32>
    %cst_8 = arith.constant 0.000000e+00 : f32
    %10 = vector.broadcast %cst_8 : f32 to vector<1x18x1x64xf32>
    %11 = tpu.concatenate %10, %9, %10 in 2 : vector<1x18x1x64xf32>, vector<1x18x16x64xf32>, vector<1x18x1x64xf32> -> vector<1x18x18x64xf32>
    %12 = vector.extract_strided_slice %11 {offsets = [0, 0, 0, 0], sizes = [1, 16, 16, 64], strides = [1, 1, 1, 1]} : vector<1x18x18x64xf32> to vector<1x16x16x64xf32>
    %13 = vector.extract_strided_slice %11 {offsets = [0, 0, 1, 0], sizes = [1, 16, 16, 64], strides = [1, 1, 1, 1]} : vector<1x18x18x64xf32> to vector<1x16x16x64xf32>
    %14 = vector.extract_strided_slice %11 {offsets = [0, 0, 2, 0], sizes = [1, 16, 16, 64], strides = [1, 1, 1, 1]} : vector<1x18x18x64xf32> to vector<1x16x16x64xf32>
    %15 = vector.extract_strided_slice %11 {offsets = [0, 1, 0, 0], sizes = [1, 16, 16, 64], strides = [1, 1, 1, 1]} : vector<1x18x18x64xf32> to vector<1x16x16x64xf32>
    %16 = vector.extract_strided_slice %11 {offsets = [0, 1, 1, 0], sizes = [1, 16, 16, 64], strides = [1, 1, 1, 1]} : vector<1x18x18x64xf32> to vector<1x16x16x64xf32>
    %17 = vector.extract_strided_slice %11 {offsets = [0, 1, 2, 0], sizes = [1, 16, 16, 64], strides = [1, 1, 1, 1]} : vector<1x18x18x64xf32> to vector<1x16x16x64xf32>
    %18 = vector.extract_strided_slice %11 {offsets = [0, 2, 0, 0], sizes = [1, 16, 16, 64], strides = [1, 1, 1, 1]} : vector<1x18x18x64xf32> to vector<1x16x16x64xf32>
    %19 = vector.extract_strided_slice %11 {offsets = [0, 2, 1, 0], sizes = [1, 16, 16, 64], strides = [1, 1, 1, 1]} : vector<1x18x18x64xf32> to vector<1x16x16x64xf32>
    %20 = vector.extract_strided_slice %11 {offsets = [0, 2, 2, 0], sizes = [1, 16, 16, 64], strides = [1, 1, 1, 1]} : vector<1x18x18x64xf32> to vector<1x16x16x64xf32>
    %21 = tpu.concatenate %12, %13, %14, %15, %16, %17, %18, %19, %20 in 3 : vector<1x16x16x64xf32>, vector<1x16x16x64xf32>, vector<1x16x16x64xf32>, vector<1x16x16x64xf32>, vector<1x16x16x64xf32>, vector<1x16x16x64xf32>, vector<1x16x16x64xf32>, vector<1x16x16x64xf32>, vector<1x16x16x64xf32> -> vector<1x16x16x576xf32>
    %22 = vector.shape_cast %21 : vector<1x16x16x576xf32> to vector<256x576xf32>
    %23 = arith.truncf %22 : vector<256x576xf32> to vector<256x576xbf16>
    %c0_9 = arith.constant 0 : index
    %c0_10 = arith.constant 0 : index
    %24 = vector.load %arg2[%c0_9, %c0_10] : memref<576x128xbf16, #tpu.memory_space<vmem>>, vector<576x128xbf16>
    %cst_11 = arith.constant dense<0.000000e+00> : vector<256x128xf32>
    %25 = tpu.matmul %23, %24, %cst_11 {dimension_numbers = #tpu.dot_dimension_numbers<[1], [0], [0], [1], [0, 0, 1, 1], [], []>} : vector<256x576xbf16>, vector<576x128xbf16>, vector<256x128xf32> -> vector<256x128xf32>
    %c0_12 = arith.constant 0 : index
    %c0_13 = arith.constant 0 : index
    %26 = vector.load %arg3[%c0_12, %c0_13] : memref<1x128xf32, #tpu.memory_space<vmem>>, vector<1x128xf32>
    %27 = vector.broadcast %26 : vector<1x128xf32> to vector<256x128xf32>
    %28 = arith.addf %25, %27 : vector<256x128xf32>
    %cst_14 = arith.constant 0.000000e+00 : f32
    %29 = vector.broadcast %cst_14 : f32 to vector<256x128xf32>
    %30 = arith.maximumf %28, %29 : vector<256x128xf32>
    %31 = vector.shape_cast %30 : vector<256x128xf32> to vector<1x16x16x128xf32>
    %cst_15 = arith.constant 0.000000e+00 : f32
    %32 = vector.broadcast %cst_15 : f32 to vector<1x1x16x128xf32>
    %33 = tpu.concatenate %32, %31, %32 in 1 : vector<1x1x16x128xf32>, vector<1x16x16x128xf32>, vector<1x1x16x128xf32> -> vector<1x18x16x128xf32>
    %cst_16 = arith.constant 0.000000e+00 : f32
    %34 = vector.broadcast %cst_16 : f32 to vector<1x18x1x128xf32>
    %35 = tpu.concatenate %34, %33, %34 in 2 : vector<1x18x1x128xf32>, vector<1x18x16x128xf32>, vector<1x18x1x128xf32> -> vector<1x18x18x128xf32>
    %36 = vector.extract_strided_slice %35 {offsets = [0, 0, 0, 0], sizes = [1, 16, 16, 128], strides = [1, 1, 1, 1]} : vector<1x18x18x128xf32> to vector<1x16x16x128xf32>
    %37 = vector.extract_strided_slice %35 {offsets = [0, 0, 1, 0], sizes = [1, 16, 16, 128], strides = [1, 1, 1, 1]} : vector<1x18x18x128xf32> to vector<1x16x16x128xf32>
    %38 = vector.extract_strided_slice %35 {offsets = [0, 0, 2, 0], sizes = [1, 16, 16, 128], strides = [1, 1, 1, 1]} : vector<1x18x18x128xf32> to vector<1x16x16x128xf32>
    %39 = vector.extract_strided_slice %35 {offsets = [0, 1, 0, 0], sizes = [1, 16, 16, 128], strides = [1, 1, 1, 1]} : vector<1x18x18x128xf32> to vector<1x16x16x128xf32>
    %40 = vector.extract_strided_slice %35 {offsets = [0, 1, 1, 0], sizes = [1, 16, 16, 128], strides = [1, 1, 1, 1]} : vector<1x18x18x128xf32> to vector<1x16x16x128xf32>
    %41 = vector.extract_strided_slice %35 {offsets = [0, 1, 2, 0], sizes = [1, 16, 16, 128], strides = [1, 1, 1, 1]} : vector<1x18x18x128xf32> to vector<1x16x16x128xf32>
    %42 = vector.extract_strided_slice %35 {offsets = [0, 2, 0, 0], sizes = [1, 16, 16, 128], strides = [1, 1, 1, 1]} : vector<1x18x18x128xf32> to vector<1x16x16x128xf32>
    %43 = vector.extract_strided_slice %35 {offsets = [0, 2, 1, 0], sizes = [1, 16, 16, 128], strides = [1, 1, 1, 1]} : vector<1x18x18x128xf32> to vector<1x16x16x128xf32>
    %44 = vector.extract_strided_slice %35 {offsets = [0, 2, 2, 0], sizes = [1, 16, 16, 128], strides = [1, 1, 1, 1]} : vector<1x18x18x128xf32> to vector<1x16x16x128xf32>
    %45 = tpu.concatenate %36, %37, %38, %39, %40, %41, %42, %43, %44 in 3 : vector<1x16x16x128xf32>, vector<1x16x16x128xf32>, vector<1x16x16x128xf32>, vector<1x16x16x128xf32>, vector<1x16x16x128xf32>, vector<1x16x16x128xf32>, vector<1x16x16x128xf32>, vector<1x16x16x128xf32>, vector<1x16x16x128xf32> -> vector<1x16x16x1152xf32>
    %46 = vector.shape_cast %45 : vector<1x16x16x1152xf32> to vector<256x1152xf32>
    %47 = arith.truncf %46 : vector<256x1152xf32> to vector<256x1152xbf16>
    %c0_17 = arith.constant 0 : index
    %c0_18 = arith.constant 0 : index
    %48 = vector.load %arg4[%c0_17, %c0_18] : memref<1152x128xbf16, #tpu.memory_space<vmem>>, vector<1152x128xbf16>
    %cst_19 = arith.constant dense<0.000000e+00> : vector<256x128xf32>
    %49 = tpu.matmul %47, %48, %cst_19 {dimension_numbers = #tpu.dot_dimension_numbers<[1], [0], [0], [1], [0, 0, 1, 1], [], []>} : vector<256x1152xbf16>, vector<1152x128xbf16>, vector<256x128xf32> -> vector<256x128xf32>
    %c0_20 = arith.constant 0 : index
    %c0_21 = arith.constant 0 : index
    %50 = vector.load %arg5[%c0_20, %c0_21] : memref<1x128xf32, #tpu.memory_space<vmem>>, vector<1x128xf32>
    %51 = vector.broadcast %50 : vector<1x128xf32> to vector<256x128xf32>
    %52 = arith.addf %49, %51 : vector<256x128xf32>
    %cst_22 = arith.constant 0.000000e+00 : f32
    %53 = vector.broadcast %cst_22 : f32 to vector<256x128xf32>
    %54 = arith.maximumf %52, %53 : vector<256x128xf32>
    %55 = vector.shape_cast %54 : vector<256x128xf32> to vector<1x16x16x128xf32>
    %c0_23 = arith.constant 0 : index
    %c0_24 = arith.constant 0 : index
    %c0_25 = arith.constant 0 : index
    %c0_26 = arith.constant 0 : index
    %56 = vector.load %arg6[%c0_23, %c0_24, %c0_25, %c0_26] : memref<1x16x16x128xf32, #tpu.memory_space<vmem>>, vector<1x16x16x128xf32>
    tpu.vector_store %arg6[%c0_23, %c0_24, %c0_25, %c0_26], %55 {strides = array<i32>} : memref<1x16x16x128xf32, #tpu.memory_space<vmem>>, vector<1x16x16x128xf32>,
    return
  }
  func.func @transform_0(%arg0: i32) -> (i32, i32, i32, i32, i32) {
    %c0_i32 = arith.constant 0 : i32
    %c0_i32_0 = arith.constant 0 : i32
    %c0_i32_1 = arith.constant 0 : i32
    %c0_i32_2 = arith.constant 0 : i32
    %c0_i32_3 = arith.constant 0 : i32
    return %arg0, %c0_i32, %c0_i32_0, %c0_i32_1, %c0_i32_2 : i32, i32, i32, i32, i32
  }
  func.func @transform_1(%arg0: i32) -> (i32, i32) {
    %c0_i32 = arith.constant 0 : i32
    %c0_i32_0 = arith.constant 0 : i32
    %c0_i32_1 = arith.constant 0 : i32
    return %c0_i32, %c0_i32_0 : i32, i32
  }
  func.func @transform_2(%arg0: i32) -> (i32, i32) {
    %c0_i32 = arith.constant 0 : i32
    %c0_i32_0 = arith.constant 0 : i32
    %c0_i32_1 = arith.constant 0 : i32
    return %c0_i32, %c0_i32_0 : i32, i32
  }
  func.func @transform_3(%arg0: i32) -> (i32, i32) {
    %c0_i32 = arith.constant 0 : i32
    %c0_i32_0 = arith.constant 0 : i32
    %c0_i32_1 = arith.constant 0 : i32
    return %c0_i32, %c0_i32_0 : i32, i32
  }
  func.func @transform_4(%arg0: i32) -> (i32, i32) {
    %c0_i32 = arith.constant 0 : i32
    %c0_i32_0 = arith.constant 0 : i32
    %c0_i32_1 = arith.constant 0 : i32
    return %c0_i32, %c0_i32_0 : i32, i32
  }
  func.func @transform_5(%arg0: i32) -> (i32, i32, i32, i32) {
    %c0_i32 = arith.constant 0 : i32
    %c0_i32_0 = arith.constant 0 : i32
    %c0_i32_1 = arith.constant 0 : i32
    %c0_i32_2 = arith.constant 0 : i32
    return %arg0, %c0_i32, %c0_i32_0, %c0_i32_1 : i32, i32, i32, i32
  }
}

</mosaic_0001>

<bundles_post_ra>
// kernel: tpu_custom_call.1
= control target key start
LH: loop header
LB: loop body
LE: loop exit
PB: predicated region body
PF: predicated region fallthrough
CT: control target
= control target key end

     0   :  { %10 = vsyncpa [#allocation3], 0  ;;  %s8711_s0 = inlined_call_operand.hbm [shape: f32[2,16,2,16,128], index: 0, kind: input, shape index: {}]   ;;  %s8712_s1 = inlined_call_operand.hbm [shape: bf16[576,128], index: 1, kind: input, shape index: {}]   ;;  %s8713_s2 = inlined_call_operand.vmem [shape: f32[1,128], index: 2, kind: input, shape index: {}]   ;;  %s8714_s3 = inlined_call_operand.hbm [shape: bf16[1152,128], index: 3, kind: input, shape index: {}]   ;;  %s8715_s4 = inlined_call_operand.vmem [shape: f32[1,128], index: 4, kind: input, shape index: {}]   ;;  %s8716_s5 = inlined_call_operand.hbm [shape: f32[2,16,16,128], index: 5, kind: output, shape index: {}]  }
   0x1   :  { %12 = vsyncpa [#allocation3 + $0x1], 0 }
   0x2   :  { %13 = vsyncpa [#allocation6], 0 }
   0x3   :  { %14 = vsyncpa [#allocation4], 0 }
   0x4   :  { %16 = vsyncpa [#allocation4 + $0x1], 0  ;;  %s6190_s18 = smov 0   ;;  %s6192_s19 = smov 0  }
   0x5   :  { %s6194_s20 = smov 0   ;;  %s6196_s21 = smov 0  }
   0x6 LB: > { %s6211_s22 = sadd.s32 4294967295, %s6145_s21   ;;  %s4312_s23 = sadd.s32 4294967294, %s6145_s21   ;;  %s6145_s21 = sphi %s6196_s21, %s8992_s21   ;;  %s6141_s20 = sphi %s6194_s20, %s8991_s20   ;;  %s6137_s19 = sphi %s6192_s19, %s8990_s19   ;;  %s6133_s18 = sphi %s6190_s18, %s8989_s18  }
   0x7   : > { %p42_p0 = scmp.ne.s32.totalorder %s6137_s19, %s6133_s18  ;;  %p8717_p1 = scmp.eq.s32.totalorder %s6211_s22, 0 }
   0x8   : > { %p156_p3 = scmp.eq.s32.totalorder %s4312_s23, 1  ;;  %p4313_p5 = scmp.ge.s32.totalorder %s6145_s21, 1 }
   0x9   : > { %p6220_p4 = por %p8717_p1, %p42_p0  ;;  %p163_p7 = scmp.lt.s32.totalorder %s6145_s21, 3 }
   0xa   : > { %p6225_p6 = por %p156_p3, %p42_p0  ;;  %s6147_s27 = smov [#allocation5]  }
   0xb   : > { %s8777_s24 = scalar_select %p6220_p4, 1, 0 }
   0xc   : > { %s8778_s25 = scalar_select %p6225_p6, 1, 0 }
   0xd   : > { %p6230_p8 = pnand %p4313_p5, %p163_p7  ;;  %s175_s28 = sshll.u32 %s6147_s27, 4  ;;  %s176_s28 = int_to_ptr.vmem [resolvable:$true] %s175_s28 }
   0xe   : > { %s6148_s30 = smov [#allocation7]   ;;  %s6008_s7 = scalar_lea.vmem %s176_s28, 4608 }
   0xf   : > { %s8779_s26 = scalar_select %p6230_p8, 1, 0 }
  0x10   : > { %p5498_p9 = pneg %p6230_p8  ;;  %s191_s6 = sshll.u32 %s6148_s30, 4  ;;  %s192_s6 = int_to_ptr.vmem [resolvable:$true] %s191_s6 }
  0x11   : > { %p6009_p13 = scmp.ne.s32.totalorder %s176_s28, %s6008_s7  ;;  %p6016_p5 = scmp.lt.s32.totalorder %s176_s28, %s176_s28 }
  0x12   : > { %p6239_p11 = pnand %p5498_p9, %p8717_p1  ;;  %p6017_p7 = scmp.lt.s32.totalorder %s6008_s7, %s6008_s7 }
  0x14   : > { %p5999_p12 = pneg %p6239_p11  ;;  %p6018_p10 = por %p6017_p7, %p6016_p5 }
  0x16   : > { %p6011_p0 = pnand %p6009_p13, %p5999_p12 }
  0x18   : > { %p6012_p3 = pneg %p6011_p0 }
  0x1a   : > { %p6019_p9 = pnand %p6018_p10, %p6012_p3 }
  0x1c   : > { %6022 = shalt.err (!%p6019_p9)
}
  0x1d   : > { %s6149_s8 = smov 64   ;;  %s6150_s9 = smov 4  }
  0x1e   : > { %5501 = dma.hbm_to_vmem [thread:$0]  (!%p6239_p11), %s8712_s1, 4608, %s176_s28, [#allocation6], %s6149_s8, %s6149_s8, %s6150_s9  }
  0x1f   : > { %s6034_s12 = scalar_lea.vmem %s192_s6, 9216  ;;  %p6042_p2 = scmp.lt.s32.totalorder %s192_s6, %s192_s6 }
  0x20   : > { %p6035_p1 = scmp.ne.s32.totalorder %s192_s6, %s6034_s12  ;;  %p6043_p6 = scmp.lt.s32.totalorder %s6034_s12, %s6034_s12 }
  0x22   : > { %p6037_p13 = pnand %p6035_p1, %p5999_p12  ;;  %p6044_p5 = por %p6043_p6, %p6042_p2 }
  0x24   : > { %p6038_p0 = pneg %p6037_p13 }
  0x26   : > { %p6045_p10 = pnand %p6044_p5, %p6038_p0 }
  0x28   : > { %6048 = shalt.err (!%p6045_p10)
}
  0x29   : > { %5504 = dma.hbm_to_vmem [thread:$0]  (!%p6239_p11), %s8714_s3, 9216, %s192_s6, [#allocation6], %s6149_s8, %s6149_s8, %s6150_s9  }
  0x2a   : > { %s6262_s15 = sadd.s32 1, %s6145_s21   ;;  %s29_s16 = sadd.s32 1, %s6141_s20 }
  0x2b   : > { %s26_s17 = ssub.s32 %s6145_s21, %s6262_s15  ;;  %p36_p1 = scmp.ne.s32.totalorder %s6141_s20, %s6137_s19 }
  0x2c   : > { %p27_p2 = scmp.eq.s32.totalorder %s26_s17, 0  ;;  %p37_p6 = scmp.eq.s32.totalorder %s6145_s21, 0 }
  0x2d   : > { %p8781_p12 = scmp.eq.s32.totalorder %s6211_s22, 1  ;;  %p5515_p7 = scmp.lt.s32.totalorder %s6145_s21, 2 }
  0x2e   : > { %s6278_s27 = scalar_select %p27_p2, %s6141_s20, %s29_s16  }
  0x2f   : > { %p6272_p3 = por %p8781_p12, %p36_p1  ;;  %p38_p9 = por %p37_p6, %p36_p1 }
  0x30   : > { %s208_s28 = sand.u32 1, %s6141_s20   ;;  %s4680_s30 = sshll.u32 %s6145_s21, 13 }
  0x31   : > { %s8782_s23 = scalar_select %p6272_p3, 1, 0 }
  0x32   : > { %s4317_s29 = sshll.u32 %s208_s28, 9  ;;  %s6285_s8 = scalar_lea.hbm %s8711_s0, %s4680_s30 }
  0x33   : > { %s212_s9 = scalar_lea.vmem [#allocation2], %s4317_s29  ;;  %p6289_p11 = pnand %p5515_p7, %p38_p9 }
  0x34   : > { %s219_s10 = sshll.u32 %s212_s9, 4  ;;  %s6293_s12 = scalar_lea.sflag [#allocation3], %s208_s28  ;;  %s6287_s10 = int_to_ptr.vmem [resolvable:$true] %s219_s10 }
  0x35   : > { %s6049_s13 = scalar_lea.hbm %s6285_s8, 8192  ;;  %p6051_p0 = pneg %p6289_p11 }
  0x36   : > { %p6050_p13 = scmp.ne.s32.totalorder %s6285_s8, %s6049_s13  ;;  %s6054_s17 = scalar_lea.hbm %s8711_s0, 16384 }
  0x37   : > { %p6055_p1 = scmp.lt.s32.totalorder %s6285_s8, %s8711_s0  ;;  %p6056_p2 = scmp.lt.s32.totalorder %s6054_s17, %s6049_s13 }
  0x38   : > { %p6052_p5 = pnand %p6051_p0, %p6050_p13 }
  0x39   : > { %p6057_p6 = por %p6056_p2, %p6055_p1 }
  0x3a   : > { %p6053_p10 = pneg %p6052_p5 }
  0x3c   : > { %p6058_p12 = pnand %p6057_p6, %p6053_p10 }
  0x3e   : > { %6061 = shalt.err (!%p6058_p12)
}
  0x3f   : > { %s6062_s28 = scalar_lea.vmem %s6287_s10, 8192  ;;  %s6151_s6 = smov [#allocation2]  }
  0x40   : > { %p6063_p7 = scmp.ne.s32.totalorder %s6287_s10, %s6062_s28  ;;  %s6067_s7 = sshll.u32 %s6151_s6, 4  ;;  %s6068_s7 = int_to_ptr.vmem [resolvable:$false] %s6067_s7 }
  0x41   : > { %s6069_s9 = scalar_lea.vmem %s6068_s7, 16384  ;;  %p6070_p5 = scmp.lt.s32.totalorder %s6287_s10, %s6068_s7 }
  0x42   : > { %p6065_p9 = pnand %p6063_p7, %p6051_p0  ;;  %p6071_p3 = scmp.lt.s32.totalorder %s6069_s9, %s6062_s28 }
  0x44   : > { %p6066_p13 = pneg %p6065_p9  ;;  %p6072_p4 = por %p6071_p3, %p6070_p5 }
  0x46   : > { %p6073_p8 = pnand %p6072_p4, %p6066_p13 }
  0x48   : > { %6076 = shalt.err (!%p6073_p8)
}
  0x49   : > { %s6152_s13 = smov 128   ;;  %s6153_s14 = smov 8  }
  0x4a   : > { %5508 = dma.hbm_to_vmem [thread:$0]  (!%p6289_p11), %s6285_s8, 8192, %s6287_s10, %s6293_s12, %s6152_s13, %s6152_s13, %s6153_s14  }
  0x4b   : > { %p8784_p0 = scmp.ne.s32.totalorder %s8779_s26, 0 }
  0x4d   : > { %231 = sbr.rel (%p8784_p0) target bundleno = 1264 (0x4f0), region = 40 }
  0x52   : > { %s6317_s16 = sand.u32 1, %s6137_s19   ;;  %p8785_p4 = scmp.ne.s32.totalorder %s8777_s24, 0 }
  0x53   : > { %s4321_s17 = sshll.u32 %s6317_s16, 9  ;;  %s234_s29 = scalar_lea.sflag [#allocation3], %s6317_s16 }
  0x54   : > { %s6321_s30 = scalar_lea.vmem [#allocation2], %s4321_s17 }
  0x55   : > { %6120 = dma.done.wait (%p8785_p4), %s234_s29, 8192  }
  0x56   : > { %6122 = vsyncadd (%p8785_p4), %s234_s29, 4294959104  ;;  %p8786_p8 = scmp.eq.s32.totalorder %s6211_s22, 0 }
  0x58   : > { %6124 = dma.done.wait (%p8786_p8), [#allocation6], 13824   ;;  %p8787_p3 = pmov %p8786_p8 }
  0x59   : > { %v273_v0 = vld [vmem:[%s6321_s30] sm:$0xff]  ;;  %v274_v1 = vld [vmem:[%s6321_s30 + $0x8] sm:$0xff]  ;;  %v4325_v2 = vld [vmem:[%s6321_s30 + $0x10] sm:$0xff]  ;;  %s6154_s24 = smov 64   ;;  %vm563_vm0 = vcmask 1040384   ;;  %vm730_vm1 = vcmask 1046528  }
  0x5a   : > { %6126 = vsyncadd (%p8787_p3), [#allocation6], 4294953472  ;;  %v4326_v3 = vld [vmem:[%s6321_s30 + $0x18] sm:$0xff]  ;;  %v6335_v4 = vmax.f32 %v273_v0, %v4325_v2  ;;  %v275_v5 = vld [vmem:[%s6321_s30 + $0x20] sm:$0xff]  ;;  %vm907_vm2 = vcmask 1045504   ;;  %vm1264_vm3 = vcmask 523264  }
  0x5b   : > { %v276_v6 = vld [vmem:[%s6321_s30 + $0x28] sm:$0xff]  ;;  %v6339_v7 = vmax.f32 %v274_v1, %v4326_v3  ;;  %v4327_v8 = vld [vmem:[%s6321_s30 + $0x30] sm:$0xff]  ;;  %v4328_v9 = vld [vmem:[%s6321_s30 + $0x38] sm:$0xff]  ;;  %vm6156_vm5 = vmmov 1   ;;  %s4324_s6 = sshll.u32 %s6317_s16, 8  ;;  %s4681_s9 = sshll.u32 %s6211_s22, 12 }
  0x5c   : > { %v277_v10 = vld [vmem:[%s6321_s30 + $0x40] sm:$0xff]  ;;  %v6344_v11 = vmax.f32 %v275_v5, %v4327_v8  ;;  %v6346_v12 = vmax.f32 %v276_v6, %v4328_v9  ;;  %v278_v13 = vld [vmem:[%s6321_s30 + $0x48] sm:$0xff]  ;;  %v4329_v14 = vld [vmem:[%s6321_s30 + $0x50] sm:$0xff]  ;;  %s8530_s7 = scalar_lea.vmem [#allocation8], %s4324_s6  ;;  %s8664_s29 = scalar_lea.hbm %s8716_s5, %s4681_s9 }
  0x5d   : > { %v4330_v15 = vld [vmem:[%s6321_s30 + $0x58] sm:$0xff]  ;;  %v5562_v16 = vpack.i.bf16 %v6339_v7, %v6335_v4  ;;  %v6353_v17 = vmax.f32 %v277_v10, %v4329_v14  ;;  %v279_v19 = vld [vmem:[%s6321_s30 + $0x60] sm:$0xff]  ;;  %v280_v20 = vld [vmem:[%s6321_s30 + $0x68] sm:$0xff]  ;;  %s4220_s13 = sshll.u32 %s8530_s7, 4  ;;  %p8986_p10 = scmp.ne.s32.totalorder %s8782_s23, 0  ;;  %s8666_s13 = int_to_ptr.vmem [resolvable:$true] %s4220_s13 }
  0x5e   : > { %v6355_v18 = vmax.f32 %v278_v13, %v4330_v15  ;;  %v4331_v21 = vld [vmem:[%s6321_s30 + $0x70] sm:$0xff]  ;;  %v4332_v22 = vld [vmem:[%s6321_s30 + $0x78] sm:$0xff]  ;;  %v281_v24 = vld [vmem:[%s6321_s30 + $0x80] sm:$0xff]  ;;  %v5567_v26 = vpack.i.bf16 %v6346_v12, %v6344_v11  ;;  %v6155_v15 = vmov 0.0   ;;  %s6077_s22 = scalar_lea.vmem %s8666_s13, 4096 }
  0x5f   : > { %v6361_v23 = vmax.f32 %v279_v19, %v4331_v21  ;;  %v282_v25 = vld [vmem:[%s6321_s30 + $0x88] sm:$0xff]  ;;  %5563 = vrot.lane.b32.xlu0 %v5562_v16, %s6154_s24  ;;  %v6370_v28 = vmax.f32 %v280_v20, %v4332_v22  ;;  %v4333_v29 = vld [vmem:[%s6321_s30 + $0x90] sm:$0xff]  ;;  %v4334_v30 = vld [vmem:[%s6321_s30 + $0x98] sm:$0xff]  ;;  %v6430_v16 = vrot.slane %v6155_v15, 7  ;;  %p6078_p11 = scmp.ne.s32.totalorder %s8666_s13, %s6077_s22 }
  0x60   : > { %v5572_v27 = vpack.i.bf16 %v6355_v18, %v6353_v17  ;;  %v283_v31 = vld [vmem:[%s6321_s30 + $0xa0] sm:$0xff]  ;;  %v6375_v32 = vmax.f32 %v281_v24, %v4333_v29  ;;  %v6377_v33 = vmax.f32 %v282_v25, %v4334_v30  ;;  %v284_v34 = vld [vmem:[%s6321_s30 + $0xa8] sm:$0xff]  ;;  %v4335_v35 = vld [vmem:[%s6321_s30 + $0xb0] sm:$0xff] }
  0x61   : > { %v4336_v36 = vld [vmem:[%s6321_s30 + $0xb8] sm:$0xff]  ;;  %v5577_v37 = vpack.i.bf16 %v6370_v28, %v6361_v23  ;;  %v6385_v38 = vmax.f32 %v283_v31, %v4335_v35  ;;  %v285_v40 = vld [vmem:[%s6321_s30 + $0xc0] sm:$0xff]  ;;  %v286_v41 = vld [vmem:[%s6321_s30 + $0xc8] sm:$0xff]  ;;  %8788 = vst [vmem:[#allocation12_spill] sm:$0xff] %v6430_v16  ;;  %v6434_v21 = vsel %vm563_vm0, 0.0, %v6430_v16  ;;  %v6438_v22 = vsel %vm563_vm0, %v6430_v16, 0.0  ;;  %p6079_p1 = pnand %p6078_p11, %p8986_p10 }
  0x62   : > { %5573 = vrot.lane.b32.xlu1 %v5572_v27, %s6154_s24  ;;  %v6387_v39 = vmax.f32 %v284_v34, %v4336_v36  ;;  %v4337_v42 = vld [vmem:[%s6321_s30 + $0xd0] sm:$0xff]  ;;  %v4338_v43 = vld [vmem:[%s6321_s30 + $0xd8] sm:$0xff]  ;;  %v287_v44 = vld [vmem:[%s6321_s30 + $0xe0] sm:$0xff]  ;;  %v5582_v46 = vpack.i.bf16 %v6377_v33, %v6375_v32  ;;  %v731_v29 = vrot.slane %v6434_v21, 1  ;;  %v732_v30 = vrot.slane %v6430_v16, 1 }
  0x63   : > { %v288_v45 = vld [vmem:[%s6321_s30 + $0xe8] sm:$0xff]  ;;  %5568 = vrot.lane.b32.xlu0 %v5567_v26, %s6154_s24  ;;  %v6398_v47 = vmax.f32 %v285_v40, %v4337_v42  ;;  %v6400_v48 = vmax.f32 %v286_v41, %v4338_v43  ;;  %v4339_v49 = vld [vmem:[%s6321_s30 + $0xf0] sm:$0xff]  ;;  %v4340_v50 = vld [vmem:[%s6321_s30 + $0xf8] sm:$0xff]  ;;  %v734_v31 = vrot.slane %v6438_v22, 1  ;;  %p6080_p2 = pneg %p6079_p1 }
  0x64   : > { %v5587_v51 = vpack.i.bf16 %v6387_v39, %v6385_v38  ;;  %v6407_v52 = vmax.f32 %v287_v44, %v4339_v49  ;;  %v6409_v53 = vmax.f32 %v288_v45, %v4340_v50  ;;  %v289_v54 = vld [vmem:[%s6321_s30 + $0x100] sm:$0xff]  ;;  %v290_v55 = vld [vmem:[%s6321_s30 + $0x108] sm:$0xff]  ;;  %v4341_v56 = vld [vmem:[%s6321_s30 + $0x110] sm:$0xff] }
  0x65   : > { %v4342_v57 = vld [vmem:[%s6321_s30 + $0x118] sm:$0xff]  ;;  %v5592_v58 = vpack.i.bf16 %v6400_v48, %v6398_v47  ;;  %v6421_v60 = vmax.f32 %v289_v54, %v4341_v56  ;;  %v5889_v1 = vld [vmem:[#allocation5 + $0x70] sm:$0xff]   ;;  %v5891_v3 = vld [vmem:[#allocation5 + $0x68] sm:$0xff]  }
  0x66   : > { %5578 = vrot.lane.b32.xlu1 %v5577_v37, %s6154_s24  ;;  %v5597_v59 = vpack.i.bf16 %v6409_v53, %v6407_v52  ;;  %v6423_v61 = vmax.f32 %v290_v55, %v4342_v57  ;;  %v5887_v63 = vld [vmem:[#allocation5 + $0x78] sm:$0xff]   ;;  %v5890_v2 = vld [vmem:[#allocation5 + $0x30] sm:$0xff]   ;;  %v5892_v5 = vld [vmem:[#allocation5 + $0x28] sm:$0xff]   ;;  %v6450_v55 = vsel %vm730_vm1, %v731_v29, %v732_v30 }
  0x67   : > { %5583 = vrot.lane.b32.xlu0 %v5582_v46, %s6154_s24  ;;  %v5888_v0 = vld [vmem:[#allocation5 + $0x38] sm:$0xff]   ;;  %4682 = vmatprep.subr.bf16.mxu0 %v5887_v63  ;;  %v5893_v6 = vld [vmem:[#allocation5 + $0x60] sm:$0xff]   ;;  %v5897_v13 = vld [vmem:[#allocation5 + $0x50] sm:$0xff]   ;;  %8789 = vst [vmem:[#allocation13_spill] sm:$0xff] %v6450_v55 }
  0x68   : > { %v5602_v62 = vpack.i.bf16 %v6423_v61, %v6421_v60  ;;  %4683 = vmatpush3.bf16.msra.mxu0 %v5888_v0  ;;  %v5894_v8 = vld [vmem:[#allocation5 + $0x20] sm:$0xff]   ;;  %v5895_v9 = vld [vmem:[#allocation5 + $0x58] sm:$0xff]   ;;  %v5898_v14 = vld [vmem:[#allocation5 + $0x10] sm:$0xff]  }
  0x69   : > { %4684 = vmatprep.subr.bf16.mxu0 %v5889_v1  ;;  %v5896_v10 = vld [vmem:[#allocation5 + $0x18] sm:$0xff]   ;;  %v5899_v19 = vld [vmem:[#allocation5 + $0x48] sm:$0xff]   ;;  %v5901_v34 = vld [vmem:[#allocation5 + $0x40] sm:$0xff]  }
  0x6a   : > { %5588 = vrot.lane.b32.xlu1 %v5587_v51, %s6154_s24  ;;  %v5900_v20 = vld [vmem:[#allocation5 + $0x8] sm:$0xff]   ;;  %v5902_v40 = vld [vmem:[#allocation5] sm:$0xff]   ;;  %v4343_v51 = vld [vmem:[%s6321_s30 + $0x130] sm:$0xff] }
  0x6b   : > { %5593 = vrot.lane.b32.xlu0 %v5592_v58, %s6154_s24  ;;  %v291_v43 = vld [vmem:[%s6321_s30 + $0x120] sm:$0xff]  ;;  %v292_v50 = vld [vmem:[%s6321_s30 + $0x128] sm:$0xff]  ;;  %v4344_v54 = vld [vmem:[%s6321_s30 + $0x138] sm:$0xff] }
  0x6c   : > { %4685 = vmatpush3.bf16.msra.mxu0 %v5890_v2  ;;  %v6465_v0 = vmax.f32 %v291_v43, %v4343_v51  ;;  %v6467_v1 = vmax.f32 %v292_v50, %v4344_v54  ;;  %v4346_v15 = vld [vmem:[%s6321_s30 + $0x158] sm:$0xff]  ;;  %v296_v54 = vld [vmem:[%s6321_s30 + $0x168] sm:$0xff]  ;;  %vm4483_vm4 = vmneg %vm563_vm0 }
  0x6d   : > { %4686 = vmatprep.subr.bf16.mxu0 %v5891_v3  ;;  %vm7559_vm6 = vmpackc.low %vm6156_vm5, %vm4483_vm4 }
  0x6e   : > { %5598 = vrot.lane.b32.xlu1 %v5597_v59, %s6154_s24  ;;  %v5617_v29 = vpack.i.bf16 %v6467_v1, %v6465_v0 }
  0x70   : > { %4687 = vmatpush3.bf16.msra.mxu0 %v5892_v5 }
  0x71   : > { %4688 = vmatprep.subr.bf16.mxu0 %v5893_v6  ;;  %v293_v6 = vld [vmem:[%s6321_s30 + $0x140] sm:$0xff] }
  0x72   : > { %5603 = vrot.lane.b32.xlu1 %v5602_v62, %s6154_s24 }
  0x74   : > { %4689 = vmatpush3.bf16.msra.mxu0 %v5894_v8  ;;  %v4345_v8 = vld [vmem:[%s6321_s30 + $0x150] sm:$0xff] }
  0x75   : > { %4690 = vmatprep.subr.bf16.mxu0 %v5895_v9 }
  0x78   : > { %4691 = vmatpush3.bf16.msra.mxu0 %v5896_v10 }
  0x79   : > { %4692 = vmatprep.subr.bf16.mxu0 %v5897_v13 }
  0x7c   : > { %4693 = vmatpush3.bf16.msra.mxu0 %v5898_v14  ;;  %v294_v14 = vld [vmem:[%s6321_s30 + $0x148] sm:$0xff] }
  0x7d   : > { %4694 = vmatprep.subr.bf16.mxu0 %v5899_v19 }
  0x80   : > { %4695 = vmatpush3.bf16.msra.mxu0 %v5900_v20 }
  0x81   : > { %4696 = vmatprep.subr.bf16.mxu0 %v5901_v34 }
  0x84   : > { %4697 = vmatpush3.bf16.msra.mxu0 %v5902_v40 }
  0xd1   : > { %v5564_v24 = vpop.permute.xlu0 %5563 }
  0xd2   : > { %v5566_v25 = vunpack.i.h.bf16 %v5564_v24  ;;  %v5565_v26 = vunpack.i.l.bf16 %v5564_v24 }
  0xd4   : > { %v5574_v27 = vpop.permute.xlu1 %5573  ;;  %v499_v35 = vmax.f32 %v6339_v7, %v5566_v25  ;;  %v498_v36 = vmax.f32 %v6335_v4, %v5565_v26  ;;  %v6453_v4 = vsel %vm730_vm1, %v732_v30, %v734_v31  ;;  %v6494_v30 = vmax.f32 %v293_v6, %v4345_v8  ;;  %v297_v8 = vld [vmem:[%s6321_s30 + $0x180] sm:$0xff] }
  0xd5   : > { %v5575_v37 = vunpack.i.l.bf16 %v5574_v27  ;;  %v5569_v41 = vpop.permute.xlu0 %5568  ;;  %v5576_v42 = vunpack.i.h.bf16 %v5574_v27  ;;  %8790 = vst [vmem:[#allocation14_spill] sm:$0xff] %v6453_v4  ;;  %v5612_v13 = vpack.i.bf16 %v6453_v4, %v6450_v55  ;;  %v4353_v55 = vld [vmem:[%s6321_s30 + $0x1d0] sm:$0xff] }
  0xd6   : > { %v567_v44 = vrot.slane %v499_v35, 7  ;;  %v566_v45 = vrot.slane %v498_v36, 7  ;;  %v5571_v46 = vunpack.i.h.bf16 %v5569_v41  ;;  %v5570_v49 = vunpack.i.l.bf16 %v5569_v41 }
  0xd7   : > { %v502_v58 = vmax.f32 %v6353_v17, %v5575_v37  ;;  %v503_v63 = vmax.f32 %v6355_v18, %v5576_v42  ;;  %v6501_v36 = vmax.f32 %v294_v14, %v4346_v15  ;;  %v298_v15 = vld [vmem:[%s6321_s30 + $0x188] sm:$0xff] }
  0xd8   : > { %v6456_v7 = vsel %vm563_vm0, 0.0, %v566_v45  ;;  %v501_v56 = vmax.f32 %v6346_v12, %v5571_v46  ;;  %v500_v57 = vmax.f32 %v6344_v11, %v5570_v49  ;;  %v5579_v59 = vpop.permute.xlu1 %5578  ;;  %v6462_v62 = vsel %vm563_vm0, %v566_v45, %v567_v44  ;;  %v295_v45 = vld [vmem:[%s6321_s30 + $0x160] sm:$0xff] }
  0xd9   : > { %v6470_v2 = vsel %vm563_vm0, %v567_v44, 0.0  ;;  %v5607_v11 = vpack.i.bf16 %v6462_v62, %v6456_v7  ;;  %v5581_v17 = vunpack.i.h.bf16 %v5579_v59  ;;  %v5580_v5 = vunpack.i.l.bf16 %v5579_v59  ;;  %v5584_v25 = vpop.permute.xlu0 %5583 }
  0xda   : > { %v570_v12 = vrot.slane %v501_v56, 7  ;;  %v569_v3 = vrot.slane %v500_v57, 7  ;;  %v572_v9 = vrot.slane %v502_v58, 7  ;;  %v739_v19 = vrot.slane %v6470_v2, 1  ;;  %v4347_v56 = vld [vmem:[%s6321_s30 + $0x170] sm:$0xff]  ;;  %v4348_v57 = vld [vmem:[%s6321_s30 + $0x178] sm:$0xff] }
  0xdb   : > { %5608 = vrot.lane.b32.xlu0 %v5607_v11, %s6154_s24  ;;  %v573_v20 = vrot.slane %v503_v63, 7  ;;  %v736_v24 = vrot.slane %v6456_v7, 1  ;;  %v505_v27 = vmax.f32 %v6370_v28, %v5581_v17  ;;  %v504_v34 = vmax.f32 %v6361_v23, %v5580_v5 }
  0xdc   : > { %v6477_v18 = vsel %vm563_vm0, 0.0, %v569_v3  ;;  %v6481_v10 = vsel %vm563_vm0, %v569_v3, %v570_v12  ;;  %v6497_v31 = vsel %vm563_vm0, %v570_v12, 0.0  ;;  %v737_v35 = vrot.slane %v6462_v62, 1  ;;  %v5589_v51 = vpop.permute.xlu1 %5588 }
  0xdd   : > { %v5622_v26 = vpack.i.bf16 %v6481_v10, %v6477_v18  ;;  %v6504_v37 = vsel %vm563_vm0, 0.0, %v572_v9  ;;  %v576_v28 = vrot.slane %v505_v27, 7  ;;  %v5586_v40 = vunpack.i.h.bf16 %v5584_v25 }
  0xde   : > { %v5585_v41 = vunpack.i.l.bf16 %v5584_v25  ;;  %v575_v42 = vrot.slane %v504_v34, 7  ;;  %v6509_v23 = vsel %vm730_vm1, %v736_v24, %v737_v35  ;;  %v6512_v43 = vsel %vm730_vm1, %v737_v35, %v739_v19  ;;  %v4349_v19 = vld [vmem:[%s6321_s30 + $0x190] sm:$0xff] }
  0xdf   : > { %5623 = vrot.lane.b32.xlu1 %v5622_v26, %s6154_s24  ;;  %5613 = vrot.lane.b32.xlu0 %v5612_v13, %s6154_s24  ;;  %8791 = vst [vmem:[#allocation15_spill] sm:$0xff] %v6509_v23  ;;  %8792 = vst [vmem:[#allocation16_spill] sm:$0xff] %v6512_v43  ;;  %v6515_v44 = vsel %vm563_vm0, %v572_v9, %v573_v20  ;;  %v6519_v46 = vsel %vm563_vm0, %v573_v20, 0.0  ;;  %v5627_v49 = vpack.i.bf16 %v6512_v43, %v6509_v23  ;;  %v4350_v20 = vld [vmem:[%s6321_s30 + $0x198] sm:$0xff] }
  0xe0   : > { %v507_v50 = vmax.f32 %v6377_v33, %v5586_v40  ;;  %v744_v58 = vrot.slane %v6497_v31, 1  ;;  %v506_v59 = vmax.f32 %v6375_v32, %v5585_v41  ;;  %v741_v63 = vrot.slane %v6477_v18, 1  ;;  %v5594_v41 = vpop.permute.xlu0 %5593 }
  0xe1   : > { %v742_v12 = vrot.slane %v6481_v10, 1  ;;  %v6532_v3 = vsel %vm563_vm0, 0.0, %v575_v42  ;;  %v5632_v33 = vpack.i.bf16 %v6515_v44, %v6504_v37  ;;  %v5637_v32 = vpack.i.bf16 %v6501_v36, %v6494_v30 }
  0xe2   : > { %v6541_v11 = vsel %vm563_vm0, %v575_v42, %v576_v28  ;;  %v5591_v17 = vunpack.i.h.bf16 %v5589_v51  ;;  %v6543_v5 = vmax.f32 %v295_v45, %v4347_v56  ;;  %v6545_v6 = vmax.f32 %v296_v54, %v4348_v57 }
  0xe3   : > { %5618 = vrot.lane.b32.xlu0 %v5617_v29, %s6154_s24  ;;  %5628 = vrot.lane.b32.xlu1 %v5627_v49, %s6154_s24  ;;  %v749_v9 = vrot.slane %v6519_v46, 1  ;;  %v579_v13 = vrot.slane %v507_v50, 7  ;;  %v5590_v14 = vunpack.i.l.bf16 %v5589_v51  ;;  %v578_v24 = vrot.slane %v506_v59, 7 }
  0xe4   : > { %v6553_v25 = vsel %vm730_vm1, %v741_v63, %v742_v12  ;;  %v6556_v26 = vsel %vm730_vm1, %v742_v12, %v744_v58  ;;  %v5647_v27 = vpack.i.bf16 %v6541_v11, %v6532_v3  ;;  %v6563_v29 = vmax.f32 %v6387_v39, %v5591_v17 }
  0xe5   : > { %8793 = vst [vmem:[#allocation17_spill] sm:$0xff] %v6553_v25  ;;  %8794 = vst [vmem:[#allocation18_spill] sm:$0xff] %v6556_v26  ;;  %v508_v34 = vmax.f32 %v6385_v38, %v5590_v14  ;;  %v746_v35 = vrot.slane %v6504_v37, 1  ;;  %v747_v40 = vrot.slane %v6515_v44, 1  ;;  %v5652_v42 = vpack.i.bf16 %v6545_v6, %v6543_v5  ;;  %v299_v14 = vld [vmem:[%s6321_s30 + $0x1a0] sm:$0xff] }
  0xe6   : > { %v6570_v45 = vmax.f32 %v297_v8, %v4349_v19  ;;  %v6572_v49 = vmax.f32 %v298_v15, %v4350_v20  ;;  %v6575_v50 = vsel %vm563_vm0, %v576_v28, 0.0  ;;  %v5642_v39 = vpack.i.bf16 %v6556_v26, %v6553_v25  ;;  %v5599_v8 = vpop.permute.xlu1 %5598  ;;  %v5904_v25 = vld [vmem:[#allocation5 + $0x110] sm:$0xff]  }
  0xe7   : > { %5633 = vrot.lane.b32.xlu0 %v5632_v33, %s6154_s24  ;;  %5638 = vrot.lane.b32.xlu1 %v5637_v32, %s6154_s24  ;;  %v6580_v38 = vsel %vm730_vm1, %v746_v35, %v747_v40  ;;  %v6583_v51 = vsel %vm730_vm1, %v747_v40, %v749_v9  ;;  %v6586_v54 = vsel %vm563_vm0, %v579_v13, 0.0  ;;  %v6589_v56 = vsel %vm563_vm0, 0.0, %v578_v24 }
  0xe8   : > { %8795 = vst [vmem:[#allocation19_spill] sm:$0xff] %v6580_v38  ;;  %8796 = vst [vmem:[#allocation20_spill] sm:$0xff] %v6583_v51  ;;  %v5596_v57 = vunpack.i.h.bf16 %v5594_v41  ;;  %v5595_v58 = vunpack.i.l.bf16 %v5594_v41  ;;  %v582_v28 = vrot.slane %v6563_v29, 7  ;;  %v581_v59 = vrot.slane %v508_v34, 7  ;;  %v4352_v29 = vld [vmem:[%s6321_s30 + $0x1b8] sm:$0xff] }
  0xe9   : > { %v5657_v63 = vpack.i.bf16 %v6583_v51, %v6580_v38  ;;  %v6597_v12 = vsel %vm563_vm0, %v578_v24, %v579_v13  ;;  %v754_v33 = vrot.slane %v6575_v50, 1  ;;  %v751_v32 = vrot.slane %v6532_v3, 1  ;;  %v300_v24 = vld [vmem:[%s6321_s30 + $0x1a8] sm:$0xff] }
  0xea   : > { %v752_v17 = vrot.slane %v6541_v11, 1  ;;  %v5667_v9 = vpack.i.bf16 %v6572_v49, %v6570_v45  ;;  %v759_v15 = vrot.slane %v6586_v54, 1  ;;  %v5662_v19 = vpack.i.bf16 %v6597_v12, %v6589_v56 }
  0xeb   : > { %5643 = vrot.lane.b32.xlu0 %v5642_v39, %s6154_s24  ;;  %5648 = vrot.lane.b32.xlu1 %v5647_v27, %s6154_s24  ;;  %v511_v20 = vmax.f32 %v6400_v48, %v5596_v57  ;;  %v510_v13 = vmax.f32 %v6398_v47, %v5595_v58  ;;  %v4351_v27 = vld [vmem:[%s6321_s30 + $0x1b0] sm:$0xff]  ;;  %v6614_v34 = vsel %vm563_vm0, 0.0, %v581_v59  ;;  %v6619_v35 = vsel %vm563_vm0, %v581_v59, %v582_v28  ;;  %v5604_v57 = vpop.permute.xlu1 %5603 }
  0xec   : > { %v5601_v40 = vunpack.i.h.bf16 %v5599_v8  ;;  %v5600_v41 = vunpack.i.l.bf16 %v5599_v8  ;;  %v6622_v48 = vsel %vm730_vm1, %v751_v32, %v752_v17  ;;  %v6625_v47 = vsel %vm730_vm1, %v752_v17, %v754_v33  ;;  %v301_v8 = vld [vmem:[%s6321_s30 + $0x1c0] sm:$0xff] }
  0xed   : > { %8797 = vst [vmem:[#allocation21_spill] sm:$0xff] %v6622_v48  ;;  %8798 = vst [vmem:[#allocation22_spill] sm:$0xff] %v6625_v47  ;;  %v756_v39 = vrot.slane %v6589_v56, 1  ;;  %v6629_v58 = vmax.f32 %v299_v14, %v4351_v27  ;;  %v585_v59 = vrot.slane %v511_v20, 7  ;;  %v584_v4 = vrot.slane %v510_v13, 7  ;;  %v4354_v27 = vld [vmem:[%s6321_s30 + $0x1d8] sm:$0xff] }
  0xee   : > { %v5677_v32 = vpack.i.bf16 %v6619_v35, %v6614_v34  ;;  %v5672_v33 = vpack.i.bf16 %v6625_v47, %v6622_v48  ;;  %v513_v17 = vmax.f32 %v6409_v53, %v5601_v40  ;;  %v512_v14 = vmax.f32 %v6407_v52, %v5600_v41 }
  0xef   : > { %5653 = vrot.lane.b32.xlu0 %v5652_v42, %s6154_s24  ;;  %5658 = vrot.lane.b32.xlu1 %v5657_v63, %s6154_s24  ;;  %v757_v42 = vrot.slane %v6597_v12, 1  ;;  %v6631_v63 = vmax.f32 %v300_v24, %v4352_v29  ;;  %v302_v24 = vld [vmem:[%s6321_s30 + $0x1c8] sm:$0xff]  ;;  %v5606_v20 = vunpack.i.h.bf16 %v5604_v57  ;;  %v6656_v47 = vmax.f32 %v301_v8, %v4353_v55 }
  0xf0   : > { %v5605_v53 = vunpack.i.l.bf16 %v5604_v57  ;;  %v6659_v52 = vsel %vm563_vm0, %v585_v59, 0.0  ;;  %v6662_v40 = vsel %vm563_vm0, 0.0, %v584_v4  ;;  %v6665_v41 = vsel %vm563_vm0, %v584_v4, %v585_v59 }
  0xf1   : > { %v6646_v13 = vsel %vm730_vm1, %v756_v39, %v757_v42  ;;  %v6649_v29 = vsel %vm730_vm1, %v757_v42, %v759_v15  ;;  %v6667_v15 = vmax.f32 %v302_v24, %v4354_v27  ;;  %v588_v55 = vrot.slane %v513_v17, 7 }
  0xf2   : > { %8799 = vst [vmem:[#allocation23_spill] sm:$0xff] %v6646_v13  ;;  %8800 = vst [vmem:[#allocation24_spill] sm:$0xff] %v6649_v29  ;;  %v5687_v39 = vpack.i.bf16 %v6649_v29, %v6646_v13  ;;  %v515_v42 = vmax.f32 %v6423_v61, %v5606_v20  ;;  %v761_v4 = vrot.slane %v6614_v34, 1  ;;  %v762_v59 = vrot.slane %v6619_v35, 1  ;;  %v304_v61 = vld [vmem:[%s6321_s30 + $0x1e8] sm:$0xff]  ;;  %v4356_v29 = vld [vmem:[%s6321_s30 + $0x1f8] sm:$0xff] }
  0xf3   : > { %5663 = vrot.lane.b32.xlu0 %v5662_v19, %s6154_s24  ;;  %5668 = vrot.lane.b32.xlu1 %v5667_v9, %s6154_s24  ;;  %v6652_v19 = vsel %vm563_vm0, %v582_v28, 0.0  ;;  %v5682_v9 = vpack.i.bf16 %v6631_v63, %v6629_v58  ;;  %v587_v28 = vrot.slane %v512_v14, 7  ;;  %v514_v8 = vmax.f32 %v6421_v60, %v5605_v53  ;;  %v303_v14 = vld [vmem:[%s6321_s30 + $0x1e0] sm:$0xff]  ;;  %v4355_v53 = vld [vmem:[%s6321_s30 + $0x1f0] sm:$0xff]  ;;  %s4207_s30 = scalar_lea.sflag [#allocation4], %s6317_s16 }
  0xf4   : > { %v764_v57 = vrot.slane %v6652_v19, 1  ;;  %v5697_v17 = vpack.i.bf16 %v6667_v15, %v6656_v47  ;;  %v6686_v24 = vsel %vm563_vm0, %v588_v55, 0.0  ;;  %v591_v60 = vrot.slane %v515_v42, 7 }
  0xf5   : > { %v6689_v27 = vsel %vm563_vm0, 0.0, %v587_v28  ;;  %v6694_v20 = vsel %vm563_vm0, %v587_v28, %v588_v55  ;;  %v6699_v13 = vsel %vm730_vm1, %v761_v4, %v762_v59  ;;  %v766_v51 = vrot.slane %v6662_v40, 1 }
  0xf6   : > { %8801 = vst [vmem:[#allocation25_spill] sm:$0xff] %v6699_v13  ;;  %v6702_v48 = vsel %vm730_vm1, %v762_v59, %v764_v57  ;;  %v767_v38 = vrot.slane %v6665_v41, 1  ;;  %v590_v26 = vrot.slane %v514_v8, 7  ;;  %v774_v55 = vrot.slane %v6686_v24, 1 }
  0xf7   : > { %5673 = vrot.lane.b32.xlu0 %v5672_v33, %s6154_s24  ;;  %5678 = vrot.lane.b32.xlu1 %v5677_v32, %s6154_s24  ;;  %v769_v33 = vrot.slane %v6659_v52, 1  ;;  %v5692_v32 = vpack.i.bf16 %v6665_v41, %v6662_v40  ;;  %8802 = vst [vmem:[#allocation26_spill] sm:$0xff] %v6702_v48  ;;  %v6714_v28 = vsel %vm563_vm0, %v591_v60, 0.0  ;;  %v5702_v42 = vpack.i.bf16 %v6702_v48, %v6699_v13 }
  0xf8   : > { %v5707_v57 = vpack.i.bf16 %v6694_v20, %v6689_v27  ;;  %v6721_v4 = vsel %vm730_vm1, %v766_v51, %v767_v38  ;;  %v771_v59 = vrot.slane %v6689_v27, 1  ;;  %v772_v8 = vrot.slane %v6694_v20, 1 }
  0xf9   : > { %8803 = vst [vmem:[#allocation27_spill] sm:$0xff] %v6721_v4 }
  0xfb   : > { %5683 = vrot.lane.b32.xlu0 %v5682_v9, %s6154_s24  ;;  %5688 = vrot.lane.b32.xlu1 %v5687_v39, %s6154_s24  ;;  %v6706_v9 = vmax.f32 %v303_v14, %v4355_v53  ;;  %v6708_v39 = vmax.f32 %v304_v61, %v4356_v29  ;;  %v6724_v29 = vsel %vm730_vm1, %v767_v38, %v769_v33  ;;  %v779_v14 = vrot.slane %v6714_v28, 1 }
  0xfc   : > { %8804 = vst [vmem:[#allocation28_spill] sm:$0xff] %v6724_v29  ;;  %v5717_v51 = vpack.i.bf16 %v6724_v29, %v6721_v4  ;;  %v6742_v33 = vsel %vm730_vm1, %v771_v59, %v772_v8  ;;  %v6745_v61 = vsel %vm730_vm1, %v772_v8, %v774_v55  ;;  %v5903_v8 = vld [vmem:[#allocation5 + $0x118] sm:$0xff]  }
  0xfd   : > { %v5712_v38 = vpack.i.bf16 %v6708_v39, %v6706_v9  ;;  %8806 = vst [vmem:[#allocation30_spill] sm:$0xff] %v6742_v33  ;;  %8807 = vst [vmem:[#allocation31_spill] sm:$0xff] %v6745_v61  ;;  %5398 = vmatprep.subr.bf16.mxu0 %v5903_v8 }
  0xff   : > { %5693 = vrot.lane.b32.xlu0 %v5692_v32, %s6154_s24  ;;  %5698 = vrot.lane.b32.xlu1 %v5697_v17, %s6154_s24  ;;  %v6729_v32 = vsel %vm563_vm0, 0.0, %v590_v26  ;;  %v6732_v17 = vsel %vm563_vm0, %v590_v26, %v591_v60 }
 0x100   : > { %8805 = vst [vmem:[#allocation29_spill] sm:$0xff] %v6732_v17  ;;  %v776_v26 = vrot.slane %v6729_v32, 1  ;;  %v777_v60 = vrot.slane %v6732_v17, 1  ;;  %v5722_v53 = vpack.i.bf16 %v6732_v17, %v6729_v32 }
 0x102   : > { %v6759_v55 = vsel %vm730_vm1, %v777_v60, %v779_v14 }
 0x103   : > { %5703 = vrot.lane.b32.xlu0 %v5702_v42, %s6154_s24  ;;  %5708 = vrot.lane.b32.xlu1 %v5707_v57, %s6154_s24  ;;  %v5727_v42 = vpack.i.bf16 %v6745_v61, %v6742_v33  ;;  %v6756_v57 = vsel %vm730_vm1, %v776_v26, %v777_v60  ;;  %8809 = vst [vmem:[#allocation33_spill] sm:$0xff] %v6759_v55  ;;  %v911_v26 = vrot.slane %v6438_v22, 2  ;;  %v914_v61 = vrot.slane %v6462_v62, 2 }
 0x104   : > { %8808 = vst [vmem:[#allocation32_spill] sm:$0xff] %v6756_v57  ;;  %v5737_v59 = vpack.i.bf16 %v6759_v55, %v6756_v57  ;;  %v913_v57 = vrot.slane %v6456_v7, 2 }
 0x107   : > { %5713 = vrot.lane.b32.xlu0 %v5712_v38, %s6154_s24  ;;  %5718 = vrot.lane.b32.xlu1 %v5717_v51, %s6154_s24  ;;  %v908_v38 = vrot.slane %v6434_v21, 2  ;;  %v909_v51 = vrot.slane %v6430_v16, 2 }
 0x109   : > { %v6770_v60 = vsel %vm907_vm2, %v908_v38, %v909_v51 }
 0x10a   : > { %8810 = vst [vmem:[#allocation34_spill] sm:$0xff] %v6770_v60 }
 0x10b   : > { %5723 = vrot.lane.b32.xlu0 %v5722_v53, %s6154_s24  ;;  %5728 = vrot.lane.b32.xlu1 %v5727_v42, %s6154_s24  ;;  %v6773_v53 = vsel %vm907_vm2, %v909_v51, %v911_v26 }
 0x10c   : > { %8811 = vst [vmem:[#allocation35_spill] sm:$0xff] %v6773_v53 }
 0x10f   : > { %5738 = vrot.lane.b32.xlu1 %v5737_v59, %s6154_s24  ;;  %v916_v59 = vrot.slane %v6470_v2, 2  ;;  %v6783_v2 = vsel %vm907_vm2, %v913_v57, %v914_v61 }
 0x14d   : > { %v5609_v14 = vpop.permute.xlu0 %5608 }
 0x14e   : > { %v5611_v42 = vunpack.i.h.bf16 %v5609_v14  ;;  %v5610_v55 = vunpack.i.l.bf16 %v5609_v14  ;;  %v6786_v14 = vsel %vm907_vm2, %v914_v61, %v916_v59 }
 0x150   : > { %v1297_v22 = vsel %vm1264_vm3, %v6770_v60, %v5610_v55  ;;  %v1298_v33 = vsel %vm1264_vm3, %v6773_v53, %v5611_v42 }
 0x151   : > { %v5624_v38 = vpop.permute.xlu1 %5623  ;;  %v5614_v29 = vpop.permute.xlu0 %5613  ;;  %v1364_v4 = vpack.c.bf16 %v1298_v33, %v1297_v22 }
 0x152   : > { %v5626_v51 = vunpack.i.h.bf16 %v5624_v38  ;;  %v5625_v26 = vunpack.i.l.bf16 %v5624_v38  ;;  %v5616_v48 = vunpack.i.h.bf16 %v5614_v29  ;;  %v5615_v13 = vunpack.i.l.bf16 %v5614_v29 }
 0x153   : > { %1803 = vmatprep.mubr.bf16.mxu0 %v1364_v4 }
 0x154   : > { %v1265_v55 = vsel %vm1264_vm3, %v6434_v21, %v5615_v13  ;;  %v1266_v42 = vsel %vm1264_vm3, %v6430_v16, %v5616_v48  ;;  %v1299_v33 = vsel %vm1264_vm3, %v6783_v2, %v5625_v26  ;;  %v1300_v22 = vsel %vm1264_vm3, %v6786_v14, %v5626_v51 }
 0x155   : > { %v5619_v29 = vpop.permute.xlu0 %5618  ;;  %v5629_v4 = vpop.permute.xlu1 %5628  ;;  %v6796_v38 = vpack.c.bf16 %v1266_v42, %v1265_v55  ;;  %v1369_v57 = vpack.c.bf16 %v1300_v22, %v1299_v33  ;;  %v918_v21 = vrot.slane %v6477_v18, 2  ;;  %v919_v51 = vrot.slane %v6481_v10, 2 }
 0x156   : > { %v5621_v53 = vunpack.i.h.bf16 %v5619_v29  ;;  %v5620_v61 = vunpack.i.l.bf16 %v5619_v29  ;;  %v5631_v59 = vunpack.i.h.bf16 %v5629_v4  ;;  %v5630_v60 = vunpack.i.l.bf16 %v5629_v4 }
 0x157   : > { %8812 = vst [vmem:[#allocation36_spill] sm:$0xff] %v6796_v38  ;;  %1804 = vmatmul.mubr.bf16.vlgmr.msra.gmra.mxu0 %v6796_v38  ;;  %v921_v26 = vrot.slane %v6497_v31, 2  ;;  %v926_v55 = vrot.slane %v6519_v46, 2  ;;  %v923_v42 = vrot.slane %v6504_v37, 2 }
 0x158   : > { %v517_v48 = vmax.f32 %v6467_v1, %v5621_v53  ;;  %v516_v13 = vmax.f32 %v6465_v0, %v5620_v61  ;;  %1811 = vmatprep.mubr.bf16.mxu0 %v1369_v57  ;;  %v1267_v29 = vsel %vm1264_vm3, %v6456_v7, %v5630_v60  ;;  %5399 = vmatpush3.bf16.msra.mxu0 %v5903_v8  ;;  %v5905_v53 = vld [vmem:[#allocation5 + $0x108] sm:$0xff]  }
 0x159   : > { %v5634_v33 = vpop.permute.xlu0 %5633  ;;  %v5639_v22 = vpop.permute.xlu1 %5638  ;;  %v1268_v0 = vsel %vm1264_vm3, %v6462_v62, %v5631_v59  ;;  %5400 = vmatprep.subr.bf16.mxu0 %v5904_v25  ;;  %v6821_v8 = vsel %vm907_vm2, %v918_v21, %v919_v51 }
 0x15a   : > { %v594_v4 = vrot.slane %v517_v48, 7  ;;  %v593_v16 = vrot.slane %v516_v13, 7  ;;  %v5635_v1 = vunpack.i.l.bf16 %v5634_v33  ;;  %v5636_v57 = vunpack.i.h.bf16 %v5634_v33 }
 0x15b   : > { %v5641_v46 = vunpack.i.h.bf16 %v5639_v22  ;;  %v5640_v61 = vunpack.i.l.bf16 %v5639_v22  ;;  %v1368_v48 = vpack.c.bf16 %v1268_v0, %v1267_v29  ;;  %v924_v33 = vrot.slane %v6515_v44, 2 }
 0x15c   : > { %v6812_v38 = vsel %vm563_vm0, %v594_v4, 0.0  ;;  %v6815_v43 = vsel %vm563_vm0, 0.0, %v593_v16  ;;  %v6818_v7 = vsel %vm563_vm0, %v593_v16, %v594_v4  ;;  %v1301_v13 = vsel %vm1264_vm3, %v6821_v8, %v5635_v1  ;;  %5401 = vmatpush3.bf16.msra.mxu0 %v5904_v25 }
 0x15d   : > { %v519_v62 = vmax.f32 %v6501_v36, %v5641_v46  ;;  %v5644_v60 = vpop.permute.xlu0 %5643  ;;  %v6824_v59 = vpop.permute.xlu1 %5648  ;;  %v518_v22 = vmax.f32 %v6494_v30, %v5640_v61  ;;  %v6831_v4 = vsel %vm907_vm2, %v919_v51, %v921_v26  ;;  %5402 = vmatprep.subr.bf16.mxu0 %v5905_v53  ;;  %v784_v36 = vrot.slane %v6812_v38, 1 }
 0x15e   : > { %v5646_v31 = vunpack.i.h.bf16 %v5644_v60  ;;  %v5645_v16 = vunpack.i.l.bf16 %v5644_v60  ;;  %v5732_v29 = vpack.i.bf16 %v6818_v7, %v6815_v43  ;;  %v1302_v1 = vsel %vm1264_vm3, %v6831_v4, %v5636_v57 }
 0x15f   : > { %v597_v21 = vrot.slane %v519_v62, 7  ;;  %1812 = vmatmul.mubr.bf16.gmra.mxu0 %v1368_v48  ;;  %v596_v0 = vrot.slane %v518_v22, 7  ;;  %v1373_v25 = vpack.c.bf16 %v1302_v1, %v1301_v13  ;;  %v781_v30 = vrot.slane %v6815_v43, 1 }
 0x160   : > { %v782_v46 = vrot.slane %v6818_v7, 1  ;;  %5733 = vrot.lane.b32.xlu0 %v5732_v29, %s6154_s24  ;;  %v1269_v60 = vsel %vm1264_vm3, %v6477_v18, %v5645_v16  ;;  %v1270_v57 = vsel %vm1264_vm3, %v6481_v10, %v5646_v31  ;;  %5403 = vmatpush3.bf16.msra.mxu0 %v5905_v53  ;;  %v5651_v48 = vunpack.i.h.bf16 %v6824_v59  ;;  %v5906_v10 = vld [vmem:[#allocation5 + $0xf8] sm:$0xff]  }
 0x161   : > { %v6842_v26 = vsel %vm563_vm0, %v597_v21, 0.0  ;;  %v5654_v61 = vpop.permute.xlu0 %5653  ;;  %v5659_v62 = vpop.permute.xlu1 %5658  ;;  %1819 = vmatprep.mubr.bf16.mxu0 %v1373_v25  ;;  %v6851_v22 = vsel %vm907_vm2, %v923_v42, %v924_v33  ;;  %v6854_v1 = vsel %vm907_vm2, %v924_v33, %v926_v55  ;;  %v6858_v51 = vsel %vm563_vm0, 0.0, %v596_v0  ;;  %v5907_v53 = vld [vmem:[#allocation5 + $0xb8] sm:$0xff]   ;;  %4794 = vmatprep.subr.bf16.mxu1 %v5906_v10  ;;  %v5908_v10 = vld [vmem:[#allocation5 + $0xf0] sm:$0xff]  }
 0x162   : > { %8813 = vst [vmem:[#allocation37_spill] sm:$0xff] %v6842_v26  ;;  %v5656_v13 = vunpack.i.h.bf16 %v5654_v61  ;;  %v789_v29 = vrot.slane %v6842_v26, 1  ;;  %v5650_v18 = vunpack.i.l.bf16 %v6824_v59  ;;  %v5655_v16 = vunpack.i.l.bf16 %v5654_v61  ;;  %4795 = vmatpush3.bf16.msra.mxu1 %v5907_v53  ;;  %v5909_v53 = vld [vmem:[#allocation5 + $0xb0] sm:$0xff]  }
 0x163   : > { %v6863_v25 = vsel %vm730_vm1, %v781_v30, %v782_v46  ;;  %v6866_v42 = vsel %vm730_vm1, %v782_v46, %v784_v36  ;;  %v1366_v55 = vpack.c.bf16 %v1270_v57, %v1269_v60  ;;  %v5660_v23 = vunpack.i.l.bf16 %v5659_v62  ;;  %4796 = vmatprep.subr.bf16.mxu1 %v5908_v10 }
 0x164   : > { %v521_v31 = vmax.f32 %v6545_v6, %v5656_v13  ;;  %8814 = vst [vmem:[#allocation38_spill] sm:$0xff] %v6863_v25  ;;  %8815 = vst [vmem:[#allocation39_spill] sm:$0xff] %v6866_v42  ;;  %v520_v33 = vmax.f32 %v6543_v5, %v5655_v16  ;;  %v5747_v26 = vpack.i.bf16 %v6866_v42, %v6863_v25  ;;  %v5661_v30 = vunpack.i.h.bf16 %v5659_v62 }
 0x165   : > { %v6872_v59 = vsel %vm563_vm0, %v596_v0, %v597_v21  ;;  %v6874_v61 = vpop.permute.xlu0 %5663  ;;  %v5669_v17 = vpop.permute.xlu1 %5668  ;;  %1964 = vmatprep.mubr.bf16.mxu1 %v1366_v55  ;;  %v786_v46 = vrot.slane %v6858_v51, 1  ;;  %v1303_v62 = vsel %vm1264_vm3, %v6851_v22, %v5650_v18  ;;  %v1304_v16 = vsel %vm1264_vm3, %v6854_v1, %v5651_v48 }
 0x166   : > { %8816 = vst [vmem:[#allocation40_spill] sm:$0xff] %v6872_v59  ;;  %v600_v6 = vrot.slane %v521_v31, 7  ;;  %v5742_v36 = vpack.i.bf16 %v6872_v59, %v6858_v51  ;;  %v599_v5 = vrot.slane %v520_v33, 7  ;;  %5748 = vrot.lane.b32.xlu1 %v5747_v26, %s6154_s24  ;;  %v5671_v60 = vunpack.i.h.bf16 %v5669_v17  ;;  %4797 = vmatpush3.bf16.msra.mxu1 %v5909_v53  ;;  %v5910_v53 = vld [vmem:[#allocation5 + $0xe8] sm:$0xff]  }
 0x167   : > { %v5670_v57 = vunpack.i.l.bf16 %v5669_v17  ;;  %v787_v21 = vrot.slane %v6872_v59, 1  ;;  %1820 = vmatmul.mubr.bf16.gmra.mxu0 %v1366_v55  ;;  %v1271_v33 = vsel %vm1264_vm3, %v6504_v37, %v5660_v23  ;;  %v1377_v23 = vpack.c.bf16 %v1304_v16, %v1303_v62  ;;  %4798 = vmatprep.subr.bf16.mxu1 %v5910_v53 }
 0x168   : > { %5743 = vrot.lane.b32.xlu0 %v5742_v36, %s6154_s24  ;;  %v523_v17 = vmax.f32 %v6572_v49, %v5671_v60  ;;  %v929_v36 = vrot.slane %v6541_v11, 2  ;;  %v1272_v49 = vsel %vm1264_vm3, %v6515_v44, %v5661_v30  ;;  %v6907_v60 = vsel %vm563_vm0, %v600_v6, 0.0 }
 0x169   : > { %v6890_v31 = vpop.permute.xlu0 %5673  ;;  %v6892_v55 = vpop.permute.xlu1 %5678  ;;  %v522_v18 = vmax.f32 %v6570_v45, %v5670_v57  ;;  %v6899_v0 = vsel %vm730_vm1, %v786_v46, %v787_v21  ;;  %v6902_v48 = vsel %vm730_vm1, %v787_v21, %v789_v29  ;;  %v6910_v26 = vsel %vm563_vm0, 0.0, %v599_v5  ;;  %1827 = vmatprep.mubr.bf16.mxu0 %v1377_v23 }
 0x16a   : > { %8817 = vst [vmem:[#allocation41_spill] sm:$0xff] %v6899_v0  ;;  %8818 = vst [vmem:[#allocation42_spill] sm:$0xff] %v6902_v48  ;;  %v5757_v37 = vpack.i.bf16 %v6902_v48, %v6899_v0  ;;  %v5665_v29 = vunpack.i.l.bf16 %v6874_v61  ;;  %v603_v46 = vrot.slane %v523_v17, 7  ;;  %v5666_v44 = vunpack.i.h.bf16 %v6874_v61  ;;  %v5911_v17 = vld [vmem:[#allocation5 + $0xa8] sm:$0xff]  }
 0x16b   : > { %v602_v57 = vrot.slane %v522_v18, 7  ;;  %v6919_v30 = vsel %vm563_vm0, %v599_v5, %v600_v6  ;;  %v6923_v13 = vpack.c.bf16 %v1272_v49, %v1271_v33  ;;  %v8820_v62 = vrot.slane %v6532_v3, 2  ;;  %4799 = vmatpush3.bf16.msra.mxu1 %v5911_v17 }
 0x16c   : > { %5758 = vrot.lane.b32.xlu1 %v5757_v37, %s6154_s24  ;;  %v794_v61 = vrot.slane %v6907_v60, 1  ;;  %v5752_v6 = vpack.i.bf16 %v6919_v30, %v6910_v26  ;;  %v791_v5 = vrot.slane %v6910_v26, 1  ;;  %v5912_v37 = vld [vmem:[#allocation5 + $0xe0] sm:$0xff]   ;;  %v8821_v23 = vrot.slane %v6575_v50, 2 }
 0x16d   : > { %v5684_v21 = vpop.permute.xlu0 %5683  ;;  %v6921_v10 = vpop.permute.xlu1 %5688  ;;  %8819 = vst [vmem:[#allocation43_spill] sm:$0xff] %v6923_v13  ;;  %v6928_v16 = vsel %vm907_vm2, %v8820_v62, %v929_v36  ;;  %v6932_v18 = vsel %vm563_vm0, 0.0, %v602_v57  ;;  %v934_v45 = vrot.slane %v6597_v12, 2  ;;  %v6945_v48 = vsel %vm563_vm0, %v603_v46, 0.0  ;;  %4800 = vmatprep.subr.bf16.mxu1 %v5912_v37 }
 0x16e   : > { %v5686_v33 = vunpack.i.h.bf16 %v5684_v21  ;;  %v5685_v49 = vunpack.i.l.bf16 %v5684_v21  ;;  %v6941_v62 = vsel %vm907_vm2, %v929_v36, %v8821_v23  ;;  %5753 = vrot.lane.b32.xlu0 %v5752_v6, %s6154_s24  ;;  %v792_v0 = vrot.slane %v6919_v30, 1 }
 0x16f   : > { %1828 = vmatmul.mubr.bf16.gmra.mxu0 %v6923_v13  ;;  %v6950_v42 = vsel %vm563_vm0, %v602_v57, %v603_v46  ;;  %v1305_v21 = vsel %vm1264_vm3, %v6928_v16, %v5665_v29  ;;  %v1306_v23 = vsel %vm1264_vm3, %v6941_v62, %v5666_v44  ;;  %v5913_v46 = vld [vmem:[#allocation5 + $0xa0] sm:$0xff]   ;;  %v5675_v57 = vunpack.i.l.bf16 %v6890_v31 }
 0x170   : > { %v525_v50 = vmax.f32 %v6631_v63, %v5686_v33  ;;  %v524_v36 = vmax.f32 %v6629_v58, %v5685_v49  ;;  %v5762_v53 = vpack.i.bf16 %v6950_v42, %v6932_v18  ;;  %v6964_v29 = vsel %vm730_vm1, %v791_v5, %v792_v0  ;;  %4801 = vmatpush3.bf16.msra.mxu1 %v5913_v46 }
 0x171   : > { %v6960_v6 = vpop.permute.xlu0 %5693  ;;  %v5699_v25 = vpop.permute.xlu1 %5698  ;;  %8822 = vst [vmem:[#allocation44_spill] sm:$0xff] %v6964_v29  ;;  %v6967_v63 = vsel %vm730_vm1, %v792_v0, %v794_v61  ;;  %v1381_v58 = vpack.c.bf16 %v1306_v23, %v1305_v21  ;;  %v799_v17 = vrot.slane %v6945_v48, 1  ;;  %v796_v59 = vrot.slane %v6932_v18, 1  ;;  %v5915_v23 = vld [vmem:[#allocation5 + $0x100] sm:$0xff]  }
 0x172   : > { %8823 = vst [vmem:[#allocation45_spill] sm:$0xff] %v6967_v63  ;;  %v606_v33 = vrot.slane %v525_v50, 7  ;;  %v605_v49 = vrot.slane %v524_v36, 7  ;;  %v5767_v44 = vpack.i.bf16 %v6967_v63, %v6964_v29  ;;  %5763 = vrot.lane.b32.xlu0 %v5762_v53, %s6154_s24  ;;  %v5701_v37 = vunpack.i.h.bf16 %v5699_v25  ;;  %v5914_v53 = vld [vmem:[#allocation5 + $0xd8] sm:$0xff]   ;;  %5404 = vmatprep.subr.bf16.mxu0 %v5915_v23 }
 0x173   : > { %1835 = vmatprep.mubr.bf16.mxu0 %v1381_v58  ;;  %v5700_v13 = vunpack.i.l.bf16 %v5699_v25  ;;  %v797_v5 = vrot.slane %v6950_v42, 1  ;;  %v5676_v61 = vunpack.i.h.bf16 %v6890_v31  ;;  %v5681_v21 = vunpack.i.h.bf16 %v6892_v55  ;;  %v5916_v25 = vld [vmem:[#allocation5 + $0x98] sm:$0xff]   ;;  %4802 = vmatprep.subr.bf16.mxu1 %v5914_v53  ;;  %v5918_v53 = vld [vmem:[#allocation5 + $0x90] sm:$0xff]  }
 0x174   : > { %v5680_v50 = vunpack.i.l.bf16 %v6892_v55  ;;  %5768 = vrot.lane.b32.xlu1 %v5767_v44, %s6154_s24  ;;  %v6983_v58 = vsel %vm563_vm0, 0.0, %v605_v49  ;;  %v527_v63 = vmax.f32 %v6667_v15, %v5701_v37  ;;  %v6987_v0 = vsel %vm563_vm0, %v605_v49, %v606_v33  ;;  %5405 = vmatpush3.bf16.msra.mxu0 %v5915_v23 }
 0x175   : > { %v6980_v36 = vpop.permute.xlu0 %5703  ;;  %v1273_v31 = vsel %vm1264_vm3, %v6532_v3, %v5675_v57  ;;  %v526_v44 = vmax.f32 %v6656_v47, %v5700_v13  ;;  %v6994_v46 = vsel %vm730_vm1, %v796_v59, %v797_v5  ;;  %v6997_v29 = vsel %vm730_vm1, %v797_v5, %v799_v17  ;;  %4803 = vmatpush3.bf16.msra.mxu1 %v5916_v25  ;;  %v5917_v5 = vld [vmem:[#allocation5 + $0xd0] sm:$0xff]  }
 0x176   : > { %8824 = vst [vmem:[#allocation46_spill] sm:$0xff] %v6994_v46  ;;  %8825 = vst [vmem:[#allocation47_spill] sm:$0xff] %v6997_v29  ;;  %v7000_v15 = vsel %vm563_vm0, %v606_v33, 0.0  ;;  %v609_v49 = vrot.slane %v527_v63, 7  ;;  %v5777_v37 = vpack.i.bf16 %v6997_v29, %v6994_v46  ;;  %v8826_v3 = vrot.slane %v6589_v56, 2  ;;  %4804 = vmatprep.subr.bf16.mxu1 %v5917_v5  ;;  %v5919_v5 = vld [vmem:[#allocation5 + $0xc8] sm:$0xff]  }
 0x177   : > { %v608_v47 = vrot.slane %v526_v44, 7  ;;  %v5772_v59 = vpack.i.bf16 %v6987_v0, %v6983_v58  ;;  %v1274_v13 = vsel %vm1264_vm3, %v6541_v11, %v5676_v61  ;;  %v8827_v17 = vrot.slane %v6586_v54, 2 }
 0x178   : > { %v7007_v57 = vsel %vm907_vm2, %v8826_v3, %v934_v45  ;;  %5778 = vrot.lane.b32.xlu1 %v5777_v37, %s6154_s24  ;;  %v7019_v3 = vpack.c.bf16 %v1274_v13, %v1273_v31  ;;  %v939_v11 = vrot.slane %v6619_v35, 2  ;;  %v804_v54 = vrot.slane %v7000_v15, 1 }
 0x179   : > { %v7016_v63 = vsel %vm907_vm2, %v934_v45, %v8827_v17  ;;  %v5714_v33 = vpop.permute.xlu0 %5713  ;;  %v1307_v23 = vsel %vm1264_vm3, %v7007_v57, %v5680_v50  ;;  %v7028_v45 = vsel %vm563_vm0, 0.0, %v608_v47  ;;  %5773 = vrot.lane.b32.xlu0 %v5772_v59, %s6154_s24  ;;  %v944_v25 = vrot.slane %v6665_v41, 2  ;;  %4805 = vmatpush3.bf16.msra.mxu1 %v5918_v53 }
 0x17a   : > { %8828 = vst [vmem:[#allocation48_spill] sm:$0xff] %v7019_v3  ;;  %v1308_v44 = vsel %vm1264_vm3, %v7016_v63, %v5681_v21  ;;  %v5691_v31 = vunpack.i.h.bf16 %v6921_v10  ;;  %v7034_v50 = vsel %vm563_vm0, %v609_v49, 0.0  ;;  %1836 = vmatmul.mubr.bf16.gmra.mxu0 %v7019_v3  ;;  %v5716_v21 = vunpack.i.h.bf16 %v5714_v33  ;;  %4806 = vmatprep.subr.bf16.mxu1 %v5919_v5 }
 0x17b   : > { %v1385_v61 = vpack.c.bf16 %v1308_v44, %v1307_v23  ;;  %v5715_v37 = vunpack.i.l.bf16 %v5714_v33  ;;  %v5690_v13 = vunpack.i.l.bf16 %v6921_v10  ;;  %v801_v17 = vrot.slane %v6983_v58, 1  ;;  %v5920_v44 = vld [vmem:[#allocation5 + $0x88] sm:$0xff]  }
 0x17c   : > { %v802_v59 = vrot.slane %v6987_v0, 1  ;;  %v7041_v23 = vsel %vm563_vm0, %v608_v47, %v609_v49  ;;  %v5695_v55 = vunpack.i.l.bf16 %v6960_v6  ;;  %v529_v29 = vmax.f32 %v6708_v39, %v5716_v21 }
 0x17d   : > { %1843 = vmatprep.mubr.bf16.mxu0 %v1385_v61  ;;  %v528_v46 = vmax.f32 %v6706_v9, %v5715_v37  ;;  %v5782_v10 = vpack.i.bf16 %v7041_v23, %v7028_v45  ;;  %v809_v33 = vrot.slane %v7034_v50, 1  ;;  %v8830_v47 = vrot.slane %v6614_v34, 2  ;;  %4807 = vmatpush3.bf16.msra.mxu1 %v5920_v44 }
 0x17e   : > { %v7050_v61 = vsel %vm730_vm1, %v801_v17, %v802_v59  ;;  %v7053_v49 = vsel %vm730_vm1, %v802_v59, %v804_v54  ;;  %v5696_v39 = vunpack.i.h.bf16 %v6960_v6  ;;  %v612_v9 = vrot.slane %v529_v29, 7  ;;  %v5709_v17 = vpop.permute.xlu1 %5708  ;;  %v5921_v6 = vld [vmem:[#allocation5 + $0xc0] sm:$0xff]  }
 0x17f   : > { %8829 = vst [vmem:[#allocation49_spill] sm:$0xff] %v7053_v49  ;;  %v7058_v53 = vsel %vm907_vm2, %v8830_v47, %v939_v11  ;;  %v611_v21 = vrot.slane %v528_v46, 7  ;;  %v5787_v37 = vpack.i.bf16 %v7053_v49, %v7050_v61  ;;  %5783 = vrot.lane.b32.xlu0 %v5782_v10, %s6154_s24  ;;  %v806_v3 = vrot.slane %v7028_v45, 1  ;;  %v5922_v29 = vld [vmem:[#allocation5 + $0x80] sm:$0xff]   ;;  %4808 = vmatprep.subr.bf16.mxu1 %v5921_v6 }
 0x180   : > { %v807_v54 = vrot.slane %v7041_v23, 1  ;;  %v1275_v59 = vsel %vm1264_vm3, %v6589_v56, %v5690_v13  ;;  %v1276_v5 = vsel %vm1264_vm3, %v6597_v12, %v5691_v31  ;;  %v5706_v46 = vunpack.i.h.bf16 %v6980_v36 }
 0x181   : > { %5788 = vrot.lane.b32.xlu1 %v5787_v37, %s6154_s24  ;;  %v7072_v47 = vpack.c.bf16 %v1276_v5, %v1275_v59  ;;  %v8831_v10 = vrot.slane %v6652_v19, 2  ;;  %v1309_v56 = vsel %vm1264_vm3, %v7058_v53, %v5695_v55  ;;  %v5705_v13 = vunpack.i.l.bf16 %v6980_v36  ;;  %4809 = vmatpush3.bf16.msra.mxu1 %v5922_v29 }
 0x182   : > { %v7083_v12 = vsel %vm563_vm0, 0.0, %v611_v21  ;;  %v7086_v31 = vsel %vm730_vm1, %v806_v3, %v807_v54  ;;  %v7089_v44 = vsel %vm730_vm1, %v807_v54, %v809_v33  ;;  %v5711_v37 = vunpack.i.h.bf16 %v5709_v17  ;;  %v5719_v6 = vpop.permute.xlu1 %5718 }
 0x183   : > { %v7077_v49 = vsel %vm907_vm2, %v939_v11, %v8831_v10  ;;  %8832 = vst [vmem:[#allocation50_spill] sm:$0xff] %v7083_v12  ;;  %8833 = vst [vmem:[#allocation51_spill] sm:$0xff] %v7086_v31  ;;  %v5710_v19 = vunpack.i.l.bf16 %v5709_v17  ;;  %v5797_v11 = vpack.i.bf16 %v7089_v44, %v7086_v31  ;;  %1844 = vmatmul.mubr.bf16.gmra.mxu0 %v7072_v47  ;;  %v8836_v54 = vrot.slane %v6662_v40, 2  ;;  %v5724_v10 = vpop.permute.xlu0 %5723 }
 0x184   : > { %8834 = vst [vmem:[#allocation52_spill] sm:$0xff] %v7089_v44  ;;  %v1310_v36 = vsel %vm1264_vm3, %v7077_v49, %v5696_v39  ;;  %v7097_v59 = vsel %vm563_vm0, %v611_v21, %v612_v9  ;;  %v1277_v33 = vsel %vm1264_vm3, %v6614_v34, %v5705_v13  ;;  %v1278_v17 = vsel %vm1264_vm3, %v6619_v35, %v5706_v46 }
 0x185   : > { %v1389_v55 = vpack.c.bf16 %v1310_v36, %v1309_v56  ;;  %8835 = vst [vmem:[#allocation53_spill] sm:$0xff] %v7097_v59  ;;  %5798 = vrot.lane.b32.xlu1 %v5797_v11, %s6154_s24  ;;  %v5792_v3 = vpack.i.bf16 %v7097_v59, %v7083_v12  ;;  %v7109_v39 = vsel %vm907_vm2, %v8836_v54, %v944_v25  ;;  %v8837_v21 = vrot.slane %v6659_v52, 2 }
 0x186   : > { %v5807_v29 = vpack.i.bf16 %v6831_v4, %v6821_v8  ;;  %v1311_v34 = vsel %vm1264_vm3, %v7109_v39, %v5710_v19  ;;  %v951_v46 = vrot.slane %v6686_v24, 2  ;;  %v948_v52 = vrot.slane %v6689_v27, 2 }
 0x187   : > { %1851 = vmatprep.mubr.bf16.mxu0 %v1389_v55  ;;  %v7114_v5 = vsel %vm907_vm2, %v944_v25, %v8837_v21  ;;  %5793 = vrot.lane.b32.xlu0 %v5792_v3, %s6154_s24  ;;  %v5802_v25 = vpack.i.bf16 %v6786_v14, %v6783_v2  ;;  %v7128_v56 = vpack.c.bf16 %v1278_v17, %v1277_v33  ;;  %v949_v13 = vrot.slane %v6694_v20, 2 }
 0x188   : > { %v1312_v35 = vsel %vm1264_vm3, %v7114_v5, %v5711_v37  ;;  %v7132_v11 = vsel %vm563_vm0, %v612_v9, 0.0  ;;  %v5721_v19 = vunpack.i.h.bf16 %v5719_v6  ;;  %v5720_v36 = vunpack.i.l.bf16 %v5719_v6 }
 0x189   : > { %5808 = vrot.lane.b32.xlu1 %v5807_v29, %s6154_s24  ;;  %v1393_v37 = vpack.c.bf16 %v1312_v35, %v1311_v34  ;;  %v5726_v55 = vunpack.i.h.bf16 %v5724_v10  ;;  %v5725_v24 = vunpack.i.l.bf16 %v5724_v10  ;;  %v5817_v3 = vpack.i.bf16 %v6941_v62, %v6928_v16  ;;  %v5729_v29 = vpop.permute.xlu1 %5728 }
 0x18a   : > { %v956_v2 = vrot.slane %v6714_v28, 2  ;;  %v953_v14 = vrot.slane %v6729_v32, 2  ;;  %v1158_v9 = vrot.slane %v7132_v11, 2  ;;  %v5812_v33 = vpack.i.bf16 %v6854_v1, %v6851_v22 }
 0x18b   : > { %5803 = vrot.lane.b32.xlu0 %v5802_v25, %s6154_s24  ;;  %1852 = vmatmul.mubr.bf16.gmra.mxu0 %v7128_v56  ;;  %v1155_v17 = vrot.slane %v7083_v12, 2  ;;  %v7146_v54 = vsel %vm907_vm2, %v948_v52, %v949_v13  ;;  %v7149_v21 = vsel %vm907_vm2, %v949_v13, %v951_v46  ;;  %v1279_v28 = vsel %vm1264_vm3, %v6662_v40, %v5720_v36 }
 0x18c   : > { %1859 = vmatprep.mubr.bf16.mxu0 %v1393_v37  ;;  %v1280_v6 = vsel %vm1264_vm3, %v6665_v41, %v5721_v19  ;;  %v5827_v34 = vpack.i.bf16 %v7077_v49, %v7058_v53  ;;  %v1313_v35 = vsel %vm1264_vm3, %v7146_v54, %v5725_v24  ;;  %v1314_v10 = vsel %vm1264_vm3, %v7149_v21, %v5726_v55  ;;  %v8838_v19 = vld [vmem:[#allocation29_spill] sm:$0xff] }
 0x18d   : > { %5818 = vrot.lane.b32.xlu1 %v5817_v3, %s6154_s24  ;;  %v1156_v46 = vrot.slane %v7097_v59, 2  ;;  %v961_v52 = vrot.slane %v6812_v38, 2  ;;  %v958_v40 = vrot.slane %v6815_v43, 2  ;;  %v5822_v41 = vpack.i.bf16 %v7016_v63, %v7007_v57 }
 0x18e   : > { %v959_v25 = vrot.slane %v6818_v7, 2  ;;  %v7169_v13 = vpack.c.bf16 %v1280_v6, %v1279_v28  ;;  %v954_v36 = vrot.slane %v8838_v19, 2  ;;  %v5731_v38 = vunpack.i.h.bf16 %v5729_v29 }
 0x18f   : > { %5813 = vrot.lane.b32.xlu0 %v5812_v33, %s6154_s24  ;;  %v7173_v37 = vsel %vm907_vm2, %v1155_v17, %v1156_v46  ;;  %v7176_v55 = vsel %vm907_vm2, %v1156_v46, %v1158_v9  ;;  %v5730_v24 = vunpack.i.l.bf16 %v5729_v29  ;;  %v1397_v3 = vpack.c.bf16 %v1314_v10, %v1313_v35 }
 0x190   : > { %v971_v44 = vrot.slane %v6907_v60, 2  ;;  %v5837_v28 = vpack.i.bf16 %v7149_v21, %v7146_v54  ;;  %v968_v17 = vrot.slane %v6910_v26, 2  ;;  %v7187_v9 = vsel %vm907_vm2, %v958_v40, %v959_v25 }
 0x191   : > { %5828 = vrot.lane.b32.xlu1 %v5827_v34, %s6154_s24  ;;  %v7190_v6 = vsel %vm907_vm2, %v959_v25, %v961_v52  ;;  %v969_v29 = vrot.slane %v6919_v30, 2  ;;  %v8839_v34 = vld [vmem:[#allocation37_spill] sm:$0xff]  ;;  %v5832_v35 = vpack.i.bf16 %v7114_v5, %v7109_v39  ;;  %v7198_v10 = vsel %vm907_vm2, %v953_v14, %v954_v36  ;;  %v8840_v25 = vld [vmem:[#allocation40_spill] sm:$0xff] }
 0x192   : > { %v966_v60 = vrot.slane %v8839_v34, 2  ;;  %v7201_v46 = vsel %vm907_vm2, %v954_v36, %v956_v2  ;;  %v963_v40 = vrot.slane %v6858_v51, 2  ;;  %v1281_v52 = vsel %vm1264_vm3, %v6689_v27, %v5730_v24 }
 0x193   : > { %5823 = vrot.lane.b32.xlu0 %v5822_v41, %s6154_s24  ;;  %1860 = vmatmul.mubr.bf16.gmra.mxu0 %v7169_v13  ;;  %v1282_v41 = vsel %vm1264_vm3, %v6694_v20, %v5731_v38  ;;  %v5847_v34 = vpack.i.bf16 %v7190_v6, %v7187_v9  ;;  %v978_v2 = vrot.slane %v6983_v58, 2  ;;  %v7215_v14 = vsel %vm907_vm2, %v968_v17, %v969_v29 }
 0x194   : > { %1867 = vmatprep.mubr.bf16.mxu0 %v1397_v3  ;;  %v964_v3 = vrot.slane %v8840_v25, 2  ;;  %v7218_v36 = vsel %vm907_vm2, %v969_v29, %v971_v44  ;;  %v979_v27 = vrot.slane %v6987_v0, 2  ;;  %v976_v20 = vrot.slane %v6945_v48, 2 }
 0x195   : > { %5838 = vrot.lane.b32.xlu1 %v5837_v28, %s6154_s24  ;;  %v981_v28 = vrot.slane %v7000_v15, 2  ;;  %v5842_v15 = vpack.i.bf16 %v7201_v46, %v7198_v10  ;;  %v7225_v38 = vpack.c.bf16 %v1282_v41, %v1281_v52  ;;  %v973_v24 = vrot.slane %v6932_v18, 2 }
 0x196   : > { %v7232_v17 = vsel %vm907_vm2, %v964_v3, %v966_v60  ;;  %v974_v44 = vrot.slane %v6950_v42, 2  ;;  %v986_v29 = vrot.slane %v7034_v50, 2  ;;  %v5857_v48 = vpack.i.bf16 %v7218_v36, %v7215_v14 }
 0x197   : > { %5833 = vrot.lane.b32.xlu0 %v5832_v35, %s6154_s24  ;;  %v7229_v35 = vsel %vm907_vm2, %v963_v40, %v964_v3  ;;  %v983_v52 = vrot.slane %v7028_v45, 2  ;;  %v7242_v41 = vsel %vm907_vm2, %v978_v2, %v979_v27  ;;  %v7245_v40 = vsel %vm907_vm2, %v979_v27, %v981_v28 }
 0x198   : > { %v984_v60 = vrot.slane %v7041_v23, 2  ;;  %v1121_v3 = vrot.slane %v7132_v11, 1  ;;  %v5852_v50 = vpack.i.bf16 %v7232_v17, %v7229_v35  ;;  %v1118_v2 = vrot.slane %v7083_v12, 1 }
 0x199   : > { %5848 = vrot.lane.b32.xlu1 %v5847_v34, %s6154_s24  ;;  %v7253_v34 = vsel %vm907_vm2, %v973_v24, %v974_v44  ;;  %v1119_v28 = vrot.slane %v7097_v59, 1  ;;  %v5867_v27 = vpack.i.bf16 %v7245_v40, %v7242_v41 }
 0x19a   : > { %v7264_v11 = vsel %vm907_vm2, %v983_v52, %v984_v60  ;;  %v5882_v52 = vpack.i.bf16 %v7176_v55, %v7173_v37 }
 0x19b   : > { %5843 = vrot.lane.b32.xlu0 %v5842_v15, %s6154_s24  ;;  %1868 = vmatmul.mubr.bf16.gmra.mxu0 %v7225_v38  ;;  %v7256_v15 = vsel %vm907_vm2, %v974_v44, %v976_v20  ;;  %v7273_v24 = vsel %vm730_vm1, %v1118_v2, %v1119_v28  ;;  %v7276_v44 = vsel %vm730_vm1, %v1119_v28, %v1121_v3 }
 0x19c   : > { %v5862_v20 = vpack.i.bf16 %v7256_v15, %v7253_v34  ;;  %8841 = vst [vmem:[#allocation29_spill] sm:$0xff] %v7273_v24  ;;  %8842 = vst [vmem:[#allocation37_spill] sm:$0xff] %v7276_v44 }
 0x19d   : > { %5858 = vrot.lane.b32.xlu1 %v5857_v48, %s6154_s24  ;;  %v7267_v48 = vsel %vm907_vm2, %v984_v60, %v986_v29  ;;  %v5872_v29 = vpack.i.bf16 %v7276_v44, %v7273_v24  ;;  %v5739_v60 = vpop.permute.xlu1 %5738 }
 0x19e   : > { %v5741_v3 = vunpack.i.h.bf16 %v5739_v60  ;;  %v5740_v2 = vunpack.i.l.bf16 %v5739_v60 }
 0x19f   : > { %5853 = vrot.lane.b32.xlu0 %v5852_v50, %s6154_s24  ;;  %v5877_v50 = vpack.i.bf16 %v7267_v48, %v7264_v11 }
 0x1a1   : > { %5868 = vrot.lane.b32.xlu1 %v5867_v27, %s6154_s24 }
 0x1a3   : > { %5863 = vrot.lane.b32.xlu0 %v5862_v20, %s6154_s24  ;;  %v1283_v20 = vsel %vm1264_vm3, %v6729_v32, %v5740_v2 }
 0x1a5   : > { %5878 = vrot.lane.b32.xlu1 %v5877_v50, %s6154_s24  ;;  %v1284_v50 = vsel %vm1264_vm3, %v8838_v19, %v5741_v3 }
 0x1a7   : > { %5873 = vrot.lane.b32.xlu0 %v5872_v29, %s6154_s24 }
 0x1ab   : > { %5883 = vrot.lane.b32.xlu0 %v5882_v52, %s6154_s24  ;;  %v7296_v52 = vpack.c.bf16 %v1284_v50, %v1283_v20  ;;  %s6157_s24 = smov [#allocation8]  }
 0x1ac   : > { %s6081_s26 = sshll.u32 %s6157_s24, 4  ;;  %s6082_s26 = int_to_ptr.vmem [resolvable:$false] %s6081_s26 }
 0x1ad   : > { %s6083_s8 = scalar_lea.vmem %s6082_s26, 8192  ;;  %p6084_p6 = scmp.lt.s32.totalorder %s8666_s13, %s6082_s26 }
 0x1ae   : > { %p6085_p12 = scmp.lt.s32.totalorder %s6083_s8, %s6077_s22 }
 0x1b0   : > { %p6086_p7 = por %p6085_p12, %p6084_p6 }
 0x1b2   : > { %p6087_p9 = pnand %p6086_p7, %p6080_p2 }
 0x1d2   : > { %v5734_v28 = vpop.permute.xlu0 %5733 }
 0x1d3   : > { %v5736_v27 = vunpack.i.h.bf16 %v5734_v28  ;;  %v5735_v33 = vunpack.i.l.bf16 %v5734_v28 }
 0x1d5   : > { %v1315_v29 = vsel %vm1264_vm3, %v7198_v10, %v5735_v33  ;;  %v1316_v44 = vsel %vm1264_vm3, %v7201_v46, %v5736_v27 }
 0x1d6   : > { %v1401_v24 = vpack.c.bf16 %v1316_v44, %v1315_v29  ;;  %v5923_v29 = vld [vmem:[#allocation7 + $0x78] sm:$0xff]  }
 0x1d7   : > { %4926 = vmatprep.subr.bf16.mxu1 %v5923_v29 }
 0x1d8   : > { %v5749_v31 = vpop.permute.xlu1 %5748  ;;  %1875 = vmatprep.mubr.bf16.mxu0 %v1401_v24 }
 0x1d9   : > { %v5751_v60 = vunpack.i.h.bf16 %v5749_v31  ;;  %v5750_v59 = vunpack.i.l.bf16 %v5749_v31  ;;  %1876 = vmatmul.mubr.bf16.gmra.mxu0 %v7296_v52 }
 0x1da   : > { %v5744_v28 = vpop.permute.xlu0 %5743 }
 0x1db   : > { %v5746_v32 = vunpack.i.h.bf16 %v5744_v28  ;;  %v5745_v2 = vunpack.i.l.bf16 %v5744_v28  ;;  %v1285_v44 = vsel %vm1264_vm3, %v6815_v43, %v5750_v59  ;;  %v1286_v3 = vsel %vm1264_vm3, %v6818_v7, %v5751_v60 }
 0x1dc   : > { %v7307_v31 = vpack.c.bf16 %v1286_v3, %v1285_v44 }
 0x1dd   : > { %v1317_v19 = vsel %vm1264_vm3, %v7187_v9, %v5745_v2  ;;  %v1318_v33 = vsel %vm1264_vm3, %v7190_v6, %v5746_v32 }
 0x1de   : > { %v1405_v24 = vpack.c.bf16 %v1318_v33, %v1317_v19  ;;  %v5759_v27 = vpop.permute.xlu1 %5758 }
 0x1df   : > { %v5761_v20 = vunpack.i.h.bf16 %v5759_v27  ;;  %v5760_v50 = vunpack.i.l.bf16 %v5759_v27 }
 0x1e0   : > { %1883 = vmatprep.mubr.bf16.mxu0 %v1405_v24  ;;  %v5754_v28 = vpop.permute.xlu0 %5753 }
 0x1e1   : > { %1884 = vmatmul.mubr.bf16.gmra.mxu0 %v7307_v31  ;;  %v5756_v2 = vunpack.i.h.bf16 %v5754_v28  ;;  %v5755_v12 = vunpack.i.l.bf16 %v5754_v28  ;;  %v1287_v59 = vsel %vm1264_vm3, %v6858_v51, %v5760_v50  ;;  %v1288_v60 = vsel %vm1264_vm3, %v8840_v25, %v5761_v20 }
 0x1e2   : > { %v7318_v24 = vpack.c.bf16 %v1288_v60, %v1287_v59 }
 0x1e3   : > { %v1319_v43 = vsel %vm1264_vm3, %v7229_v35, %v5755_v12  ;;  %v1320_v7 = vsel %vm1264_vm3, %v7232_v17, %v5756_v2 }
 0x1e4   : > { %v5764_v32 = vpop.permute.xlu0 %5763  ;;  %v1409_v19 = vpack.c.bf16 %v1320_v7, %v1319_v43 }
 0x1e5   : > { %v5766_v44 = vunpack.i.h.bf16 %v5764_v32  ;;  %v5765_v3 = vunpack.i.l.bf16 %v5764_v32 }
 0x1e6   : > { %v5769_v33 = vpop.permute.xlu1 %5768  ;;  %1891 = vmatprep.mubr.bf16.mxu0 %v1409_v19 }
 0x1e7   : > { %v5771_v27 = vunpack.i.h.bf16 %v5769_v33  ;;  %v5770_v29 = vunpack.i.l.bf16 %v5769_v33  ;;  %v1321_v12 = vsel %vm1264_vm3, %v7215_v14, %v5765_v3  ;;  %v1322_v28 = vsel %vm1264_vm3, %v7218_v36, %v5766_v44 }
 0x1e8   : > { %v1413_v51 = vpack.c.bf16 %v1322_v28, %v1321_v12 }
 0x1e9   : > { %1892 = vmatmul.mubr.bf16.gmra.mxu0 %v7318_v24  ;;  %v1289_v20 = vsel %vm1264_vm3, %v6910_v26, %v5770_v29  ;;  %v1290_v50 = vsel %vm1264_vm3, %v6919_v30, %v5771_v27 }
 0x1ea   : > { %1899 = vmatprep.mubr.bf16.mxu0 %v1413_v51  ;;  %v5779_v2 = vpop.permute.xlu1 %5778  ;;  %v7329_v59 = vpack.c.bf16 %v1290_v50, %v1289_v20 }
 0x1eb   : > { %v5774_v25 = vpop.permute.xlu0 %5773  ;;  %v5781_v19 = vunpack.i.h.bf16 %v5779_v2  ;;  %v5780_v33 = vunpack.i.l.bf16 %v5779_v2 }
 0x1ec   : > { %v5776_v43 = vunpack.i.h.bf16 %v5774_v25  ;;  %v5775_v7 = vunpack.i.l.bf16 %v5774_v25 }
 0x1ed   : > { %v1291_v27 = vsel %vm1264_vm3, %v6932_v18, %v5780_v33  ;;  %v1292_v12 = vsel %vm1264_vm3, %v6950_v42, %v5781_v19 }
 0x1ee   : > { %v1323_v60 = vsel %vm1264_vm3, %v7253_v34, %v5775_v7  ;;  %v1324_v32 = vsel %vm1264_vm3, %v7256_v15, %v5776_v43  ;;  %v7344_v25 = vpack.c.bf16 %v1292_v12, %v1291_v27 }
 0x1ef   : > { %v1417_v44 = vpack.c.bf16 %v1324_v32, %v1323_v60 }
 0x1f1   : > { %v5784_v3 = vpop.permute.xlu0 %5783  ;;  %1900 = vmatmul.mubr.bf16.gmra.mxu0 %v7329_v59 }
 0x1f2   : > { %v5786_v26 = vunpack.i.h.bf16 %v5784_v3  ;;  %v5785_v29 = vunpack.i.l.bf16 %v5784_v3  ;;  %1907 = vmatprep.mubr.bf16.mxu0 %v1417_v44 }
 0x1f3   : > { %v5789_v30 = vpop.permute.xlu1 %5788 }
 0x1f4   : > { %v1325_v28 = vsel %vm1264_vm3, %v7242_v41, %v5785_v29  ;;  %v1326_v51 = vsel %vm1264_vm3, %v7245_v40, %v5786_v26  ;;  %v5791_v20 = vunpack.i.h.bf16 %v5789_v30  ;;  %v5790_v50 = vunpack.i.l.bf16 %v5789_v30 }
 0x1f5   : > { %v1421_v2 = vpack.c.bf16 %v1326_v51, %v1325_v28  ;;  %v8843_v28 = vld [vmem:[#allocation15_spill] sm:$0xff]  ;;  %v8844_v51 = vld [vmem:[#allocation16_spill] sm:$0xff] }
 0x1f6   : > { %v1293_v42 = vsel %vm1264_vm3, %v6983_v58, %v5790_v50  ;;  %v1294_v32 = vsel %vm1264_vm3, %v6987_v0, %v5791_v20  ;;  %v5924_v50 = vld [vmem:[#allocation7 + $0x38] sm:$0xff]  }
 0x1f7   : > { %v5799_v43 = vpop.permute.xlu1 %5798  ;;  %v7355_v27 = vpack.c.bf16 %v1294_v32, %v1293_v42  ;;  %v5926_v32 = vld [vmem:[#allocation7 + $0x30] sm:$0xff]  }
 0x1f8   : > { %v5801_v29 = vunpack.i.h.bf16 %v5799_v43  ;;  %v5800_v12 = vunpack.i.l.bf16 %v5799_v43 }
 0x1f9   : > { %v5794_v7 = vpop.permute.xlu0 %5793  ;;  %1908 = vmatmul.mubr.bf16.gmra.mxu0 %v7344_v25 }
 0x1fa   : > { %v5796_v60 = vunpack.i.h.bf16 %v5794_v7  ;;  %v5795_v18 = vunpack.i.l.bf16 %v5794_v7  ;;  %1915 = vmatprep.mubr.bf16.mxu0 %v1421_v2  ;;  %v5925_v7 = vld [vmem:[#allocation7 + $0x70] sm:$0xff]   ;;  %v1295_v43 = vsel %vm1264_vm3, %v7028_v45, %v5800_v12  ;;  %v1296_v42 = vsel %vm1264_vm3, %v7041_v23, %v5801_v29  ;;  %v5928_v45 = vld [vmem:[#allocation7 + $0x28] sm:$0xff]   ;;  %v5929_v23 = vld [vmem:[#allocation7 + $0x60] sm:$0xff]  }
 0x1fb   : > { %v5809_v30 = vpop.permute.xlu1 %5808 }
 0x1fc   : > { %v1327_v33 = vsel %vm1264_vm3, %v7264_v11, %v5795_v18  ;;  %v1328_v44 = vsel %vm1264_vm3, %v7267_v48, %v5796_v60  ;;  %v5811_v60 = vunpack.i.h.bf16 %v5809_v30  ;;  %v5810_v18 = vunpack.i.l.bf16 %v5809_v30 }
 0x1fd   : > { %v5804_v19 = vpop.permute.xlu0 %5803  ;;  %v1425_v20 = vpack.c.bf16 %v1328_v44, %v1327_v33  ;;  %v5927_v33 = vld [vmem:[#allocation7 + $0x68] sm:$0xff]  }
 0x1fe   : > { %v5806_v3 = vunpack.i.h.bf16 %v5804_v19  ;;  %v5805_v26 = vunpack.i.l.bf16 %v5804_v19  ;;  %v8845_v19 = vld [vmem:[#allocation43_spill] sm:$0xff]  ;;  %v8846_v44 = vld [vmem:[#allocation17_spill] sm:$0xff] }
 0x200   : > { %v1329_v58 = vsel %vm1264_vm3, %v8843_v28, %v5805_v26  ;;  %v1330_v0 = vsel %vm1264_vm3, %v8844_v51, %v5806_v3  ;;  %v1331_v3 = vsel %vm1264_vm3, %v8846_v44, %v5810_v18  ;;  %v8847_v26 = vld [vmem:[#allocation18_spill] sm:$0xff]  ;;  %v1367_v51 = vpack.c.bf16 %v6831_v4, %v6821_v8  ;;  %v8850_v4 = vld [vmem:[#allocation20_spill] sm:$0xff]  ;;  %v5819_v18 = vpop.permute.xlu1 %5818  ;;  %v8851_v44 = vld [vmem:[#allocation21_spill] sm:$0xff] }
 0x201   : > { %v1365_v2 = vpack.c.bf16 %v1330_v0, %v1329_v58  ;;  %1916 = vmatmul.mubr.bf16.gmra.mxu0 %v7355_v27  ;;  %v1332_v30 = vsel %vm1264_vm3, %v8847_v26, %v5811_v60  ;;  %v5814_v28 = vpop.permute.xlu0 %5813  ;;  %v7371_v58 = vpack.c.bf16 %v1296_v42, %v1295_v43  ;;  %v1372_v60 = vpack.c.bf16 %v6854_v1, %v6851_v22  ;;  %v8852_v22 = vld [vmem:[#allocation22_spill] sm:$0xff] }
 0x202   : > { %1923 = vmatprep.mubr.bf16.mxu0 %v1425_v20  ;;  %v1370_v12 = vpack.c.bf16 %v1332_v30, %v1331_v3  ;;  %v5816_v29 = vunpack.i.h.bf16 %v5814_v28  ;;  %v5815_v0 = vunpack.i.l.bf16 %v5814_v28  ;;  %v8848_v20 = vld [vmem:[#allocation48_spill] sm:$0xff]  ;;  %v5821_v42 = vunpack.i.h.bf16 %v5819_v18 }
 0x203   : > { %1965 = vmatmul.mubr.bf16.vlgmr.msra.gmra.mxu1 %v1365_v2  ;;  %v8849_v2 = vld [vmem:[#allocation19_spill] sm:$0xff]  ;;  %v1384_v30 = vpack.c.bf16 %v7077_v49, %v7058_v53  ;;  %v8854_v53 = vld [vmem:[#allocation24_spill] sm:$0xff] }
 0x204   : > { %1972 = vmatprep.mubr.bf16.mxu1 %v8845_v19  ;;  %4927 = vmatpush3.bf16.msra.mxu1 %v5924_v50  ;;  %v5930_v50 = vld [vmem:[#allocation7 + $0x20] sm:$0xff]   ;;  %v1333_v8 = vsel %vm1264_vm3, %v8849_v2, %v5815_v0  ;;  %v1376_v19 = vpack.c.bf16 %v6941_v62, %v6928_v16  ;;  %v1336_v1 = vsel %vm1264_vm3, %v8852_v22, %v5821_v42  ;;  %v5931_v0 = vld [vmem:[#allocation7 + $0x58] sm:$0xff]  }
 0x205   : > { %4928 = vmatprep.subr.bf16.mxu1 %v5925_v7  ;;  %v1334_v7 = vsel %vm1264_vm3, %v8850_v4, %v5816_v29  ;;  %v5824_v26 = vpop.permute.xlu0 %5823  ;;  %v1380_v16 = vpack.c.bf16 %v7016_v63, %v7007_v57  ;;  %v8853_v63 = vld [vmem:[#allocation23_spill] sm:$0xff]  ;;  %v1388_v2 = vpack.c.bf16 %v7114_v5, %v7109_v39  ;;  %v1392_v4 = vpack.c.bf16 %v7149_v21, %v7146_v54  ;;  %v8855_v54 = vld [vmem:[#allocation25_spill] sm:$0xff] }
 0x206   : > { %v1374_v43 = vpack.c.bf16 %v1334_v7, %v1333_v8 }
 0x208   : > { %4929 = vmatpush3.bf16.msra.mxu1 %v5926_v32  ;;  %v5820_v32 = vunpack.i.l.bf16 %v5819_v18 }
 0x209   : > { %1924 = vmatmul.mubr.bf16.gmra.mxu0 %v7371_v58  ;;  %4930 = vmatprep.subr.bf16.mxu1 %v5927_v33 }
 0x20a   : > { %5406 = vmatprep.mubr.msk.bf16.mxu0 %vm1264_vm3, %v1367_v51  ;;  %v1335_v3 = vsel %vm1264_vm3, %v8851_v44, %v5820_v32  ;;  %v5834_v32 = vpop.permute.xlu0 %5833 }
 0x20b   : > { %1973 = vmatmul.mubr.bf16.gmra.mxu1 %v1370_v12  ;;  %v1378_v28 = vpack.c.bf16 %v1336_v1, %v1335_v3  ;;  %v1400_v3 = vpack.c.bf16 %v7190_v6, %v7187_v9  ;;  %v5836_v1 = vunpack.i.h.bf16 %v5834_v32  ;;  %v8858_v6 = vld [vmem:[#allocation28_spill] sm:$0xff] }
 0x20c   : > { %1980 = vmatprep.mubr.bf16.mxu1 %v8848_v20  ;;  %4931 = vmatpush3.bf16.msra.mxu1 %v5928_v45  ;;  %v5825_v45 = vunpack.i.l.bf16 %v5824_v26  ;;  %v5932_v20 = vld [vmem:[#allocation7 + $0x18] sm:$0xff]  }
 0x20d   : > { %4932 = vmatprep.subr.bf16.mxu1 %v5929_v23 }
 0x20e   : > { %v1337_v49 = vsel %vm1264_vm3, %v8853_v63, %v5825_v45 }
 0x210   : > { %4933 = vmatpush3.bf16.msra.mxu1 %v5930_v50  ;;  %v5829_v50 = vpop.permute.xlu1 %5828 }
 0x211   : > { %5407 = vmatmul.mubr.msk.bf16.vlgmr.msra.gmra.mxu0 %vm1264_vm3, %v1372_v60  ;;  %4934 = vmatprep.subr.bf16.mxu1 %v5931_v0  ;;  %v5831_v60 = vunpack.i.h.bf16 %v5829_v50  ;;  %v5830_v18 = vunpack.i.l.bf16 %v5829_v50  ;;  %v5844_v50 = vpop.permute.xlu0 %5843 }
 0x212   : > { %5410 = vmatprep.mubr.msk.bf16.mxu0 %vm1264_vm3, %v1376_v19 }
 0x213   : > { %1981 = vmatmul.mubr.bf16.gmra.mxu1 %v1374_v43  ;;  %v1339_v21 = vsel %vm1264_vm3, %v8855_v54, %v5830_v18  ;;  %v8856_v43 = vld [vmem:[#allocation26_spill] sm:$0xff] }
 0x214   : > { %1988 = vmatprep.mubr.bf16.mxu1 %v7072_v47  ;;  %v5826_v47 = vunpack.i.h.bf16 %v5824_v26  ;;  %4935 = vmatpush3.bf16.msra.mxu1 %v5932_v20  ;;  %v1340_v42 = vsel %vm1264_vm3, %v8856_v43, %v5831_v60  ;;  %v5835_v26 = vunpack.i.l.bf16 %v5834_v32  ;;  %v5839_v45 = vpop.permute.xlu1 %5838  ;;  %v5846_v60 = vunpack.i.h.bf16 %v5844_v50  ;;  %v5936_v43 = vld [vmem:[#allocation7 + $0x8] sm:$0xff]  }
 0x215   : > { %v1386_v22 = vpack.c.bf16 %v1340_v42, %v1339_v21  ;;  %v5840_v0 = vunpack.i.l.bf16 %v5839_v45  ;;  %v8861_v21 = vld [vmem:[#allocation32_spill] sm:$0xff] }
 0x216   : > { %v1338_v29 = vsel %vm1264_vm3, %v8854_v53, %v5826_v47  ;;  %v5934_v47 = vld [vmem:[#allocation7 + $0x10] sm:$0xff]  }
 0x217   : > { %v4698_v33 = vpop.f32.mrf.mxu0 }
 0x218   : > { %v5849_v42 = vpop.permute.xlu1 %5848 }
 0x219   : > { %v4699_v62 = vpop.f32.mrf.mxu0  ;;  %5411 = vmatmul.mubr.msk.bf16.gmra.mxu0 %vm1264_vm3, %v1380_v16 }
 0x21a   : > { %v7398_v51 = vadd.f32 %v4699_v62, %v4698_v33  ;;  %5414 = vmatprep.mubr.msk.bf16.mxu0 %vm1264_vm3, %v1384_v30  ;;  %v1396_v33 = vpack.c.bf16 %v7201_v46, %v7198_v10  ;;  %v8857_v46 = vld [vmem:[#allocation27_spill] sm:$0xff]  ;;  %v1342_v30 = vsel %vm1264_vm3, %v8858_v6, %v5836_v1  ;;  %v8863_v1 = vpack.c.bf16 %v7176_v55, %v7173_v37  ;;  %v8867_v6 = vld [vmem:[#allocation38_spill] sm:$0xff] }
 0x21b   : > { %v7401_v12 = vpop.f32.mrf.mxu0  ;;  %1989 = vmatmul.mubr.bf16.gmra.mxu1 %v1378_v28  ;;  %v1341_v9 = vsel %vm1264_vm3, %v8857_v46, %v5835_v26  ;;  %v5933_v28 = vld [vmem:[#allocation7 + $0x50] sm:$0xff]   ;;  %v5937_v37 = vld [vmem:[#allocation7 + $0xf8] sm:$0xff]  }
 0x21c   : > { %1996 = vmatprep.mubr.bf16.mxu1 %v7128_v56  ;;  %v1382_v56 = vpack.c.bf16 %v1338_v29, %v1337_v49  ;;  %v1408_v49 = vpack.c.bf16 %v7218_v36, %v7215_v14  ;;  %4936 = vmatprep.subr.bf16.mxu1 %v5933_v28  ;;  %v5841_v29 = vunpack.i.h.bf16 %v5839_v45  ;;  %v8860_v14 = vld [vmem:[#allocation31_spill] sm:$0xff]  ;;  %v5854_v45 = vpop.permute.xlu0 %5853 }
 0x21d   : > { %v7404_v23 = vpop.f32.mrf.mxu0  ;;  %4937 = vmatpush3.bf16.msra.mxu1 %v5934_v47  ;;  %v8868_v28 = vld [vmem:[#allocation39_spill] sm:$0xff]  ;;  %5038 = vmatprep.subr.bf16.mxu0 %v5937_v37 }
 0x21e   : > { %v1344_v36 = vsel %vm1264_vm3, %v8860_v14, %v5841_v29  ;;  %v5938_v55 = vld [vmem:[#allocation7 + $0xb8] sm:$0xff]   ;;  %v5939_v29 = vld [vmem:[#allocation7 + $0xf0] sm:$0xff]  }
 0x21f   : > { %v4704_v57 = vpop.f32.mrf.mxu0  ;;  %5039 = vmatpush3.bf16.msra.mxu0 %v5938_v55  ;;  %v5948_v37 = vld [vmem:[#allocation7 + $0x98] sm:$0xff]  }
 0x220   : > { %5040 = vmatprep.subr.bf16.mxu0 %v5939_v29  ;;  %v8874_v29 = vld [vmem:[#allocation47_spill] sm:$0xff] }
 0x221   : > { %v4705_v8 = vpop.f32.mrf.mxu0  ;;  %5415 = vmatmul.mubr.msk.bf16.gmra.mxu0 %vm1264_vm3, %v1388_v2 }
 0x222   : > { %v7415_v7 = vadd.f32 %v4705_v8, %v4704_v57  ;;  %5418 = vmatprep.mubr.msk.bf16.mxu0 %vm1264_vm3, %v1392_v4  ;;  %v1404_v57 = vpack.c.bf16 %v7232_v17, %v7229_v35  ;;  %v8859_v35 = vld [vmem:[#allocation30_spill] sm:$0xff]  ;;  %v1412_v8 = vpack.c.bf16 %v7256_v15, %v7253_v34  ;;  %v1416_v4 = vpack.c.bf16 %v7245_v40, %v7242_v41  ;;  %v8862_v15 = vld [vmem:[#allocation33_spill] sm:$0xff] }
 0x223   : > { %v7418_v19 = vpop.f32.mrf.mxu0  ;;  %1997 = vmatmul.mubr.bf16.gmra.mxu1 %v1382_v56  ;;  %v1343_v17 = vsel %vm1264_vm3, %v8859_v35, %v5840_v0  ;;  %v1346_v41 = vsel %vm1264_vm3, %v8862_v15, %v5846_v60  ;;  %v5935_v40 = vld [vmem:[#allocation7 + $0x48] sm:$0xff]   ;;  %v5940_v0 = vld [vmem:[#allocation7 + $0xb0] sm:$0xff]  }
 0x224   : > { %2004 = vmatprep.mubr.bf16.mxu1 %v7169_v13  ;;  %v1394_v56 = vpack.c.bf16 %v1344_v36, %v1343_v17  ;;  %4938 = vmatprep.subr.bf16.mxu1 %v5935_v40  ;;  %v8869_v36 = vld [vmem:[#allocation41_spill] sm:$0xff]  ;;  %v5945_v40 = vld [vmem:[#allocation7 + $0xe0] sm:$0xff]  }
 0x225   : > { %v7421_v39 = vpop.f32.mrf.mxu0  ;;  %4939 = vmatpush3.bf16.msra.mxu1 %v5936_v43  ;;  %5041 = vmatpush3.bf16.msra.mxu0 %v5940_v0  ;;  %v5942_v60 = vld [vmem:[#allocation7 + $0xa8] sm:$0xff]   ;;  %v5946_v43 = vld [vmem:[#allocation7 + $0xa0] sm:$0xff]  }
 0x227   : > { %v4710_v5 = vpop.f32.mrf.mxu0 }
 0x229   : > { %v4711_v44 = vpop.f32.mrf.mxu0  ;;  %5419 = vmatmul.mubr.msk.bf16.gmra.mxu0 %vm1264_vm3, %v1396_v33  ;;  %v1420_v33 = vpack.c.bf16 %v7267_v48, %v7264_v11  ;;  %v8865_v11 = vld [vmem:[#allocation35_spill] sm:$0xff] }
 0x22a   : > { %v7432_v13 = vadd.f32 %v4711_v44, %v4710_v5  ;;  %5422 = vmatprep.mubr.msk.bf16.mxu0 %vm1264_vm3, %v1400_v3  ;;  %v5851_v3 = vunpack.i.h.bf16 %v5849_v42 }
 0x22b   : > { %v7435_v16 = vpop.f32.mrf.mxu0  ;;  %2005 = vmatmul.mubr.bf16.gmra.mxu1 %v1386_v22  ;;  %v5850_v22 = vunpack.i.l.bf16 %v5849_v42 }
 0x22c   : > { %2012 = vmatprep.mubr.bf16.mxu1 %v7225_v38  ;;  %v1390_v38 = vpack.c.bf16 %v1342_v30, %v1341_v9  ;;  %v1348_v47 = vsel %vm1264_vm3, %v8868_v28, %v5851_v3  ;;  %v8871_v3 = vld [vmem:[#allocation44_spill] sm:$0xff] }
 0x22d   : > { %v7438_v62 = vpop.f32.mrf.mxu0  ;;  %v1347_v30 = vsel %vm1264_vm3, %v8867_v6, %v5850_v22 }
 0x22f   : > { %v4716_v10 = vpop.f32.mrf.mxu0 }
 0x231   : > { %v4717_v63 = vpop.f32.mrf.mxu0  ;;  %5423 = vmatmul.mubr.msk.bf16.gmra.mxu0 %vm1264_vm3, %v1404_v57 }
 0x232   : > { %v7449_v53 = vadd.f32 %v4717_v63, %v4716_v10  ;;  %5426 = vmatprep.mubr.msk.bf16.mxu0 %vm1264_vm3, %v1408_v49  ;;  %v8864_v10 = vld [vmem:[#allocation34_spill] sm:$0xff]  ;;  %v1402_v63 = vpack.c.bf16 %v1348_v47, %v1347_v30  ;;  %v5856_v49 = vunpack.i.h.bf16 %v5854_v45  ;;  %v5947_v30 = vld [vmem:[#allocation7 + $0xd8] sm:$0xff]  }
 0x233   : > { %2013 = vmatmul.mubr.bf16.gmra.mxu1 %v1390_v38  ;;  %v7452_v20 = vpop.f32.mrf.mxu0  ;;  %v7488_v48 = vpack.c.bf16 %v8865_v11, %v8864_v10  ;;  %v5855_v38 = vunpack.i.l.bf16 %v5854_v45  ;;  %v5864_v10 = vpop.permute.xlu0 %5863  ;;  %v5949_v45 = vld [vmem:[#allocation7 + $0xd0] sm:$0xff]  }
 0x234   : > { %2020 = vmatprep.mubr.bf16.mxu1 %v7296_v52  ;;  %v5845_v52 = vunpack.i.l.bf16 %v5844_v50  ;;  %v5866_v28 = vunpack.i.h.bf16 %v5864_v10 }
 0x235   : > { %v7459_v2 = vpop.f32.mrf.mxu0  ;;  %8866 = vst [vmem:[#allocation40_spill] sm:$0xff] %v7488_v48  ;;  %v1349_v50 = vsel %vm1264_vm3, %v8869_v36, %v5855_v38 }
 0x236   : > { %v1345_v34 = vsel %vm1264_vm3, %v8861_v21, %v5845_v52  ;;  %v5859_v52 = vpop.permute.xlu1 %5858  ;;  %v5944_v21 = vld [vmem:[#allocation7] sm:$0xff]   ;;  %v1354_v0 = vsel %vm1264_vm3, %v8874_v29, %v5866_v28  ;;  %v8882_v29 = vld [vmem:[#allocation37_spill] sm:$0xff] }
 0x237   : > { %v5861_v15 = vunpack.i.h.bf16 %v5859_v52  ;;  %v5874_v36 = vpop.permute.xlu0 %5873 }
 0x239   : > { %5427 = vmatmul.mubr.msk.bf16.gmra.mxu0 %vm1264_vm3, %v1412_v8  ;;  %v8870_v8 = vld [vmem:[#allocation42_spill] sm:$0xff] }
 0x23a   : > { %5430 = vmatprep.mubr.msk.bf16.mxu0 %vm1264_vm3, %v1416_v4  ;;  %v4722_v18 = vpop.f32.mrf.mxu0  ;;  %v1350_v4 = vsel %vm1264_vm3, %v8870_v8, %v5856_v49  ;;  %v8873_v49 = vld [vmem:[#allocation46_spill] sm:$0xff] }
 0x23b   : > { %2021 = vmatmul.mubr.bf16.gmra.mxu1 %v1394_v56  ;;  %v5941_v56 = vld [vmem:[#allocation7 + $0xe8] sm:$0xff]  }
 0x23c   : > { %2028 = vmatprep.mubr.bf16.mxu1 %v7307_v31  ;;  %v4723_v5 = vpop.f32.mrf.mxu0  ;;  %v1398_v31 = vpack.c.bf16 %v1346_v41, %v1345_v34  ;;  %5042 = vmatprep.subr.bf16.mxu0 %v5941_v56  ;;  %v1406_v34 = vpack.c.bf16 %v1350_v4, %v1349_v50  ;;  %v5860_v41 = vunpack.i.l.bf16 %v5859_v52  ;;  %v5875_v56 = vunpack.i.l.bf16 %v5874_v36  ;;  %v8875_v52 = vld [vmem:[#allocation49_spill] sm:$0xff] }
 0x23d   : > { %v7468_v54 = vadd.f32 %v4723_v5, %v4722_v18  ;;  %v5943_v5 = vld [vmem:[#allocation7 + $0x40] sm:$0xff]   ;;  %5043 = vmatpush3.bf16.msra.mxu0 %v5942_v60 }
 0x23e   : > { %v7474_v32 = vpop.f32.mrf.mxu0  ;;  %4940 = vmatprep.subr.bf16.mxu1 %v5943_v5  ;;  %5044 = vmatprep.subr.bf16.mxu0 %v5945_v40  ;;  %v1351_v22 = vsel %vm1264_vm3, %v8871_v3, %v5860_v41  ;;  %v8877_v41 = vld [vmem:[#allocation53_spill] sm:$0xff]  ;;  %v5953_v3 = vld [vmem:[#allocation7 + $0x178] sm:$0xff]  }
 0x23f   : > { %4941 = vmatpush3.bf16.msra.mxu1 %v5944_v21 }
 0x240   : > { %v7478_v44 = vpop.f32.mrf.mxu0  ;;  %5150 = vmatprep.subr.bf16.mxu1 %v5953_v3 }
 0x241   : > { %5431 = vmatmul.mubr.msk.bf16.gmra.mxu0 %vm1264_vm3, %v1420_v33 }
 0x242   : > { %5434 = vmatprep.mubr.msk.bf16.mxu0 %vm1264_vm3, %v8863_v1  ;;  %v8872_v1 = vld [vmem:[#allocation45_spill] sm:$0xff]  ;;  %5045 = vmatpush3.bf16.msra.mxu0 %v5946_v43 }
 0x243   : > { %v4728_v26 = vpop.f32.mrf.mxu0  ;;  %2029 = vmatmul.mubr.bf16.gmra.mxu1 %v1398_v31  ;;  %5046 = vmatprep.subr.bf16.mxu0 %v5947_v30  ;;  %v8879_v30 = vld [vmem:[#allocation52_spill] sm:$0xff] }
 0x244   : > { %2036 = vmatprep.mubr.bf16.mxu1 %v7318_v24 }
 0x245   : > { %v4729_v46 = vpop.f32.mrf.mxu0 }
 0x246   : > { %v7490_v9 = vadd.f32 %v4729_v46, %v4728_v26  ;;  %v1352_v26 = vsel %vm1264_vm3, %v8872_v1, %v5861_v15  ;;  %5047 = vmatpush3.bf16.msra.mxu0 %v5948_v37 }
 0x247   : > { %v7496_v57 = vpop.f32.mrf.mxu0  ;;  %v1410_v6 = vpack.c.bf16 %v1352_v26, %v1351_v22  ;;  %5048 = vmatprep.subr.bf16.mxu0 %v5949_v45  ;;  %v5956_v26 = vld [vmem:[#allocation7 + $0x80] sm:$0xff]  }
 0x248   : > { %v8880_v45 = vld [vmem:[#allocation36_spill] sm:$0xff] }
 0x249   : > { %v7498_v24 = vpop.f32.mrf.mxu0  ;;  %5435 = vmatmul.mubr.msk.bf16.gmra.mxu0 %vm1264_vm3, %v7488_v48 }
 0x24b   : > { %v4734_v35 = vpop.f32.mrf.mxu0  ;;  %2037 = vmatmul.mubr.bf16.gmra.mxu1 %v1402_v63 }
 0x24c   : > { %2044 = vmatprep.mubr.bf16.mxu1 %v7329_v59 }
 0x24d   : > { %v4735_v17 = vpop.f32.mrf.mxu0 }
 0x24e   : > { %v7503_v14 = vadd.f32 %v4735_v17, %v4734_v35  ;;  %v5869_v35 = vpop.permute.xlu1 %5868  ;;  %v5950_v17 = vld [vmem:[#allocation7 + $0x90] sm:$0xff]  }
 0x24f   : > { %v7509_v18 = vpop.f32.mrf.mxu0  ;;  %5049 = vmatpush3.bf16.msra.mxu0 %v5950_v17  ;;  %v5871_v8 = vunpack.i.h.bf16 %v5869_v35  ;;  %v5870_v4 = vunpack.i.l.bf16 %v5869_v35  ;;  %v8883_v35 = vld [vmem:[#allocation13_spill] sm:$0xff]  ;;  %v8884_v17 = vld [vmem:[#allocation14_spill] sm:$0xff] }
 0x251   : > { %v7511_v59 = vpop.f32.mrf.mxu0  ;;  %v1355_v60 = vsel %vm1264_vm3, %v7050_v61, %v5870_v4  ;;  %v1356_v5 = vsel %vm1264_vm3, %v8875_v52, %v5871_v8  ;;  %v5955_v61 = vld [vmem:[#allocation7 + $0xc0] sm:$0xff]   ;;  %v5958_v52 = vld [vmem:[#allocation7 + $0x130] sm:$0xff]  }
 0x252   : > { %v5879_v21 = vpop.permute.xlu1 %5878  ;;  %v1418_v43 = vpack.c.bf16 %v1356_v5, %v1355_v60  ;;  %v8886_v8 = vld [vmem:[#allocation12_spill] sm:$0xff]  ;;  %v5957_v60 = vld [vmem:[#allocation7 + $0x170] sm:$0xff]   ;;  %v5959_v5 = vld [vmem:[#allocation7 + $0x168] sm:$0xff]  }
 0x253   : > { %v4740_v42 = vpop.f32.mrf.mxu0  ;;  %2045 = vmatmul.mubr.bf16.gmra.mxu1 %v1406_v34  ;;  %v8876_v34 = vld [vmem:[#allocation50_spill] sm:$0xff]  ;;  %v5881_v22 = vunpack.i.h.bf16 %v5879_v21  ;;  %v5880_v1 = vunpack.i.l.bf16 %v5879_v21  ;;  %v7557_v4 = vpack.c.bf16 %v8886_v8, %v8886_v8  ;;  %v5960_v21 = vld [vmem:[#allocation7 + $0x128] sm:$0xff]  }
 0x254   : > { %2052 = vmatprep.mubr.bf16.mxu1 %v7344_v25  ;;  %v5865_v25 = vunpack.i.l.bf16 %v5864_v10  ;;  %v1361_v15 = vsel %vm1264_vm3, %v8876_v34, %v5875_v56  ;;  %v8878_v10 = vld [vmem:[#allocation51_spill] sm:$0xff]  ;;  %v5970_v8 = vld [vmem:[#allocation7 + $0x110] sm:$0xff]  }
 0x255   : > { %v4741_v33 = vpop.f32.mrf.mxu0  ;;  %v1358_v28 = vsel %vm1264_vm3, %v8879_v30, %v5881_v22  ;;  %8887 = vst [vmem:[#allocation16_spill] sm:$0xff] %v7557_v4  ;;  %v5954_v56 = vld [vmem:[#allocation7 + $0x138] sm:$0xff]  }
 0x256   : > { %v7514_v31 = vadd.f32 %v4741_v33, %v4740_v42  ;;  %v1353_v38 = vsel %vm1264_vm3, %v8873_v49, %v5865_v25  ;;  %v5951_v42 = vld [vmem:[#allocation7 + $0xc8] sm:$0xff]   ;;  %v5884_v25 = vpop.permute.xlu0 %5883 }
 0x257   : > { %v7520_v11 = vpop.f32.mrf.mxu0  ;;  %v1414_v50 = vpack.c.bf16 %v1354_v0, %v1353_v38  ;;  %v5952_v33 = vld [vmem:[#allocation7 + $0x88] sm:$0xff]   ;;  %5050 = vmatprep.subr.bf16.mxu0 %v5951_v42  ;;  %v5886_v37 = vunpack.i.h.bf16 %v5884_v25 }
 0x258   : > { %5051 = vmatpush3.bf16.msra.mxu0 %v5952_v33  ;;  %v8881_v49 = vld [vmem:[#allocation29_spill] sm:$0xff] }
 0x259   : > { %v7522_v46 = vpop.f32.mrf.mxu0  ;;  %5052 = vmatprep.subr.bf16.mxu0 %v5955_v61  ;;  %v1360_v0 = vsel %vm1264_vm3, %v8882_v29, %v5886_v37 }
 0x25b   : > { %v4746_v47 = vpop.f32.mrf.mxu0  ;;  %2053 = vmatmul.mubr.bf16.gmra.mxu1 %v1410_v6  ;;  %v1357_v6 = vsel %vm1264_vm3, %v8878_v10, %v5880_v1  ;;  %v5963_v10 = vld [vmem:[#allocation7 + $0x1f8] sm:$0xff]  }
 0x25c   : > { %2060 = vmatprep.mubr.bf16.mxu1 %v7355_v27  ;;  %v5876_v27 = vunpack.i.h.bf16 %v5874_v36  ;;  %5053 = vmatpush3.bf16.msra.mxu0 %v5956_v26  ;;  %v7551_v36 = vpack.c.bf16 %v8884_v17, %v8883_v35 }
 0x25d   : > { %v4747_v55 = vpop.f32.mrf.mxu0  ;;  %5262 = vmatprep.subr.bf16.mxu0 %v5963_v10 }
 0x25e   : > { %v7525_v63 = vadd.f32 %v4747_v55, %v4746_v47  ;;  %v1362_v40 = vsel %vm1264_vm3, %v8877_v41, %v5876_v27  ;;  %v1422_v47 = vpack.c.bf16 %v1358_v28, %v1357_v6  ;;  %v5885_v55 = vunpack.i.l.bf16 %v5884_v25  ;;  %8885 = vst [vmem:[#allocation15_spill] sm:$0xff] %v7551_v36  ;;  %v5965_v28 = vld [vmem:[#allocation7 + $0x158] sm:$0xff]  }
 0x25f   : > { %v7566_v34 = vpop.f32.mrf.mxu0  ;;  %v5966_v25 = vld [vmem:[#allocation7 + $0x118] sm:$0xff]  }
 0x260   : > { %v1359_v38 = vsel %vm1264_vm3, %v8881_v49, %v5885_v55 }
 0x263   : > { %2061 = vmatmul.mubr.bf16.gmra.mxu1 %v1414_v50  ;;  %v1426_v50 = vpack.c.bf16 %v1360_v0, %v1359_v38 }
 0x264   : > { %2068 = vmatprep.mubr.bf16.mxu1 %v7371_v58  ;;  %v1423_v58 = vpack.c.bf16 %v1362_v40, %v1361_v15  ;;  %v7568_v15 = vpop.f32.mrf.mxu0  ;;  %v5961_v40 = vld [vmem:[#allocation7 + $0x160] sm:$0xff]  }
 0x26b   : > { %2069 = vmatmul.mubr.bf16.gmra.mxu1 %v1418_v43  ;;  %v5962_v43 = vld [vmem:[#allocation7 + $0x120] sm:$0xff]  }
 0x26c   : > { %2076 = vmatprep.mubr.bf16.mxu1 %v1423_v58 }
 0x273   : > { %2077 = vmatmul.mubr.bf16.gmra.mxu1 %v1422_v47 }
 0x274   : > { %2084 = vmatprep.mubr.bf16.mxu1 %v8880_v45 }
 0x27b   : > { %2085 = vmatmul.mubr.bf16.gmra.mxu1 %v1426_v50  ;;  %v5969_v50 = vld [vmem:[#allocation7 + $0x150] sm:$0xff]  }
 0x27c   : > { %3369 = vmatprep.mubr.bf16.mxu1 %v7551_v36 }
 0x283   : > { %4486 = vmatmul.mubr.msk.bf16.vlgmr.msra.gmra.mxu1 %vm7559_vm6, %v7557_v4 }
 0x284   : > { %5151 = vmatpush3.bf16.msra.mxu1 %v5954_v56 }
 0x285   : > { %5152 = vmatprep.subr.bf16.mxu1 %v5957_v60 }
 0x288   : > { %5153 = vmatpush3.bf16.msra.mxu1 %v5958_v52 }
 0x289   : > { %5154 = vmatprep.subr.bf16.mxu1 %v5959_v5 }
 0x28c   : > { %5155 = vmatpush3.bf16.msra.mxu1 %v5960_v21 }
 0x28d   : > { %5156 = vmatprep.subr.bf16.mxu1 %v5961_v40 }
 0x290   : > { %5157 = vmatpush3.bf16.msra.mxu1 %v5962_v43 }
 0x291   : > { %5158 = vmatprep.subr.bf16.mxu1 %v5965_v28  ;;  %v5974_v28 = vld [vmem:[#allocation7 + $0x108] sm:$0xff]  }
 0x294   : > { %5159 = vmatpush3.bf16.msra.mxu1 %v5966_v25 }
 0x295   : > { %5160 = vmatprep.subr.bf16.mxu1 %v5969_v50  ;;  %v5977_v50 = vld [vmem:[#allocation7 + $0x140] sm:$0xff]  }
 0x298   : > { %5161 = vmatpush3.bf16.msra.mxu1 %v5970_v8  ;;  %v7611_v8 = vld [vmem:[%s8713_s2] ss:$0 sm:$0xff] }
 0x299   : > { %v4752_v41 = vpop.f32.mrf.mxu0 }
 0x29b   : > { %v4753_v42 = vpop.f32.mrf.mxu0 }
 0x29c   : > { %v7570_v33 = vadd.f32 %v4753_v42, %v4752_v41 }
 0x29d   : > { %v7572_v3 = vpop.f32.mrf.mxu0 }
 0x29f   : > { %v7574_v22 = vpop.f32.mrf.mxu0 }
 0x2a1   : > { %v4758_v1 = vpop.f32.mrf.mxu0 }
 0x2a3   : > { %v4759_v58 = vpop.f32.mrf.mxu0 }
 0x2a4   : > { %v7576_v61 = vadd.f32 %v4759_v58, %v4758_v1 }
 0x2a5   : > { %v7578_v26 = vpop.f32.mrf.mxu0 }
 0x2a7   : > { %v7580_v6 = vpop.f32.mrf.mxu0 }
 0x2a9   : > { %v4764_v30 = vpop.f32.mrf.mxu0 }
 0x2ab   : > { %v4765_v47 = vpop.f32.mrf.mxu0 }
 0x2ac   : > { %v7582_v37 = vadd.f32 %v4765_v47, %v4764_v30  ;;  %v5973_v30 = vld [vmem:[#allocation7 + $0x148] sm:$0xff]  }
 0x2ad   : > { %v7584_v55 = vpop.f32.mrf.mxu0  ;;  %5162 = vmatprep.subr.bf16.mxu1 %v5973_v30  ;;  %v4709_v30 = vadd.f32 %v7421_v39, %v7418_v19 }
 0x2ae   : > { %5163 = vmatpush3.bf16.msra.mxu1 %v5974_v28  ;;  %v4703_v28 = vadd.f32 %v7404_v23, %v7401_v12  ;;  %v4715_v12 = vadd.f32 %v7438_v62, %v7435_v16  ;;  %v4721_v23 = vadd.f32 %v7459_v2, %v7452_v20  ;;  %v1822_v16 = vadd.f32 %v7432_v13, %v7611_v8 }
 0x2af   : > { %v7586_v45 = vpop.f32.mrf.mxu0  ;;  %5164 = vmatprep.subr.bf16.mxu1 %v5977_v50  ;;  %v1817_v19 = vadd.f32 %v4709_v30, %v7611_v8  ;;  %v1830_v20 = vadd.f32 %v7449_v53, %v7611_v8  ;;  %v7653_v53 = vadd.f32 %v7490_v9, %v7611_v8 }
 0x2b0   : > { %v1825_v62 = vadd.f32 %v4715_v12, %v7611_v8  ;;  %v7639_v2 = vadd.f32 %v4721_v23, %v7611_v8 }
 0x2b1   : > { %v4770_v49 = vpop.f32.mrf.mxu0 }
 0x2b3   : > { %v4771_v38 = vpop.f32.mrf.mxu0 }
 0x2b4   : > { %v7588_v29 = vadd.f32 %v4771_v38, %v4770_v49 }
 0x2b5   : > { %v7590_v0 = vpop.f32.mrf.mxu0 }
 0x2b6   : > { %8890 = vst [vmem:[#allocation43_spill] sm:$0xff] %v7588_v29  ;;  %8891 = vst [vmem:[#allocation17_spill] sm:$0xff] %v7590_v0 }
 0x2b7   : > { %v7592_v35 = vpop.f32.mrf.mxu0 }
 0x2b8   : > { %8892 = vst [vmem:[#allocation18_spill] sm:$0xff] %v7592_v35 }
 0x2b9   : > { %v4776_v17 = vpop.f32.mrf.mxu0 }
 0x2bb   : > { %v4777_v56 = vpop.f32.mrf.mxu0 }
 0x2bc   : > { %v7594_v60 = vadd.f32 %v4777_v56, %v4776_v17 }
 0x2bd   : > { %v7596_v52 = vpop.f32.mrf.mxu0 }
 0x2be   : > { %8893 = vst [vmem:[#allocation48_spill] sm:$0xff] %v7594_v60  ;;  %8894 = vst [vmem:[#allocation19_spill] sm:$0xff] %v7596_v52 }
 0x2bf   : > { %v7598_v5 = vpop.f32.mrf.mxu0 }
 0x2c0   : > { %8895 = vst [vmem:[#allocation20_spill] sm:$0xff] %v7598_v5 }
 0x2c1   : > { %v4782_v21 = vpop.f32.mrf.mxu0 }
 0x2c3   : > { %v4810_v41 = vpop.f32.mrf.mxu1  ;;  %v4783_v40 = vpop.f32.mrf.mxu0 }
 0x2c4   : > { %v7600_v43 = vadd.f32 %v4783_v40, %v4782_v21  ;;  %v1814_v40 = vadd.f32 %v7415_v7, %v7611_v8 }
 0x2c5   : > { %v4811_v42 = vpop.f32.mrf.mxu1  ;;  %v7602_v1 = vpop.f32.mrf.mxu0 }
 0x2c6   : > { %8896 = vst [vmem:[#allocation21_spill] sm:$0xff] %v7600_v43  ;;  %8897 = vst [vmem:[#allocation22_spill] sm:$0xff] %v7602_v1  ;;  %v4812_v4 = vadd.f32 %v4811_v42, %v4810_v41 }
 0x2c7   : > { %v4813_v58 = vpop.f32.mrf.mxu1  ;;  %v7604_v10 = vpop.f32.mrf.mxu0 }
 0x2c8   : > { %8898 = vst [vmem:[#allocation23_spill] sm:$0xff] %v7604_v10  ;;  %v1806_v10 = vadd.f32 %v7398_v51, %v7611_v8 }
 0x2c9   : > { %v4814_v25 = vpop.f32.mrf.mxu1  ;;  %v4788_v47 = vpop.f32.mrf.mxu0 }
 0x2ca   : > { %v4815_v1 = vadd.f32 %v4814_v25, %v4813_v58  ;;  %v1967_v42 = vadd.f32 %v4812_v4, %v1806_v10 }
 0x2cb   : > { %v4816_v49 = vpop.f32.mrf.mxu1  ;;  %v4789_v38 = vpop.f32.mrf.mxu0 }
 0x2cc   : > { %v7606_v17 = vadd.f32 %v4789_v38, %v4788_v47 }
 0x2cd   : > { %v4817_v56 = vpop.f32.mrf.mxu1  ;;  %v7613_v21 = vpop.f32.mrf.mxu0 }
 0x2ce   : > { %8899 = vst [vmem:[#allocation24_spill] sm:$0xff] %v7606_v17  ;;  %8900 = vst [vmem:[#allocation25_spill] sm:$0xff] %v7613_v21  ;;  %v4818_v36 = vadd.f32 %v4817_v56, %v4816_v49  ;;  %v5978_v17 = vld [vmem:[#allocation7 + $0x100] sm:$0xff]   ;;  %v1809_v49 = vadd.f32 %v4703_v28, %v7611_v8 }
 0x2cf   : > { %v4819_v47 = vpop.f32.mrf.mxu1  ;;  %v7621_v38 = vpop.f32.mrf.mxu0  ;;  %5165 = vmatpush3.bf16.msra.mxu1 %v5978_v17  ;;  %v4727_v17 = vadd.f32 %v7478_v44, %v7474_v32 }
 0x2d0   : > { %8901 = vst [vmem:[#allocation26_spill] sm:$0xff] %v7621_v38  ;;  %v1975_v21 = vadd.f32 %v4818_v36, %v1814_v40  ;;  %v5964_v38 = vld [vmem:[#allocation7 + $0x1b8] sm:$0xff]  }
 0x2d1   : > { %v4820_v43 = vpop.f32.mrf.mxu1  ;;  %v5408_v7 = vpop.f32.mrf.mxu0  ;;  %v7649_v13 = vadd.f32 %v4727_v17, %v7611_v8  ;;  %v5985_v17 = vld [vmem:[#allocation7 + $0x238] sm:$0xff]  }
 0x2d2   : > { %v4821_v39 = vadd.f32 %v4820_v43, %v4819_v47  ;;  %v2136_v41 = vadd.f32 %v5408_v7, %v1975_v21  ;;  %v1970_v21 = vadd.f32 %v4815_v1, %v1809_v49  ;;  %5438 = vmatprep.subr.bf16.mxu1 %v5985_v17  ;;  %v5967_v17 = vld [vmem:[#allocation7 + $0x1f0] sm:$0xff]  }
 0x2d3   : > { %v4822_v50 = vpop.f32.mrf.mxu1  ;;  %v2127_v51 = vpop.f32.mrf.mxu0 }
 0x2d4   : > { %v2256_v36 = vmax.f32 %v2136_v41, 0.0  ;;  %v2128_v58 = vadd.f32 %v2127_v51, %v1967_v42  ;;  %v1978_v25 = vadd.f32 %v4821_v39, %v1817_v19  ;;  %v7646_v19 = vadd.f32 %v7468_v54, %v7611_v8 }
 0x2d5   : > { %v4823_v56 = vpop.f32.mrf.mxu1  ;;  %v5409_v43 = vpop.f32.mrf.mxu0  ;;  %v7657_v39 = vadd.f32 %v7498_v24, %v7496_v57 }
 0x2d6   : > { %v2321_v4 = vrot.slane %v2256_v36, 7  ;;  %v4824_v10 = vadd.f32 %v4823_v56, %v4822_v50  ;;  %v2254_v40 = vmax.f32 %v2128_v58, 0.0  ;;  %v2139_v30 = vadd.f32 %v5409_v43, %v1978_v25 }
 0x2d7   : > { %v4825_v28 = vpop.f32.mrf.mxu1  ;;  %v2130_v32 = vpop.f32.mrf.mxu0 }
 0x2d8   : > { %v7642_v44 = vsel %vm563_vm0, 0.0, %v2321_v4  ;;  %v2318_v1 = vrot.slane %v2254_v40, 7  ;;  %v2257_v47 = vmax.f32 %v2139_v30, 0.0  ;;  %v2131_v7 = vadd.f32 %v2130_v32, %v1970_v21 }
 0x2d9   : > { %v4826_v41 = vpop.f32.mrf.mxu1  ;;  %v5412_v42 = vpop.f32.mrf.mxu0  ;;  %v1983_v54 = vadd.f32 %v4824_v10, %v1822_v16  ;;  %v2481_v50 = vrot.slane %v7642_v44, 1 }
 0x2da   : > { %v7660_v49 = vsel %vm563_vm0, 0.0, %v2318_v1  ;;  %v2322_v12 = vrot.slane %v2257_v47, 7  ;;  %v2255_v23 = vmax.f32 %v2131_v7, 0.0  ;;  %v4827_v9 = vadd.f32 %v4826_v41, %v4825_v28 }
 0x2db   : > { %v2476_v36 = vrot.slane %v7660_v49, 1  ;;  %v4828_v58 = vpop.f32.mrf.mxu1  ;;  %v2143_v25 = vpop.f32.mrf.mxu0  ;;  %v2583_v21 = vrot.slane %v7660_v49, 2 }
 0x2dc   : > { %v7666_v57 = vsel %vm563_vm0, %v2321_v4, %v2322_v12  ;;  %v7669_v24 = vsel %vm563_vm0, %v2322_v12, 0.0  ;;  %v2319_v56 = vrot.slane %v2255_v23, 7  ;;  %v2144_v43 = vadd.f32 %v2143_v25, %v1983_v54 }
 0x2dd   : > { %v2482_v10 = vrot.slane %v7666_v57, 1  ;;  %v2484_v40 = vrot.slane %v7669_v24, 1  ;;  %v4829_v16 = vpop.f32.mrf.mxu1  ;;  %v5413_v28 = vpop.f32.mrf.mxu0  ;;  %v1986_v25 = vadd.f32 %v4827_v9, %v1825_v62  ;;  %v7678_v30 = vpack.c.bf16 %v7666_v57, %v2321_v4 }
 0x2de   : > { %v2320_v32 = vsel %vm563_vm0, %v2318_v1, %v2319_v56  ;;  %v2430_v47 = vsel %vm563_vm0, %v2319_v56, 0.0  ;;  %v4830_v7 = vadd.f32 %v4829_v16, %v4828_v58  ;;  %v2258_v41 = vmax.f32 %v2144_v43, 0.0 }
 0x2df   : > { %v2479_v12 = vrot.slane %v2430_v47, 1  ;;  %v2586_v23 = vrot.slane %v2430_v47, 2  ;;  %v4831_v54 = vpop.f32.mrf.mxu1  ;;  %v2146_v49 = vpop.f32.mrf.mxu0  ;;  %v4489_v51 = vpack.c.bf16 %v2320_v32, %v2318_v1  ;;  %v2477_v60 = vrot.slane %v2320_v32, 1 }
 0x2e0   : > { %v1991_v5 = vadd.f32 %v4830_v7, %v1830_v20  ;;  %v2324_v52 = vrot.slane %v2258_v41, 7  ;;  %v2147_v0 = vadd.f32 %v2146_v49, %v1986_v25  ;;  %v2483_v58 = vsel %vm730_vm1, %v2481_v50, %v2482_v10 }
 0x2e1   : > { %v4832_v35 = vpop.f32.mrf.mxu1  ;;  %v7680_v29 = vpop.f32.mrf.mxu0  ;;  %4550 = vmatprep.mubr.msk.bf16.mxu0 %vm7559_vm6, %v4489_v51  ;;  %v2485_v62 = vsel %vm730_vm1, %v2482_v10, %v2484_v40  ;;  %v2584_v1 = vrot.slane %v2320_v32, 2  ;;  %v2478_v56 = vsel %vm730_vm1, %v2476_v36, %v2477_v60  ;;  %v2591_v43 = vrot.slane %v7669_v24, 2  ;;  %v5971_v24 = vld [vmem:[#allocation7 + $0x1e8] sm:$0xff]  }
 0x2e2   : > { %v2152_v9 = vadd.f32 %v5412_v42, %v1991_v5  ;;  %v7687_v20 = vsel %vm563_vm0, 0.0, %v2324_v52  ;;  %v4833_v4 = vadd.f32 %v4832_v35, %v4831_v54  ;;  %3531 = vmatmul.mubr.bf16.vlgmr.msra.gmra.mxu0 %v7488_v48  ;;  %v2259_v47 = vmax.f32 %v2147_v0, 0.0  ;;  %v5968_v42 = vld [vmem:[#allocation7 + $0x1b0] sm:$0xff]  }
 0x2e3   : > { %v2486_v16 = vrot.slane %v7687_v20, 1  ;;  %v4834_v7 = vpop.f32.mrf.mxu1  ;;  %4554 = vmatprep.mubr.msk.bf16.mxu0 %vm7559_vm6, %v7678_v30  ;;  %v2480_v5 = vsel %vm730_vm1, %v2477_v60, %v2479_v12  ;;  %5263 = vmatpush3.bf16.msra.mxu0 %v5964_v38  ;;  %v7700_v36 = vpack.c.bf16 %v2485_v62, %v2483_v58  ;;  %v2159_v32 = vpop.f32.mrf.mxu0  ;;  %v2585_v41 = vsel %vm907_vm2, %v2583_v21, %v2584_v1 }
 0x2e4   : > { %v2260_v50 = vmax.f32 %v2152_v9, 0.0  ;;  %v1994_v35 = vadd.f32 %v4833_v4, %v7639_v2  ;;  %v7698_v10 = vpack.c.bf16 %v2480_v5, %v2478_v56  ;;  %5264 = vmatprep.subr.bf16.mxu0 %v5967_v17  ;;  %v2325_v40 = vrot.slane %v2259_v47, 7 }
 0x2e5   : > { %v4835_v0 = vpop.f32.mrf.mxu1  ;;  %v2587_v54 = vsel %vm907_vm2, %v2584_v1, %v2586_v23  ;;  %v8902_v60 = vrot.slane %v7666_v57, 2  ;;  %v8903_v38 = vrot.slane %v7642_v44, 2  ;;  %v2593_v58 = vrot.slane %v7687_v20, 2  ;;  %v5975_v20 = vld [vmem:[#allocation7 + $0x1e0] sm:$0xff]  }
 0x2e6   : > { %v2327_v2 = vrot.slane %v2260_v50, 7  ;;  %v2155_v25 = vadd.f32 %v5413_v28, %v1994_v35  ;;  %v4836_v49 = vadd.f32 %v4835_v0, %v4834_v7  ;;  %3377 = vmatprep.mubr.bf16.mxu1 %v7698_v10  ;;  %v7710_v17 = vpack.c.bf16 %v2587_v54, %v2585_v41  ;;  %v5972_v28 = vld [vmem:[#allocation7 + $0x1a8] sm:$0xff]   ;;  %v7723_v50 = vpop.f32.mrf.mxu0 }
 0x2e7   : > { %v2590_v12 = vsel %vm907_vm2, %v8903_v38, %v8902_v60  ;;  %v2326_v62 = vsel %vm563_vm0, %v2324_v52, %v2325_v40  ;;  %v2432_v21 = vsel %vm563_vm0, %v2325_v40, 0.0  ;;  %v4837_v23 = vpop.f32.mrf.mxu1  ;;  %4490 = vmatmul.mubr.msk.bf16.gmra.mxu1 %vm7559_vm6, %v4489_v51  ;;  %v8904_v44 = vmov %v8902_v60  ;;  %5265 = vmatpush3.bf16.msra.mxu0 %v5968_v42  ;;  %v5976_v60 = vld [vmem:[#allocation7 + $0x1a0] sm:$0xff]  }
 0x2e8   : > { %v2592_v1 = vsel %vm907_vm2, %v8904_v44, %v2591_v43  ;;  %v2417_v9 = vsel %vm563_vm0, 0.0, %v2327_v2  ;;  %v2261_v4 = vmax.f32 %v2155_v25, 0.0  ;;  %v2489_v56 = vrot.slane %v2432_v21, 1  ;;  %3385 = vmatprep.mubr.bf16.mxu1 %v7700_v36  ;;  %5266 = vmatprep.subr.bf16.mxu0 %v5971_v24  ;;  %v2162_v44 = vpop.f32.mrf.mxu0 }
 0x2e9   : > { %v2596_v47 = vrot.slane %v2432_v21, 2  ;;  %v2598_v7 = vrot.slane %v2417_v9, 2  ;;  %v1999_v5 = vadd.f32 %v4836_v49, %v7646_v19  ;;  %v4838_v51 = vpop.f32.mrf.mxu1  ;;  %v7725_v57 = vpack.c.bf16 %v2326_v62, %v2324_v52  ;;  %v5979_v49 = vld [vmem:[#allocation7 + $0x1d8] sm:$0xff]  }
 0x2ea   : > { %v2487_v43 = vrot.slane %v2326_v62, 1  ;;  %v2328_v42 = vrot.slane %v2261_v4, 7  ;;  %v4839_v35 = vadd.f32 %v4838_v51, %v4837_v23  ;;  %3539 = vmatmul.mubr.bf16.gmra.mxu0 %v7710_v17  ;;  %v7728_v40 = vpack.c.bf16 %v2592_v1, %v2590_v12 }
 0x2eb   : > { %v2491_v0 = vrot.slane %v2417_v9, 1  ;;  %v2160_v41 = vadd.f32 %v2159_v32, %v1999_v5  ;;  %v4840_v54 = vpop.f32.mrf.mxu1  ;;  %4558 = vmatprep.mubr.msk.bf16.mxu0 %vm7559_vm6, %v7725_v57  ;;  %v2594_v52 = vrot.slane %v2326_v62, 2  ;;  %5267 = vmatpush3.bf16.msra.mxu0 %v5972_v28 }
 0x2ec   : > { %v2488_v19 = vsel %vm730_vm1, %v2486_v16, %v2487_v43  ;;  %v2490_v24 = vsel %vm730_vm1, %v2487_v43, %v2489_v56  ;;  %v2433_v38 = vsel %vm563_vm0, %v2328_v42, 0.0  ;;  %v2002_v25 = vadd.f32 %v4839_v35, %v7649_v13  ;;  %5268 = vmatprep.subr.bf16.mxu0 %v5975_v20 }
 0x2ed   : > { %v7737_v12 = vpack.c.bf16 %v2490_v24, %v2488_v19  ;;  %v2329_v32 = vsel %vm563_vm0, %v2327_v2, %v2328_v42  ;;  %v2601_v21 = vrot.slane %v2433_v38, 2  ;;  %v2262_v23 = vmax.f32 %v2160_v41, 0.0  ;;  %v4841_v1 = vpop.f32.mrf.mxu1  ;;  %v5980_v42 = vld [vmem:[#allocation7 + $0x198] sm:$0xff]   ;;  %v5981_v19 = vld [vmem:[#allocation7 + $0x1d0] sm:$0xff]  }
 0x2ee   : > { %v2599_v16 = vrot.slane %v2329_v32, 2  ;;  %v7740_v9 = vpack.c.bf16 %v2329_v32, %v2327_v2  ;;  %v2163_v62 = vadd.f32 %v2162_v44, %v2002_v25  ;;  %v4842_v28 = vadd.f32 %v4841_v1, %v4840_v54 }
 0x2ef   : > { %v2492_v4 = vrot.slane %v2329_v32, 1  ;;  %v2494_v56 = vrot.slane %v2433_v38, 1  ;;  %v2330_v5 = vrot.slane %v2262_v23, 7  ;;  %v4843_v51 = vpop.f32.mrf.mxu1  ;;  %4494 = vmatmul.mubr.msk.bf16.gmra.mxu1 %vm7559_vm6, %v7678_v30  ;;  %v2595_v13 = vsel %vm907_vm2, %v2593_v58, %v2594_v52  ;;  %5269 = vmatpush3.bf16.msra.mxu0 %v5976_v60  ;;  %v7753_v58 = vpop.f32.mrf.mxu0 }
 0x2f0   : > { %v2597_v20 = vsel %vm907_vm2, %v2594_v52, %v2596_v47  ;;  %v2600_v43 = vsel %vm907_vm2, %v2598_v7, %v2599_v16  ;;  %v2263_v2 = vmax.f32 %v2163_v62, 0.0  ;;  %v2007_v35 = vadd.f32 %v4842_v28, %v7653_v53  ;;  %3393 = vmatprep.mubr.bf16.mxu1 %v7737_v12  ;;  %5270 = vmatprep.subr.bf16.mxu0 %v5979_v49  ;;  %v5983_v62 = vld [vmem:[#allocation7 + $0x1c8] sm:$0xff]  }
 0x2f1   : > { %v2493_v41 = vsel %vm730_vm1, %v2491_v0, %v2492_v4  ;;  %v2495_v54 = vsel %vm730_vm1, %v2492_v4, %v2494_v56  ;;  %v2418_v24 = vsel %vm563_vm0, 0.0, %v2330_v5  ;;  %v4844_v47 = vpop.f32.mrf.mxu1  ;;  %v7757_v7 = vpack.c.bf16 %v2597_v20, %v2595_v13  ;;  %v2175_v4 = vpop.f32.mrf.mxu0 }
 0x2f2   : > { %v7755_v52 = vpack.c.bf16 %v2495_v54, %v2493_v41  ;;  %v2602_v60 = vsel %vm907_vm2, %v2599_v16, %v2601_v21  ;;  %v1849_v53 = vadd.f32 %v7657_v39, %v7611_v8  ;;  %v1854_v0 = vadd.f32 %v7503_v14, %v7611_v8  ;;  %3547 = vmatmul.mubr.bf16.gmra.mxu0 %v7728_v40  ;;  %v5982_v39 = vld [vmem:[#allocation7 + $0x190] sm:$0xff]  }
 0x2f3   : > { %v2331_v38 = vrot.slane %v2263_v2, 7  ;;  %v2168_v25 = vadd.f32 %v7680_v29, %v2007_v35  ;;  %v4739_v32 = vadd.f32 %v7511_v59, %v7509_v18  ;;  %v2496_v49 = vrot.slane %v2418_v24, 1  ;;  %v4846_v44 = vpop.f32.mrf.mxu1  ;;  %4562 = vmatprep.mubr.msk.bf16.mxu0 %vm7559_vm6, %v7740_v9  ;;  %5271 = vmatpush3.bf16.msra.mxu0 %v5980_v42 }
 0x2f4   : > { %v4845_v23 = vadd.f32 %v4844_v47, %v4843_v51  ;;  %v7771_v21 = vpack.c.bf16 %v2602_v60, %v2600_v43  ;;  %v2603_v14 = vrot.slane %v2418_v24, 2  ;;  %5272 = vmatprep.subr.bf16.mxu0 %v5981_v19  ;;  %v5984_v19 = vld [vmem:[#allocation7 + $0x188] sm:$0xff]  }
 0x2f5   : > { %v2332_v1 = vsel %vm563_vm0, %v2330_v5, %v2331_v38  ;;  %v2434_v29 = vsel %vm563_vm0, %v2331_v38, 0.0  ;;  %v2264_v16 = vmax.f32 %v2168_v25, 0.0  ;;  %v4847_v51 = vpop.f32.mrf.mxu1  ;;  %v1857_v60 = vadd.f32 %v4739_v32, %v7611_v8  ;;  %v7789_v38 = vpop.f32.mrf.mxu0 }
 0x2f6   : > { %v2499_v18 = vrot.slane %v2434_v29, 1  ;;  %v2604_v59 = vrot.slane %v2332_v1, 2  ;;  %v2606_v28 = vrot.slane %v2434_v29, 2  ;;  %v2010_v56 = vadd.f32 %v4845_v23, %v1849_v53 }
 0x2f7   : > { %v2333_v13 = vrot.slane %v2264_v16, 7  ;;  %v4848_v20 = vadd.f32 %v4847_v51, %v4846_v44  ;;  %v7775_v43 = vpack.c.bf16 %v2332_v1, %v2330_v5  ;;  %v2497_v42 = vrot.slane %v2332_v1, 1  ;;  %v4849_v35 = vpop.f32.mrf.mxu1  ;;  %4498 = vmatmul.mubr.msk.bf16.gmra.mxu1 %vm7559_vm6, %v7725_v57  ;;  %5273 = vmatpush3.bf16.msra.mxu0 %v5982_v39 }
 0x2f8   : > { %v2171_v2 = vadd.f32 %v7723_v50, %v2010_v56  ;;  %v2605_v41 = vsel %vm907_vm2, %v2603_v14, %v2604_v59  ;;  %v2607_v54 = vsel %vm907_vm2, %v2604_v59, %v2606_v28  ;;  %3401 = vmatprep.mubr.bf16.mxu1 %v7755_v52  ;;  %5274 = vmatprep.subr.bf16.mxu0 %v5983_v62  ;;  %v5986_v50 = vld [vmem:[#allocation7 + $0x1c0] sm:$0xff]   ;;  %v2178_v59 = vpop.f32.mrf.mxu0 }
 0x2f9   : > { %v2015_v24 = vadd.f32 %v4848_v20, %v1854_v0  ;;  %v2498_v5 = vsel %vm730_vm1, %v2496_v49, %v2497_v42  ;;  %v2500_v47 = vsel %vm730_vm1, %v2497_v42, %v2499_v18  ;;  %v4745_v53 = vadd.f32 %v7522_v46, %v7520_v11  ;;  %v4850_v23 = vpop.f32.mrf.mxu1  ;;  %v5987_v11 = vld [vmem:[#allocation7 + $0x180] sm:$0xff]  }
 0x2fa   : > { %v2265_v25 = vmax.f32 %v2171_v2, 0.0  ;;  %v7791_v44 = vpack.c.bf16 %v2500_v47, %v2498_v5  ;;  %v2419_v0 = vsel %vm563_vm0, 0.0, %v2333_v13  ;;  %v4851_v14 = vadd.f32 %v4850_v23, %v4849_v35  ;;  %3555 = vmatmul.mubr.bf16.gmra.mxu0 %v7757_v7 }
 0x2fb   : > { %v2176_v39 = vadd.f32 %v2175_v4, %v2015_v24  ;;  %v7795_v49 = vpack.c.bf16 %v2607_v54, %v2605_v41  ;;  %v4852_v29 = vpop.f32.mrf.mxu1  ;;  %4566 = vmatprep.mubr.msk.bf16.mxu0 %vm7559_vm6, %v7775_v43  ;;  %5275 = vmatpush3.bf16.msra.mxu0 %v5984_v19  ;;  %v1862_v46 = vadd.f32 %v7514_v31, %v7611_v8  ;;  %v2501_v56 = vrot.slane %v2419_v0, 1 }
 0x2fc   : > { %v2334_v1 = vrot.slane %v2265_v25, 7  ;;  %v2018_v16 = vadd.f32 %v4851_v14, %v1857_v60  ;;  %5276 = vmatprep.subr.bf16.mxu0 %v5986_v50  ;;  %v1865_v62 = vadd.f32 %v4745_v53, %v7611_v8  ;;  %v1870_v24 = vadd.f32 %v7525_v63, %v7611_v8  ;;  %v7816_v25 = vpop.f32.mrf.mxu0 }
 0x2fd   : > { %v2266_v32 = vmax.f32 %v2176_v39, 0.0  ;;  %v4853_v28 = vpop.f32.mrf.mxu1  ;;  %v4751_v60 = vadd.f32 %v7568_v15, %v7566_v34  ;;  %v2608_v53 = vrot.slane %v2419_v0, 2 }
 0x2fe   : > { %v2435_v18 = vsel %vm563_vm0, %v2334_v1, 0.0  ;;  %v2335_v4 = vsel %vm563_vm0, %v2333_v13, %v2334_v1  ;;  %v2179_v42 = vadd.f32 %v2178_v59, %v2018_v16  ;;  %v4854_v2 = vadd.f32 %v4853_v28, %v4852_v29  ;;  %v2191_v59 = vpop.f32.mrf.mxu0 }
 0x2ff   : > { %v2611_v51 = vrot.slane %v2435_v18, 2  ;;  %v2336_v20 = vrot.slane %v2266_v32, 7  ;;  %v4855_v35 = vpop.f32.mrf.mxu1  ;;  %4502 = vmatmul.mubr.msk.bf16.gmra.mxu1 %vm7559_vm6, %v7740_v9  ;;  %v2609_v31 = vrot.slane %v2335_v4, 2  ;;  %v7808_v41 = vpack.c.bf16 %v2335_v4, %v2333_v13  ;;  %5277 = vmatpush3.bf16.msra.mxu0 %v5987_v11 }
 0x300   : > { %v2502_v54 = vrot.slane %v2335_v4, 1  ;;  %v2504_v19 = vrot.slane %v2435_v18, 1  ;;  %v2267_v47 = vmax.f32 %v2179_v42, 0.0  ;;  %v2023_v50 = vadd.f32 %v4854_v2, %v1862_v46  ;;  %3409 = vmatprep.mubr.bf16.mxu1 %v7791_v44 }
 0x301   : > { %v2420_v5 = vsel %vm563_vm0, 0.0, %v2336_v20  ;;  %v4856_v13 = vpop.f32.mrf.mxu1  ;;  %v2610_v15 = vsel %vm907_vm2, %v2608_v53, %v2609_v31  ;;  %v2612_v0 = vsel %vm907_vm2, %v2609_v31, %v2611_v51 }
 0x302   : > { %v2503_v23 = vsel %vm730_vm1, %v2501_v56, %v2502_v54  ;;  %v2505_v39 = vsel %vm730_vm1, %v2502_v54, %v2504_v19  ;;  %v2337_v14 = vrot.slane %v2267_v47, 7  ;;  %v2184_v63 = vadd.f32 %v7753_v58, %v2023_v50  ;;  %3563 = vmatmul.mubr.bf16.gmra.mxu0 %v7771_v21 }
 0x303   : > { %v4857_v1 = vadd.f32 %v4856_v13, %v4855_v35  ;;  %v7822_v29 = vpack.c.bf16 %v2505_v39, %v2503_v23  ;;  %v2613_v11 = vrot.slane %v2420_v5, 2  ;;  %v4858_v46 = vpop.f32.mrf.mxu1  ;;  %4570 = vmatprep.mubr.msk.bf16.mxu0 %vm7559_vm6, %v7808_v41  ;;  %v2506_v34 = vrot.slane %v2420_v5, 1  ;;  %v7845_v23 = vpop.f32.mrf.mxu0 }
 0x304   : > { %v2436_v32 = vsel %vm563_vm0, %v2337_v14, 0.0  ;;  %v2268_v16 = vmax.f32 %v2184_v63, 0.0  ;;  %v2338_v18 = vsel %vm563_vm0, %v2336_v20, %v2337_v14  ;;  %v7838_v51 = vpack.c.bf16 %v2612_v0, %v2610_v15 }
 0x305   : > { %v2026_v58 = vadd.f32 %v4857_v1, %v1865_v62  ;;  %v2616_v28 = vrot.slane %v2436_v32, 2  ;;  %v4859_v4 = vpop.f32.mrf.mxu1  ;;  %v2614_v56 = vrot.slane %v2338_v18, 2  ;;  %v7831_v42 = vpack.c.bf16 %v2338_v18, %v2336_v20 }
 0x306   : > { %v2507_v2 = vrot.slane %v2338_v18, 1  ;;  %v2339_v35 = vrot.slane %v2268_v16, 7  ;;  %v4860_v19 = vadd.f32 %v4859_v4, %v4858_v46  ;;  %v2509_v5 = vrot.slane %v2436_v32, 1 }
 0x307   : > { %v2187_v54 = vadd.f32 %v7789_v38, %v2026_v58  ;;  %v4861_v47 = vpop.f32.mrf.mxu1  ;;  %4506 = vmatmul.mubr.msk.bf16.gmra.mxu1 %vm7559_vm6, %v7775_v43  ;;  %v2615_v31 = vsel %vm907_vm2, %v2613_v11, %v2614_v56  ;;  %v2617_v20 = vsel %vm907_vm2, %v2614_v56, %v2616_v28  ;;  %v1873_v1 = vadd.f32 %v4751_v60, %v7611_v8  ;;  %v2194_v28 = vpop.f32.mrf.mxu0 }
 0x308   : > { %v2508_v62 = vsel %vm730_vm1, %v2506_v34, %v2507_v2  ;;  %v2421_v50 = vsel %vm563_vm0, 0.0, %v2339_v35  ;;  %v2031_v13 = vadd.f32 %v4860_v19, %v1870_v24  ;;  %3417 = vmatprep.mubr.bf16.mxu1 %v7822_v29  ;;  %v2510_v38 = vsel %vm730_vm1, %v2507_v2, %v2509_v5 }
 0x309   : > { %v2269_v53 = vmax.f32 %v2187_v54, 0.0  ;;  %v4862_v39 = vpop.f32.mrf.mxu1  ;;  %v7847_v14 = vpack.c.bf16 %v2510_v38, %v2508_v62  ;;  %v7849_v63 = vpack.c.bf16 %v2617_v20, %v2615_v31  ;;  %v1878_v24 = vadd.f32 %v7570_v33, %v7611_v8  ;;  %v7873_v38 = vpop.f32.mrf.mxu0 }
 0x30a   : > { %v2192_v46 = vadd.f32 %v2191_v59, %v2031_v13  ;;  %v4863_v34 = vadd.f32 %v4862_v39, %v4861_v47  ;;  %3571 = vmatmul.mubr.bf16.gmra.mxu0 %v7795_v49  ;;  %v4757_v15 = vadd.f32 %v7574_v22, %v7572_v3  ;;  %v2618_v0 = vrot.slane %v2421_v50, 2 }
 0x30b   : > { %v2340_v11 = vrot.slane %v2269_v53, 7  ;;  %v4864_v32 = vpop.f32.mrf.mxu1  ;;  %4574 = vmatprep.mubr.msk.bf16.mxu0 %vm7559_vm6, %v7831_v42  ;;  %v2511_v16 = vrot.slane %v2421_v50, 1 }
 0x30c   : > { %v2270_v58 = vmax.f32 %v2192_v46, 0.0  ;;  %v2034_v18 = vadd.f32 %v4863_v34, %v1873_v1  ;;  %v1881_v46 = vadd.f32 %v4757_v15, %v7611_v8 }
 0x30d   : > { %v2437_v60 = vsel %vm563_vm0, %v2340_v11, 0.0  ;;  %v2341_v59 = vsel %vm563_vm0, %v2339_v35, %v2340_v11  ;;  %v4865_v56 = vpop.f32.mrf.mxu1 }
 0x30e   : > { %v2621_v4 = vrot.slane %v2437_v60, 2  ;;  %v2619_v33 = vrot.slane %v2341_v59, 2  ;;  %v7862_v2 = vpack.c.bf16 %v2341_v59, %v2339_v35  ;;  %v2512_v3 = vrot.slane %v2341_v59, 1 }
 0x30f   : > { %v2342_v22 = vrot.slane %v2270_v58, 7  ;;  %v2195_v54 = vadd.f32 %v2194_v28, %v2034_v18  ;;  %v4866_v19 = vadd.f32 %v4865_v56, %v4864_v32  ;;  %v2514_v5 = vrot.slane %v2437_v60, 1  ;;  %v4867_v47 = vpop.f32.mrf.mxu1  ;;  %4510 = vmatmul.mubr.msk.bf16.gmra.mxu1 %vm7559_vm6, %v7808_v41 }
 0x310   : > { %v2513_v62 = vsel %vm730_vm1, %v2511_v16, %v2512_v3  ;;  %v2620_v31 = vsel %vm907_vm2, %v2618_v0, %v2619_v33  ;;  %v2622_v20 = vsel %vm907_vm2, %v2619_v33, %v2621_v4  ;;  %3425 = vmatprep.mubr.bf16.mxu1 %v7847_v14  ;;  %v4763_v16 = vadd.f32 %v7580_v6, %v7578_v26  ;;  %v2207_v4 = vpop.f32.mrf.mxu0 }
 0x311   : > { %v2422_v50 = vsel %vm563_vm0, 0.0, %v2342_v22  ;;  %v2271_v35 = vmax.f32 %v2195_v54, 0.0  ;;  %v2039_v53 = vadd.f32 %v4866_v19, %v1878_v24  ;;  %v2515_v13 = vsel %vm730_vm1, %v2512_v3, %v2514_v5  ;;  %v4868_v39 = vpop.f32.mrf.mxu1 }
 0x312   : > { %v7875_v1 = vpack.c.bf16 %v2515_v13, %v2513_v62  ;;  %v7877_v11 = vpack.c.bf16 %v2622_v20, %v2620_v31  ;;  %v4869_v32 = vadd.f32 %v4868_v39, %v4867_v47  ;;  %3579 = vmatmul.mubr.bf16.gmra.mxu0 %v7838_v51  ;;  %v1886_v24 = vadd.f32 %v7576_v61, %v7611_v8 }
 0x313   : > { %v2343_v34 = vrot.slane %v2271_v35, 7  ;;  %v2200_v0 = vadd.f32 %v7816_v25, %v2039_v53  ;;  %v2623_v60 = vrot.slane %v2422_v50, 2  ;;  %v4870_v58 = vpop.f32.mrf.mxu1  ;;  %4578 = vmatprep.mubr.msk.bf16.mxu0 %vm7559_vm6, %v7862_v2  ;;  %v2516_v18 = vrot.slane %v2422_v50, 1  ;;  %v7903_v53 = vpop.f32.mrf.mxu0 }
 0x314   : > { %v2042_v25 = vadd.f32 %v4869_v32, %v1881_v46 }
 0x315   : > { %v2438_v15 = vsel %vm563_vm0, %v2343_v34, 0.0  ;;  %v2272_v59 = vmax.f32 %v2200_v0, 0.0  ;;  %v2344_v28 = vsel %vm563_vm0, %v2342_v22, %v2343_v34  ;;  %v4871_v33 = vpop.f32.mrf.mxu1  ;;  %v1889_v34 = vadd.f32 %v4763_v16, %v7611_v8 }
 0x316   : > { %v2626_v56 = vrot.slane %v2438_v15, 2  ;;  %v2624_v61 = vrot.slane %v2344_v28, 2  ;;  %v7891_v3 = vpack.c.bf16 %v2344_v28, %v2342_v22  ;;  %v2517_v26 = vrot.slane %v2344_v28, 1 }
 0x317   : > { %v2345_v6 = vrot.slane %v2272_v59, 7  ;;  %v2203_v54 = vadd.f32 %v7845_v23, %v2042_v25  ;;  %v4872_v19 = vadd.f32 %v4871_v33, %v4870_v58  ;;  %v2519_v5 = vrot.slane %v2438_v15, 1  ;;  %v4873_v47 = vpop.f32.mrf.mxu1  ;;  %4514 = vmatmul.mubr.msk.bf16.gmra.mxu1 %vm7559_vm6, %v7831_v42 }
 0x318   : > { %v2518_v62 = vsel %vm730_vm1, %v2516_v18, %v2517_v26  ;;  %v2625_v31 = vsel %vm907_vm2, %v2623_v60, %v2624_v61  ;;  %v2627_v20 = vsel %vm907_vm2, %v2624_v61, %v2626_v56  ;;  %3433 = vmatprep.mubr.bf16.mxu1 %v7875_v1  ;;  %v4769_v58 = vadd.f32 %v7586_v45, %v7584_v55  ;;  %v2210_v56 = vpop.f32.mrf.mxu0 }
 0x319   : > { %v2423_v22 = vsel %vm563_vm0, 0.0, %v2345_v6  ;;  %v2273_v50 = vmax.f32 %v2203_v54, 0.0  ;;  %v2047_v35 = vadd.f32 %v4872_v19, %v1886_v24  ;;  %v2520_v23 = vsel %vm730_vm1, %v2517_v26, %v2519_v5  ;;  %v4874_v13 = vpop.f32.mrf.mxu1 }
 0x31a   : > { %v7905_v39 = vpack.c.bf16 %v2520_v23, %v2518_v62  ;;  %v7907_v46 = vpack.c.bf16 %v2627_v20, %v2625_v31  ;;  %v4875_v60 = vadd.f32 %v4874_v13, %v4873_v47  ;;  %3587 = vmatmul.mubr.bf16.gmra.mxu0 %v7849_v63  ;;  %v1894_v24 = vadd.f32 %v7582_v37, %v7611_v8  ;;  %v7931_v23 = vpop.f32.mrf.mxu0 }
 0x31b   : > { %v2346_v0 = vrot.slane %v2273_v50, 7  ;;  %v2208_v32 = vadd.f32 %v2207_v4, %v2047_v35  ;;  %v2628_v18 = vrot.slane %v2423_v22, 2  ;;  %v4876_v15 = vpop.f32.mrf.mxu1  ;;  %4582 = vmatprep.mubr.msk.bf16.mxu0 %vm7559_vm6, %v7891_v3  ;;  %v2521_v59 = vrot.slane %v2423_v22, 1 }
 0x31c   : > { %v2050_v28 = vadd.f32 %v4875_v60, %v1889_v34 }
 0x31d   : > { %v2439_v16 = vsel %vm563_vm0, %v2346_v0, 0.0  ;;  %v2274_v25 = vmax.f32 %v2208_v32, 0.0  ;;  %v2347_v4 = vsel %vm563_vm0, %v2345_v6, %v2346_v0  ;;  %v4877_v61 = vpop.f32.mrf.mxu1  ;;  %v1897_v32 = vadd.f32 %v4769_v58, %v7611_v8 }
 0x31e   : > { %v2631_v33 = vrot.slane %v2439_v16, 2  ;;  %v2629_v37 = vrot.slane %v2347_v4, 2  ;;  %v7920_v26 = vpack.c.bf16 %v2347_v4, %v2345_v6  ;;  %v2522_v55 = vrot.slane %v2347_v4, 1 }
 0x31f   : > { %v2348_v45 = vrot.slane %v2274_v25, 7  ;;  %v2211_v54 = vadd.f32 %v2210_v56, %v2050_v28  ;;  %v4878_v19 = vadd.f32 %v4877_v61, %v4876_v15  ;;  %v2524_v5 = vrot.slane %v2439_v16, 1  ;;  %v4879_v47 = vpop.f32.mrf.mxu1  ;;  %4518 = vmatmul.mubr.msk.bf16.gmra.mxu1 %vm7559_vm6, %v7862_v2  ;;  %v8906_v16 = vld [vmem:[#allocation17_spill] sm:$0xff]  ;;  %v8907_v25 = vld [vmem:[#allocation18_spill] sm:$0xff] }
 0x320   : > { %v2523_v62 = vsel %vm730_vm1, %v2521_v59, %v2522_v55  ;;  %v2630_v31 = vsel %vm907_vm2, %v2628_v18, %v2629_v37  ;;  %v2632_v20 = vsel %vm907_vm2, %v2629_v37, %v2631_v33  ;;  %3441 = vmatprep.mubr.bf16.mxu1 %v7905_v39  ;;  %v4775_v28 = vadd.f32 %v8907_v25, %v8906_v16 }
 0x321   : > { %v2424_v22 = vsel %vm563_vm0, 0.0, %v2348_v45  ;;  %v2275_v6 = vmax.f32 %v2211_v54, 0.0  ;;  %v2055_v50 = vadd.f32 %v4878_v19, %v1894_v24  ;;  %v2525_v35 = vsel %vm730_vm1, %v2522_v55, %v2524_v5  ;;  %v4880_v13 = vpop.f32.mrf.mxu1  ;;  %v8905_v24 = vld [vmem:[#allocation43_spill] sm:$0xff]  ;;  %v2223_v55 = vpop.f32.mrf.mxu0 }
 0x322   : > { %v7933_v34 = vpack.c.bf16 %v2525_v35, %v2523_v62  ;;  %v7935_v0 = vpack.c.bf16 %v2632_v20, %v2630_v31  ;;  %v4881_v15 = vadd.f32 %v4880_v13, %v4879_v47  ;;  %3595 = vmatmul.mubr.bf16.gmra.mxu0 %v7877_v11  ;;  %v1902_v59 = vadd.f32 %v8905_v24, %v7611_v8 }
 0x323   : > { %v2349_v60 = vrot.slane %v2275_v6, 7  ;;  %v2216_v18 = vadd.f32 %v7873_v38, %v2055_v50  ;;  %v2633_v4 = vrot.slane %v2424_v22, 2  ;;  %v4882_v56 = vpop.f32.mrf.mxu1  ;;  %4586 = vmatprep.mubr.msk.bf16.mxu0 %vm7559_vm6, %v7920_v26  ;;  %v2526_v33 = vrot.slane %v2424_v22, 1 }
 0x324   : > { %v2058_v38 = vadd.f32 %v4881_v15, %v1897_v32  ;;  %v7961_v15 = vpop.f32.mrf.mxu0 }
 0x325   : > { %v2440_v58 = vsel %vm563_vm0, %v2349_v60, 0.0  ;;  %v2276_v61 = vmax.f32 %v2216_v18, 0.0  ;;  %v2350_v37 = vsel %vm563_vm0, %v2348_v45, %v2349_v60  ;;  %v4883_v19 = vpop.f32.mrf.mxu1 }
 0x326   : > { %v2636_v54 = vrot.slane %v2440_v58, 2  ;;  %v2634_v5 = vrot.slane %v2350_v37, 2  ;;  %v7949_v47 = vpack.c.bf16 %v2350_v37, %v2348_v45  ;;  %v2527_v62 = vrot.slane %v2350_v37, 1  ;;  %v8913_v37 = vld [vmem:[#allocation20_spill] sm:$0xff] }
 0x327   : > { %v2351_v31 = vrot.slane %v2276_v61, 7  ;;  %v2219_v20 = vadd.f32 %v7903_v53, %v2058_v38  ;;  %v4884_v6 = vadd.f32 %v4883_v19, %v4882_v56  ;;  %v2529_v50 = vrot.slane %v2440_v58, 1  ;;  %v4885_v35 = vpop.f32.mrf.mxu1  ;;  %4522 = vmatmul.mubr.msk.bf16.gmra.mxu1 %vm7559_vm6, %v7891_v3  ;;  %v8912_v38 = vld [vmem:[#allocation19_spill] sm:$0xff] }
 0x328   : > { %8908 = vst [vmem:[#allocation27_spill] sm:$0xff] %v7949_v47  ;;  %v2528_v22 = vsel %vm730_vm1, %v2526_v33, %v2527_v62  ;;  %v2635_v13 = vsel %vm907_vm2, %v2633_v4, %v2634_v5  ;;  %v2637_v32 = vsel %vm907_vm2, %v2634_v5, %v2636_v54  ;;  %3449 = vmatprep.mubr.bf16.mxu1 %v7933_v34 }
 0x329   : > { %v2425_v45 = vsel %vm563_vm0, 0.0, %v2351_v31  ;;  %v2277_v60 = vmax.f32 %v2219_v20, 0.0  ;;  %v2063_v18 = vadd.f32 %v4884_v6, %v1902_v59  ;;  %v2530_v53 = vsel %vm730_vm1, %v2527_v62, %v2529_v50  ;;  %v4886_v24 = vpop.f32.mrf.mxu1  ;;  %v8911_v59 = vld [vmem:[#allocation48_spill] sm:$0xff]  ;;  %v2226_v50 = vpop.f32.mrf.mxu0 }
 0x32a   : > { %v7963_v16 = vpack.c.bf16 %v2530_v53, %v2528_v22  ;;  %v7965_v25 = vpack.c.bf16 %v2637_v32, %v2635_v13  ;;  %v1905_v56 = vadd.f32 %v4775_v28, %v7611_v8  ;;  %v4887_v58 = vadd.f32 %v4886_v24, %v4885_v35  ;;  %3603 = vmatmul.mubr.bf16.gmra.mxu0 %v7907_v46 }
 0x32b   : > { %v2352_v4 = vrot.slane %v2277_v60, 7  ;;  %v2224_v33 = vadd.f32 %v2223_v55, %v2063_v18  ;;  %v1910_v61 = vadd.f32 %v8911_v59, %v7611_v8  ;;  %v4781_v54 = vadd.f32 %v8913_v37, %v8912_v38  ;;  %v4888_v5 = vpop.f32.mrf.mxu1  ;;  %4590 = vmatprep.mubr.msk.bf16.mxu0 %vm7559_vm6, %v7949_v47 }
 0x32c   : > { %8909 = vst [vmem:[#allocation28_spill] sm:$0xff] %v7963_v16  ;;  %8910 = vst [vmem:[#allocation30_spill] sm:$0xff] %v7965_v25  ;;  %v2638_v19 = vrot.slane %v2425_v45, 2  ;;  %v2531_v62 = vrot.slane %v2425_v45, 1  ;;  %v2066_v55 = vadd.f32 %v4887_v58, %v1905_v56  ;;  %v7983_v45 = vpop.f32.mrf.mxu0 }
 0x32d   : > { %v2441_v28 = vsel %vm563_vm0, %v2352_v4, 0.0  ;;  %v2278_v20 = vmax.f32 %v2224_v33, 0.0  ;;  %v2353_v6 = vsel %vm563_vm0, %v2351_v31, %v2352_v4  ;;  %v4889_v22 = vpop.f32.mrf.mxu1 }
 0x32e   : > { %v2641_v35 = vrot.slane %v2441_v28, 2  ;;  %v2639_v8 = vrot.slane %v2353_v6, 2  ;;  %v7978_v13 = vpack.c.bf16 %v2353_v6, %v2351_v31  ;;  %v2532_v32 = vrot.slane %v2353_v6, 1 }
 0x32f   : > { %v2354_v60 = vrot.slane %v2278_v20, 7  ;;  %v2227_v18 = vadd.f32 %v2226_v50, %v2066_v55  ;;  %v4890_v53 = vadd.f32 %v4889_v22, %v4888_v5  ;;  %v2534_v24 = vrot.slane %v2441_v28, 1  ;;  %v4891_v59 = vpop.f32.mrf.mxu1  ;;  %4526 = vmatmul.mubr.msk.bf16.gmra.mxu1 %vm7559_vm6, %v7920_v26  ;;  %v8915_v50 = vld [vmem:[#allocation21_spill] sm:$0xff]  ;;  %v8916_v22 = vld [vmem:[#allocation22_spill] sm:$0xff] }
 0x330   : > { %v2533_v56 = vsel %vm730_vm1, %v2531_v62, %v2532_v32  ;;  %v2640_v4 = vsel %vm907_vm2, %v2638_v19, %v2639_v8  ;;  %v2642_v33 = vsel %vm907_vm2, %v2639_v8, %v2641_v35  ;;  %3457 = vmatprep.mubr.bf16.mxu1 %v7963_v16  ;;  %v7998_v62 = vld [vmem:[%s8713_s2] ss:$0 sm:$0xff]  ;;  %v8917_v8 = vld [vmem:[#allocation23_spill] sm:$0xff] }
 0x331   : > { %v2426_v31 = vsel %vm563_vm0, 0.0, %v2354_v60  ;;  %v2279_v58 = vmax.f32 %v2227_v18, 0.0  ;;  %v2071_v38 = vadd.f32 %v4890_v53, %v1910_v61  ;;  %v2535_v37 = vsel %vm730_vm1, %v2532_v32, %v2534_v24  ;;  %v4892_v5 = vpop.f32.mrf.mxu1  ;;  %v2239_v24 = vpop.f32.mrf.mxu0 }
 0x332   : > { %v7991_v28 = vpack.c.bf16 %v2535_v37, %v2533_v56  ;;  %v7993_v20 = vpack.c.bf16 %v2642_v33, %v2640_v4  ;;  %v1913_v19 = vadd.f32 %v7998_v62, %v4781_v54  ;;  %v4893_v61 = vadd.f32 %v4892_v5, %v4891_v59  ;;  %3611 = vmatmul.mubr.bf16.gmra.mxu0 %v7935_v0 }
 0x333   : > { %v2355_v55 = vrot.slane %v2279_v58, 7  ;;  %v2232_v6 = vadd.f32 %v7931_v23, %v2071_v38  ;;  %v1918_v35 = vadd.f32 %v7998_v62, %v8915_v50  ;;  %v4787_v32 = vadd.f32 %v8917_v8, %v8916_v22  ;;  %v4894_v53 = vpop.f32.mrf.mxu1  ;;  %4594 = vmatprep.mubr.msk.bf16.mxu0 %vm7559_vm6, %v7978_v13 }
 0x334   : > { %8914 = vst [vmem:[#allocation31_spill] sm:$0xff] %v7991_v28  ;;  %v2643_v18 = vrot.slane %v2426_v31, 2  ;;  %v2536_v54 = vrot.slane %v2426_v31, 1  ;;  %v2074_v59 = vadd.f32 %v4893_v61, %v1913_v19  ;;  %v8018_v31 = vpop.f32.mrf.mxu0 }
 0x335   : > { %v2442_v56 = vsel %vm563_vm0, %v2355_v55, 0.0  ;;  %v2280_v23 = vmax.f32 %v2232_v6, 0.0  ;;  %v2356_v4 = vsel %vm563_vm0, %v2354_v60, %v2355_v55  ;;  %v4895_v58 = vpop.f32.mrf.mxu1 }
 0x336   : > { %v2646_v33 = vrot.slane %v2442_v56, 2  ;;  %v2644_v38 = vrot.slane %v2356_v4, 2  ;;  %v8012_v37 = vpack.c.bf16 %v2356_v4, %v2354_v60  ;;  %v2537_v5 = vrot.slane %v2356_v4, 1 }
 0x337   : > { %v2357_v50 = vrot.slane %v2280_v23, 7  ;;  %v2235_v22 = vadd.f32 %v7961_v15, %v2074_v59  ;;  %v4896_v8 = vadd.f32 %v4895_v58, %v4894_v53  ;;  %v2539_v48 = vrot.slane %v2442_v56, 1  ;;  %v4897_v16 = vpop.f32.mrf.mxu1  ;;  %4530 = vmatmul.mubr.msk.bf16.gmra.mxu1 %vm7559_vm6, %v7949_v47 }
 0x338   : > { %v2538_v19 = vsel %vm730_vm1, %v2536_v54, %v2537_v5  ;;  %v2645_v55 = vsel %vm907_vm2, %v2643_v18, %v2644_v38  ;;  %v2647_v60 = vsel %vm907_vm2, %v2644_v38, %v2646_v33  ;;  %3465 = vmatprep.mubr.bf16.mxu1 %v7991_v28  ;;  %v1921_v4 = vadd.f32 %v7998_v62, %v4787_v32  ;;  %v8918_v33 = vld [vmem:[#allocation24_spill] sm:$0xff] }
 0x339   : > { %v2427_v6 = vsel %vm563_vm0, 0.0, %v2357_v50  ;;  %v2281_v61 = vmax.f32 %v2235_v22, 0.0  ;;  %v2079_v23 = vadd.f32 %v4896_v8, %v1918_v35  ;;  %v2540_v15 = vsel %vm730_vm1, %v2537_v5, %v2539_v48  ;;  %v4898_v53 = vpop.f32.mrf.mxu1  ;;  %v8919_v35 = vld [vmem:[#allocation25_spill] sm:$0xff]  ;;  %v8920_v22 = vld [vmem:[#allocation26_spill] sm:$0xff]  ;;  %v2242_v5 = vpop.f32.mrf.mxu0 }
 0x33a   : > { %v8026_v56 = vpack.c.bf16 %v2540_v15, %v2538_v19  ;;  %v8028_v59 = vpack.c.bf16 %v2647_v60, %v2645_v55  ;;  %v4899_v58 = vadd.f32 %v4898_v53, %v4897_v16  ;;  %3619 = vmatmul.mubr.bf16.gmra.mxu0 %v7965_v25  ;;  %v1926_v38 = vadd.f32 %v7998_v62, %v8918_v33 }
 0x33b   : > { %v2358_v54 = vrot.slane %v2281_v61, 7  ;;  %v2240_v18 = vadd.f32 %v2239_v24, %v2079_v23  ;;  %v4793_v8 = vadd.f32 %v8920_v22, %v8919_v35  ;;  %v2648_v28 = vrot.slane %v2427_v6, 2  ;;  %v4900_v48 = vpop.f32.mrf.mxu1  ;;  %4598 = vmatprep.mubr.msk.bf16.mxu0 %vm7559_vm6, %v8012_v37 }
 0x33c   : > { %v2541_v19 = vrot.slane %v2427_v6, 1  ;;  %v2082_v24 = vadd.f32 %v4899_v58, %v1921_v4 }
 0x33d   : > { %v2443_v32 = vsel %vm563_vm0, %v2358_v54, 0.0  ;;  %v2282_v16 = vmax.f32 %v2240_v18, 0.0  ;;  %v2359_v55 = vsel %vm563_vm0, %v2357_v50, %v2358_v54  ;;  %v4901_v61 = vpop.f32.mrf.mxu1 }
 0x33e   : > { %v2651_v60 = vrot.slane %v2443_v32, 2  ;;  %v2649_v23 = vrot.slane %v2359_v55, 2  ;;  %v8041_v15 = vpack.c.bf16 %v2359_v55, %v2357_v50  ;;  %v2542_v53 = vrot.slane %v2359_v55, 1 }
 0x33f   : > { %v2360_v33 = vrot.slane %v2282_v16, 7  ;;  %v4902_v35 = vadd.f32 %v4901_v61, %v4900_v48  ;;  %v2243_v22 = vadd.f32 %v2242_v5, %v2082_v24  ;;  %v2544_v47 = vrot.slane %v2443_v32, 1  ;;  %v4903_v25 = vpop.f32.mrf.mxu1  ;;  %4534 = vmatmul.mubr.msk.bf16.gmra.mxu1 %vm7559_vm6, %v7978_v13 }
 0x340   : > { %v2543_v6 = vsel %vm730_vm1, %v2541_v19, %v2542_v53  ;;  %v2650_v4 = vsel %vm907_vm2, %v2648_v28, %v2649_v23  ;;  %v2652_v54 = vsel %vm907_vm2, %v2649_v23, %v2651_v60  ;;  %3473 = vmatprep.mubr.bf16.mxu1 %v8026_v56  ;;  %v1929_v24 = vadd.f32 %v7998_v62, %v4793_v8 }
 0x341   : > { %v2428_v58 = vsel %vm563_vm0, 0.0, %v2360_v33  ;;  %v2087_v50 = vadd.f32 %v4902_v35, %v1926_v38  ;;  %v2283_v18 = vmax.f32 %v2243_v22, 0.0  ;;  %v2545_v48 = vsel %vm730_vm1, %v2542_v53, %v2544_v47  ;;  %v4904_v5 = vpop.f32.mrf.mxu1 }
 0x342   : > { %v8052_v32 = vpack.c.bf16 %v2545_v48, %v2543_v6  ;;  %v8054_v16 = vpack.c.bf16 %v2652_v54, %v2650_v4  ;;  %v4905_v55 = vadd.f32 %v4904_v5, %v4903_v25  ;;  %3627 = vmatmul.mubr.bf16.gmra.mxu0 %v7993_v20  ;;  %v2546_v60 = vrot.slane %v2428_v58, 1 }
 0x343   : > { %v2248_v19 = vadd.f32 %v7983_v45, %v2087_v50  ;;  %v2361_v28 = vrot.slane %v2283_v18, 7  ;;  %v2653_v38 = vrot.slane %v2428_v58, 2  ;;  %4602 = vmatprep.mubr.msk.bf16.mxu0 %vm7559_vm6, %v8041_v15  ;;  %v4942_v47 = vpop.f32.mrf.mxu1 }
 0x344   : > { %v2090_v35 = vadd.f32 %v4905_v55, %v1929_v24 }
 0x345   : > { %v2284_v61 = vmax.f32 %v2248_v19, 0.0  ;;  %v2362_v23 = vsel %vm563_vm0, %v2360_v33, %v2361_v28  ;;  %v2444_v53 = vsel %vm563_vm0, %v2361_v28, 0.0  ;;  %v4943_v25 = vpop.f32.mrf.mxu1 }
 0x346   : > { %v2549_v62 = vrot.slane %v2444_v53, 1  ;;  %v2654_v8 = vrot.slane %v2362_v23, 2  ;;  %v2656_v45 = vrot.slane %v2444_v53, 2  ;;  %v8064_v22 = vpack.c.bf16 %v2362_v23, %v2360_v33 }
 0x347   : > { %v2363_v6 = vrot.slane %v2284_v61, 7  ;;  %v2251_v4 = vadd.f32 %v8018_v31, %v2090_v35  ;;  %v2547_v54 = vrot.slane %v2362_v23, 1  ;;  %v8067_v58 = vadd.f32 %v4943_v25, %v4942_v47  ;;  %4538 = vmatmul.mubr.msk.bf16.gmra.mxu1 %vm7559_vm6, %v8012_v37 }
 0x348   : > { %v2655_v50 = vsel %vm907_vm2, %v2653_v38, %v2654_v8  ;;  %v2657_v18 = vsel %vm907_vm2, %v2654_v8, %v2656_v45  ;;  %3481 = vmatprep.mubr.bf16.mxu1 %v8052_v32 }
 0x349   : > { %v2285_v48 = vmax.f32 %v2251_v4, 0.0  ;;  %v2548_v33 = vsel %vm730_vm1, %v2546_v60, %v2547_v54  ;;  %v2550_v5 = vsel %vm730_vm1, %v2547_v54, %v2549_v62  ;;  %v2429_v31 = vsel %vm563_vm0, 0.0, %v2363_v6 }
 0x34a   : > { %v8078_v24 = vpack.c.bf16 %v2550_v5, %v2548_v33  ;;  %v8080_v19 = vpack.c.bf16 %v2657_v18, %v2655_v50  ;;  %3635 = vmatmul.mubr.bf16.gmra.mxu0 %v8028_v59  ;;  %v2690_v60 = vrot.slane %v2429_v31, 1  ;;  %v2697_v47 = vrot.slane %v2429_v31, 2  ;;  %v5988_v50 = vld [vmem:[#allocation7 + $0x230] sm:$0xff]   ;;  %v5996_v18 = vld [vmem:[#allocation7 + $0x238] sm:$0xff]  }
 0x34b   : > { %v2364_v28 = vrot.slane %v2285_v48, 7  ;;  %4606 = vmatprep.mubr.msk.bf16.mxu0 %vm7559_vm6, %v8064_v22  ;;  %v5989_v48 = vld [vmem:[#allocation7 + $0x228] sm:$0xff]  }
 0x34d   : > { %v2445_v55 = vsel %vm563_vm0, %v2364_v28, 0.0  ;;  %v2365_v38 = vsel %vm563_vm0, %v2363_v6, %v2364_v28 }
 0x34e   : > { %v8088_v61 = vpack.c.bf16 %v2365_v38, %v2363_v6  ;;  %v2691_v23 = vrot.slane %v2365_v38, 1  ;;  %v2693_v53 = vrot.slane %v2445_v55, 1  ;;  %v2698_v35 = vrot.slane %v2365_v38, 2  ;;  %v8923_v38 = vld [vmem:[#allocation27_spill] sm:$0xff] }
 0x34f   : > { %v2700_v62 = vrot.slane %v2445_v55, 2  ;;  %4542 = vmatmul.mubr.msk.bf16.gmra.mxu1 %vm7559_vm6, %v8041_v15 }
 0x350   : > { %v2692_v8 = vsel %vm730_vm1, %v2690_v60, %v2691_v23  ;;  %v2694_v45 = vsel %vm730_vm1, %v2691_v23, %v2693_v53  ;;  %v2699_v25 = vsel %vm907_vm2, %v2697_v47, %v2698_v35  ;;  %3489 = vmatprep.mubr.bf16.mxu1 %v8078_v24  ;;  %v8924_v47 = vld [vmem:[#allocation31_spill] sm:$0xff] }
 0x351   : > { %v8097_v4 = vpack.c.bf16 %v2694_v45, %v2692_v8  ;;  %v2701_v6 = vsel %vm907_vm2, %v2698_v35, %v2700_v62 }
 0x352   : > { %v8100_v54 = vpack.c.bf16 %v2701_v6, %v2699_v25  ;;  %3643 = vmatmul.mubr.bf16.gmra.mxu0 %v8054_v16 }
 0x353   : > { %4610 = vmatprep.mubr.msk.bf16.mxu0 %vm7559_vm6, %v8088_v61 }
 0x357   : > { %4546 = vmatmul.mubr.msk.bf16.gmra.mxu1 %vm7559_vm6, %v8064_v22 }
 0x358   : > { %3691 = vmatprep.mubr.bf16.mxu1 %v7710_v17  ;;  %v5990_v17 = vld [vmem:[#allocation7 + $0x220] sm:$0xff]  }
 0x35a   : > { %3651 = vmatmul.mubr.bf16.gmra.mxu0 %v8080_v19 }
 0x35b   : > { %3852 = vmatprep.mubr.bf16.mxu0 %v7700_v36 }
 0x35f   : > { %3692 = vmatmul.mubr.bf16.vlgmr.msra.gmra.mxu1 %v7698_v10  ;;  %v5991_v10 = vld [vmem:[#allocation7 + $0x218] sm:$0xff]  }
 0x360   : > { %5439 = vmatpush3.bf16.msra.mxu1 %v5996_v18  ;;  %3699 = vmatprep.mubr.bf16.mxu1 %v7728_v40 }
 0x361   : > { %5440 = vmatprep.subr.bf16.mxu1 %v5988_v50 }
 0x362   : > { %4614 = vmatmul.mubr.msk.bf16.vlgmr.msra.gmra.mxu0 %vm7559_vm6, %v7678_v30  ;;  %v5992_v30 = vld [vmem:[#allocation7 + $0x210] sm:$0xff]  }
 0x363   : > { %3860 = vmatprep.mubr.bf16.mxu0 %v7737_v12 }
 0x364   : > { %5441 = vmatpush3.bf16.msra.mxu1 %v5988_v50 }
 0x365   : > { %5442 = vmatprep.subr.bf16.mxu1 %v5989_v48 }
 0x367   : > { %3700 = vmatmul.mubr.bf16.gmra.mxu1 %v7700_v36  ;;  %v5993_v36 = vld [vmem:[#allocation7 + $0x208] sm:$0xff]  }
 0x368   : > { %3707 = vmatprep.mubr.bf16.mxu1 %v7757_v7  ;;  %5443 = vmatpush3.bf16.msra.mxu1 %v5989_v48 }
 0x369   : > { %5444 = vmatprep.subr.bf16.mxu1 %v5990_v17 }
 0x36a   : > { %4618 = vmatmul.mubr.msk.bf16.gmra.mxu0 %vm7559_vm6, %v7725_v57  ;;  %v5994_v57 = vld [vmem:[#allocation7 + $0x200] sm:$0xff]  }
 0x36b   : > { %3868 = vmatprep.mubr.bf16.mxu0 %v7755_v52 }
 0x36c   : > { %5445 = vmatpush3.bf16.msra.mxu1 %v5990_v17 }
 0x36d   : > { %5446 = vmatprep.subr.bf16.mxu1 %v5991_v10 }
 0x36f   : > { %3708 = vmatmul.mubr.bf16.gmra.mxu1 %v7737_v12  ;;  %v4945_v12 = vpop.f32.mrf.mxu1 }
 0x370   : > { %3715 = vmatprep.mubr.bf16.mxu1 %v7771_v21  ;;  %5447 = vmatpush3.bf16.msra.mxu1 %v5991_v10 }
 0x371   : > { %5448 = vmatprep.subr.bf16.mxu1 %v5992_v30 }
 0x372   : > { %4622 = vmatmul.mubr.msk.bf16.gmra.mxu0 %vm7559_vm6, %v7740_v9  ;;  %v8165_v9 = vld [vmem:[%s8715_s4] ss:$0 sm:$0xff] }
 0x373   : > { %3876 = vmatprep.mubr.bf16.mxu0 %v7791_v44 }
 0x374   : > { %5449 = vmatpush3.bf16.msra.mxu1 %v5992_v30 }
 0x375   : > { %5450 = vmatprep.subr.bf16.mxu1 %v5993_v36 }
 0x377   : > { %3716 = vmatmul.mubr.bf16.gmra.mxu1 %v7755_v52  ;;  %v4946_v52 = vpop.f32.mrf.mxu1 }
 0x378   : > { %3723 = vmatprep.mubr.bf16.mxu1 %v7795_v49  ;;  %5451 = vmatpush3.bf16.msra.mxu1 %v5993_v36 }
 0x379   : > { %5452 = vmatprep.subr.bf16.mxu1 %v5994_v57 }
 0x37a   : > { %4626 = vmatmul.mubr.msk.bf16.gmra.mxu0 %vm7559_vm6, %v7775_v43 }
 0x37b   : > { %3884 = vmatprep.mubr.bf16.mxu0 %v7822_v29 }
 0x37c   : > { %5453 = vmatpush3.bf16.msra.mxu1 %v5994_v57 }
 0x37f   : > { %3724 = vmatmul.mubr.bf16.gmra.mxu1 %v7791_v44  ;;  %v8921_v44 = vld [vmem:[#allocation28_spill] sm:$0xff] }
 0x380   : > { %3731 = vmatprep.mubr.bf16.mxu1 %v7838_v51 }
 0x382   : > { %4630 = vmatmul.mubr.msk.bf16.gmra.mxu0 %vm7559_vm6, %v7808_v41 }
 0x383   : > { %3892 = vmatprep.mubr.bf16.mxu0 %v7847_v14 }
 0x387   : > { %3732 = vmatmul.mubr.bf16.gmra.mxu1 %v7822_v29  ;;  %v3372_v29 = vadd.f32 %v8067_v58, %v8165_v9 }
 0x388   : > { %3739 = vmatprep.mubr.bf16.mxu1 %v7849_v63 }
 0x38a   : > { %4634 = vmatmul.mubr.msk.bf16.gmra.mxu0 %vm7559_vm6, %v7831_v42  ;;  %v4947_v42 = vadd.f32 %v4946_v52, %v4945_v12 }
 0x38b   : > { %3900 = vmatprep.mubr.bf16.mxu0 %v7875_v1 }
 0x38c   : > { %v3375_v5 = vadd.f32 %v4947_v42, %v8165_v9 }
 0x38f   : > { %3740 = vmatmul.mubr.bf16.gmra.mxu1 %v7847_v14 }
 0x390   : > { %3747 = vmatprep.mubr.bf16.mxu1 %v7877_v11 }
 0x392   : > { %4638 = vmatmul.mubr.msk.bf16.gmra.mxu0 %vm7559_vm6, %v7862_v2 }
 0x393   : > { %3908 = vmatprep.mubr.bf16.mxu0 %v7905_v39 }
 0x397   : > { %3748 = vmatmul.mubr.bf16.gmra.mxu1 %v7875_v1 }
 0x398   : > { %3755 = vmatprep.mubr.bf16.mxu1 %v7907_v46 }
 0x39a   : > { %4642 = vmatmul.mubr.msk.bf16.gmra.mxu0 %vm7559_vm6, %v7891_v3 }
 0x39b   : > { %3916 = vmatprep.mubr.bf16.mxu0 %v7933_v34 }
 0x39f   : > { %3756 = vmatmul.mubr.bf16.gmra.mxu1 %v7905_v39  ;;  %v8922_v39 = vld [vmem:[#allocation30_spill] sm:$0xff] }
 0x3a0   : > { %3763 = vmatprep.mubr.bf16.mxu1 %v7935_v0 }
 0x3a2   : > { %v5054_v43 = vpop.f32.mrf.mxu0  ;;  %4646 = vmatmul.mubr.msk.bf16.gmra.mxu0 %vm7559_vm6, %v7920_v26 }
 0x3a3   : > { %3924 = vmatprep.mubr.bf16.mxu0 %v8921_v44 }
 0x3a4   : > { %v5055_v41 = vpop.f32.mrf.mxu0 }
 0x3a5   : > { %v5056_v14 = vadd.f32 %v5055_v41, %v5054_v43 }
 0x3a6   : > { %v5057_v2 = vpop.f32.mrf.mxu0 }
 0x3a7   : > { %v8173_v1 = vadd.f32 %v5056_v14, %v3372_v29  ;;  %v4948_v3 = vpop.f32.mrf.mxu1  ;;  %3764 = vmatmul.mubr.bf16.gmra.mxu1 %v7933_v34 }
 0x3a8   : > { %3771 = vmatprep.mubr.bf16.mxu1 %v8922_v39  ;;  %v5058_v33 = vpop.f32.mrf.mxu0 }
 0x3a9   : > { %v4949_v26 = vpop.f32.mrf.mxu1  ;;  %v5059_v31 = vadd.f32 %v5058_v33, %v5057_v2 }
 0x3aa   : > { %v4950_v28 = vadd.f32 %v4949_v26, %v4948_v3  ;;  %v5060_v55 = vpop.f32.mrf.mxu0  ;;  %4650 = vmatmul.mubr.msk.bf16.gmra.mxu0 %vm7559_vm6, %v8923_v38 }
 0x3ab   : > { %v8181_v58 = vadd.f32 %v5059_v31, %v3375_v5  ;;  %v4951_v60 = vpop.f32.mrf.mxu1  ;;  %3932 = vmatprep.mubr.bf16.mxu0 %v8924_v47 }
 0x3ac   : > { %v5061_v23 = vpop.f32.mrf.mxu0  ;;  %v3380_v34 = vadd.f32 %v4950_v28, %v8165_v9 }
 0x3ad   : > { %v4952_v53 = vpop.f32.mrf.mxu1  ;;  %v5062_v35 = vadd.f32 %v5061_v23, %v5060_v55 }
 0x3ae   : > { %v4953_v62 = vadd.f32 %v4952_v53, %v4951_v60  ;;  %v5063_v8 = vpop.f32.mrf.mxu0 }
 0x3af   : > { %v8185_v45 = vadd.f32 %v5062_v35, %v3380_v34  ;;  %v4954_v25 = vpop.f32.mrf.mxu1  ;;  %3772 = vmatmul.mubr.bf16.gmra.mxu1 %v8921_v44 }
 0x3b0   : > { %3779 = vmatprep.mubr.bf16.mxu1 %v7993_v20  ;;  %v5064_v6 = vpop.f32.mrf.mxu0  ;;  %v3383_v50 = vadd.f32 %v4953_v62, %v8165_v9 }
 0x3b1   : > { %v4955_v18 = vpop.f32.mrf.mxu1  ;;  %v5065_v48 = vadd.f32 %v5064_v6, %v5063_v8 }
 0x3b2   : > { %v4956_v17 = vadd.f32 %v4955_v18, %v4954_v25  ;;  %v5066_v10 = vpop.f32.mrf.mxu0  ;;  %4654 = vmatmul.mubr.msk.bf16.gmra.mxu0 %vm7559_vm6, %v7978_v13 }
 0x3b3   : > { %v8193_v30 = vadd.f32 %v5065_v48, %v3383_v50  ;;  %v4957_v36 = vpop.f32.mrf.mxu1  ;;  %3940 = vmatprep.mubr.bf16.mxu0 %v8026_v56 }
 0x3b4   : > { %v5067_v57 = vpop.f32.mrf.mxu0  ;;  %v3388_v12 = vadd.f32 %v4956_v17, %v8165_v9 }
 0x3b5   : > { %v4958_v52 = vpop.f32.mrf.mxu1  ;;  %v5068_v43 = vadd.f32 %v5067_v57, %v5066_v10 }
 0x3b6   : > { %v4959_v44 = vadd.f32 %v4958_v52, %v4957_v36  ;;  %v5069_v41 = vpop.f32.mrf.mxu0 }
 0x3b7   : > { %v8197_v29 = vadd.f32 %v5068_v43, %v3388_v12  ;;  %v4960_v42 = vpop.f32.mrf.mxu1  ;;  %3780 = vmatmul.mubr.bf16.gmra.mxu1 %v8924_v47 }
 0x3b8   : > { %3787 = vmatprep.mubr.bf16.mxu1 %v8028_v59  ;;  %v5070_v13 = vpop.f32.mrf.mxu0  ;;  %v3391_v14 = vadd.f32 %v4959_v44, %v8165_v9 }
 0x3b9   : > { %v4961_v2 = vpop.f32.mrf.mxu1  ;;  %v5071_v3 = vadd.f32 %v5070_v13, %v5069_v41 }
 0x3ba   : > { %v4962_v33 = vadd.f32 %v4961_v2, %v4960_v42  ;;  %v5072_v5 = vpop.f32.mrf.mxu0  ;;  %4658 = vmatmul.mubr.msk.bf16.gmra.mxu0 %vm7559_vm6, %v8012_v37 }
 0x3bb   : > { %v8205_v26 = vadd.f32 %v5071_v3, %v3391_v14  ;;  %v4963_v31 = vpop.f32.mrf.mxu1  ;;  %3948 = vmatprep.mubr.bf16.mxu0 %v8052_v32 }
 0x3bc   : > { %v5073_v28 = vpop.f32.mrf.mxu0  ;;  %v3396_v55 = vadd.f32 %v4962_v33, %v8165_v9 }
 0x3bd   : > { %v4964_v38 = vpop.f32.mrf.mxu1  ;;  %v5074_v60 = vadd.f32 %v5073_v28, %v5072_v5 }
 0x3be   : > { %v4965_v47 = vadd.f32 %v4964_v38, %v4963_v31  ;;  %v5075_v23 = vpop.f32.mrf.mxu0 }
 0x3bf   : > { %v8209_v34 = vadd.f32 %v5074_v60, %v3396_v55  ;;  %v4966_v53 = vpop.f32.mrf.mxu1  ;;  %3788 = vmatmul.mubr.bf16.gmra.mxu1 %v8026_v56 }
 0x3c0   : > { %3795 = vmatprep.mubr.bf16.mxu1 %v8054_v16  ;;  %v5076_v37 = vpop.f32.mrf.mxu0  ;;  %v3399_v35 = vadd.f32 %v4965_v47, %v8165_v9 }
 0x3c1   : > { %v4967_v62 = vpop.f32.mrf.mxu1  ;;  %v5077_v8 = vadd.f32 %v5076_v37, %v5075_v23 }
 0x3c2   : > { %v4968_v25 = vadd.f32 %v4967_v62, %v4966_v53  ;;  %v5078_v6 = vpop.f32.mrf.mxu0  ;;  %4662 = vmatmul.mubr.msk.bf16.gmra.mxu0 %vm7559_vm6, %v8041_v15 }
 0x3c3   : > { %v8217_v50 = vadd.f32 %v5077_v8, %v3399_v35  ;;  %v4969_v18 = vpop.f32.mrf.mxu1  ;;  %3956 = vmatprep.mubr.bf16.mxu0 %v8078_v24  ;;  %v8925_v8 = vld [vmem:[#allocation15_spill] sm:$0xff] }
 0x3c4   : > { %v5079_v48 = vpop.f32.mrf.mxu0  ;;  %v3404_v56 = vadd.f32 %v4968_v25, %v8165_v9 }
 0x3c5   : > { %v4970_v17 = vpop.f32.mrf.mxu1  ;;  %v5080_v10 = vadd.f32 %v5079_v48, %v5078_v6 }
 0x3c6   : > { %v4971_v36 = vadd.f32 %v4970_v17, %v4969_v18  ;;  %v5081_v57 = vpop.f32.mrf.mxu0 }
 0x3c7   : > { %v8221_v12 = vadd.f32 %v5080_v10, %v3404_v56  ;;  %v4972_v52 = vpop.f32.mrf.mxu1  ;;  %3796 = vmatmul.mubr.bf16.gmra.mxu1 %v8052_v32 }
 0x3c8   : > { %3803 = vmatprep.mubr.bf16.mxu1 %v8080_v19  ;;  %v5082_v15 = vpop.f32.mrf.mxu0  ;;  %v3407_v43 = vadd.f32 %v4971_v36, %v8165_v9 }
 0x3c9   : > { %v4973_v44 = vpop.f32.mrf.mxu1  ;;  %v5083_v41 = vadd.f32 %v5082_v15, %v5081_v57 }
 0x3ca   : > { %v4974_v42 = vadd.f32 %v4973_v44, %v4972_v52  ;;  %v5084_v13 = vpop.f32.mrf.mxu0  ;;  %4666 = vmatmul.mubr.msk.bf16.gmra.mxu0 %vm7559_vm6, %v8064_v22  ;;  %v8926_v44 = vld [vmem:[#allocation16_spill] sm:$0xff] }
 0x3cb   : > { %v8229_v14 = vadd.f32 %v5083_v41, %v3407_v43  ;;  %v4975_v2 = vpop.f32.mrf.mxu1  ;;  %3964 = vmatprep.mubr.bf16.mxu0 %v8097_v4 }
 0x3cc   : > { %v5085_v3 = vpop.f32.mrf.mxu0  ;;  %v3412_v32 = vadd.f32 %v4974_v42, %v8165_v9 }
 0x3cd   : > { %v4976_v33 = vpop.f32.mrf.mxu1  ;;  %v5086_v5 = vadd.f32 %v5085_v3, %v5084_v13 }
 0x3ce   : > { %v4977_v31 = vadd.f32 %v4976_v33, %v4975_v2  ;;  %v5087_v28 = vpop.f32.mrf.mxu0 }
 0x3cf   : > { %v8233_v55 = vadd.f32 %v5086_v5, %v3412_v32  ;;  %v4978_v38 = vpop.f32.mrf.mxu1  ;;  %3804 = vmatmul.mubr.bf16.gmra.mxu1 %v8078_v24 }
 0x3d0   : > { %3811 = vmatprep.mubr.bf16.mxu1 %v8100_v54  ;;  %v5088_v22 = vpop.f32.mrf.mxu0  ;;  %v3415_v60 = vadd.f32 %v4977_v31, %v8165_v9 }
 0x3d1   : > { %v4979_v47 = vpop.f32.mrf.mxu1  ;;  %v5089_v23 = vadd.f32 %v5088_v22, %v5087_v28 }
 0x3d2   : > { %v4980_v53 = vadd.f32 %v4979_v47, %v4978_v38  ;;  %v5090_v37 = vpop.f32.mrf.mxu0  ;;  %4670 = vmatmul.mubr.msk.bf16.gmra.mxu0 %vm7559_vm6, %v8088_v61 }
 0x3d3   : > { %v8241_v35 = vadd.f32 %v5089_v23, %v3415_v60  ;;  %v4981_v62 = vpop.f32.mrf.mxu1  ;;  %3972 = vmatprep.mubr.bf16.mxu0 %v8925_v8 }
 0x3d4   : > { %v5091_v25 = vpop.f32.mrf.mxu0  ;;  %v3420_v24 = vadd.f32 %v4980_v53, %v8165_v9 }
 0x3d5   : > { %v4982_v6 = vpop.f32.mrf.mxu1  ;;  %v5092_v18 = vadd.f32 %v5091_v25, %v5090_v37 }
 0x3d6   : > { %v4983_v48 = vadd.f32 %v4982_v6, %v4981_v62  ;;  %v5093_v56 = vpop.f32.mrf.mxu0 }
 0x3d7   : > { %v8245_v17 = vadd.f32 %v5092_v18, %v3420_v24  ;;  %v4984_v10 = vpop.f32.mrf.mxu1  ;;  %3812 = vmatmul.mubr.bf16.gmra.mxu1 %v8097_v4 }
 0x3d8   : > { %5454 = vmatprep.mubr.bf16.mxu1 %v7728_v40  ;;  %v5094_v61 = vpop.f32.mrf.mxu0  ;;  %v3423_v36 = vadd.f32 %v4983_v48, %v8165_v9 }
 0x3d9   : > { %v4985_v57 = vpop.f32.mrf.mxu1  ;;  %v5095_v52 = vadd.f32 %v5094_v61, %v5093_v56 }
 0x3da   : > { %v4986_v15 = vadd.f32 %v4985_v57, %v4984_v10  ;;  %v5096_v43 = vpop.f32.mrf.mxu0  ;;  %4674 = vmatmul.mubr.msk.bf16.gmra.mxu0 %vm7559_vm6, %v8926_v44 }
 0x3db   : > { %v8253_v41 = vadd.f32 %v5095_v52, %v3423_v36  ;;  %v4987_v42 = vpop.f32.mrf.mxu1 }
 0x3dc   : > { %v5097_v13 = vpop.f32.mrf.mxu0  ;;  %v3428_v2 = vadd.f32 %v4986_v15, %v8165_v9 }
 0x3dd   : > { %v4988_v4 = vpop.f32.mrf.mxu1  ;;  %v5098_v3 = vadd.f32 %v5097_v13, %v5096_v43 }
 0x3de   : > { %v4989_v40 = vadd.f32 %v4988_v4, %v4987_v42  ;;  %v5099_v32 = vpop.f32.mrf.mxu0 }
 0x3df   : > { %v8256_v33 = vadd.f32 %v5098_v3, %v3428_v2  ;;  %v4990_v5 = vpop.f32.mrf.mxu1  ;;  %5455 = vmatmul.mubr.bf16.vlgmr.msra.gmra.mxu1 %v7757_v7 }
 0x3e0   : > { %5458 = vmatprep.mubr.bf16.mxu1 %v7771_v21  ;;  %v5100_v31 = vpop.f32.mrf.mxu0  ;;  %v3431_v27 = vadd.f32 %v4989_v40, %v8165_v9 }
 0x3e1   : > { %v4991_v28 = vpop.f32.mrf.mxu1  ;;  %v5101_v38 = vadd.f32 %v5100_v31, %v5099_v32 }
 0x3e2   : > { %v4992_v22 = vadd.f32 %v4991_v28, %v4990_v5  ;;  %v5102_v60 = vpop.f32.mrf.mxu0 }
 0x3e3   : > { %v8261_v47 = vadd.f32 %v5101_v38, %v3431_v27  ;;  %v4993_v23 = vpop.f32.mrf.mxu1 }
 0x3e4   : > { %v5103_v53 = vpop.f32.mrf.mxu0  ;;  %v3436_v37 = vadd.f32 %v4992_v22, %v8165_v9 }
 0x3e5   : > { %v4994_v62 = vpop.f32.mrf.mxu1  ;;  %v5104_v8 = vadd.f32 %v5103_v53, %v5102_v60 }
 0x3e6   : > { %v4995_v25 = vadd.f32 %v4994_v62, %v4993_v23  ;;  %v5105_v24 = vpop.f32.mrf.mxu0 }
 0x3e7   : > { %v8264_v7 = vadd.f32 %v5104_v8, %v3436_v37  ;;  %v4996_v21 = vpop.f32.mrf.mxu1  ;;  %5459 = vmatmul.mubr.bf16.gmra.mxu1 %v7795_v49 }
 0x3e8   : > { %5462 = vmatprep.mubr.bf16.mxu1 %v7838_v51  ;;  %v5106_v6 = vpop.f32.mrf.mxu0  ;;  %v3439_v18 = vadd.f32 %v4995_v25, %v8165_v9 }
 0x3e9   : > { %v4997_v48 = vpop.f32.mrf.mxu1  ;;  %v5107_v56 = vadd.f32 %v5106_v6, %v5105_v24 }
 0x3ea   : > { %v4998_v10 = vadd.f32 %v4997_v48, %v4996_v21  ;;  %v5108_v61 = vpop.f32.mrf.mxu0 }
 0x3eb   : > { %v8269_v36 = vadd.f32 %v5107_v56, %v3439_v18  ;;  %v4999_v57 = vpop.f32.mrf.mxu1 }
 0x3ec   : > { %v5109_v52 = vpop.f32.mrf.mxu0  ;;  %v3444_v15 = vadd.f32 %v4998_v10, %v8165_v9 }
 0x3ed   : > { %v5000_v43 = vpop.f32.mrf.mxu1  ;;  %v5110_v44 = vadd.f32 %v5109_v52, %v5108_v61 }
 0x3ee   : > { %v5001_v42 = vadd.f32 %v5000_v43, %v4999_v57  ;;  %v5111_v13 = vpop.f32.mrf.mxu0 }
 0x3ef   : > { %v8272_v49 = vadd.f32 %v5110_v44, %v3444_v15  ;;  %v5002_v51 = vpop.f32.mrf.mxu1  ;;  %5463 = vmatmul.mubr.bf16.gmra.mxu1 %v7849_v63 }
 0x3f0   : > { %5466 = vmatprep.mubr.bf16.mxu1 %v7877_v11  ;;  %v5112_v2 = vpop.f32.mrf.mxu0  ;;  %v3447_v4 = vadd.f32 %v5001_v42, %v8165_v9 }
 0x3f1   : > { %v5003_v3 = vpop.f32.mrf.mxu1  ;;  %v5113_v40 = vadd.f32 %v5112_v2, %v5111_v13 }
 0x3f2   : > { %v5004_v32 = vadd.f32 %v5003_v3, %v5002_v51  ;;  %v5114_v5 = vpop.f32.mrf.mxu0 }
 0x3f3   : > { %v8277_v31 = vadd.f32 %v5113_v40, %v3447_v4  ;;  %v5005_v27 = vpop.f32.mrf.mxu1 }
 0x3f4   : > { %v5115_v28 = vpop.f32.mrf.mxu0  ;;  %v3452_v38 = vadd.f32 %v5004_v32, %v8165_v9 }
 0x3f5   : > { %v5006_v22 = vpop.f32.mrf.mxu1  ;;  %v5116_v60 = vadd.f32 %v5115_v28, %v5114_v5 }
 0x3f6   : > { %v5007_v23 = vadd.f32 %v5006_v22, %v5005_v27  ;;  %v5117_v53 = vpop.f32.mrf.mxu0 }
 0x3f7   : > { %v8280_v63 = vadd.f32 %v5116_v60, %v3452_v38  ;;  %v5008_v11 = vpop.f32.mrf.mxu1  ;;  %5467 = vmatmul.mubr.bf16.gmra.mxu1 %v7907_v46 }
 0x3f8   : > { %5470 = vmatprep.mubr.bf16.mxu1 %v7935_v0  ;;  %v5118_v37 = vpop.f32.mrf.mxu0  ;;  %v3455_v62 = vadd.f32 %v5007_v23, %v8165_v9 }
 0x3f9   : > { %v5009_v8 = vpop.f32.mrf.mxu1  ;;  %v5119_v25 = vadd.f32 %v5118_v37, %v5117_v53 }
 0x3fa   : > { %v5010_v24 = vadd.f32 %v5009_v8, %v5008_v11  ;;  %v5120_v21 = vpop.f32.mrf.mxu0 }
 0x3fb   : > { %v8285_v6 = vadd.f32 %v5119_v25, %v3455_v62  ;;  %v5011_v18 = vpop.f32.mrf.mxu1 }
 0x3fc   : > { %v5121_v48 = vpop.f32.mrf.mxu0  ;;  %v3460_v56 = vadd.f32 %v5010_v24, %v8165_v9 }
 0x3fd   : > { %v5012_v10 = vpop.f32.mrf.mxu1  ;;  %v5122_v61 = vadd.f32 %v5121_v48, %v5120_v21 }
 0x3fe   : > { %v5013_v57 = vadd.f32 %v5012_v10, %v5011_v18  ;;  %v5123_v52 = vpop.f32.mrf.mxu0 }
 0x3ff   : > { %v8288_v46 = vadd.f32 %v5122_v61, %v3460_v56  ;;  %v5014_v0 = vpop.f32.mrf.mxu1  ;;  %5471 = vmatmul.mubr.bf16.gmra.mxu1 %v8922_v39 }
 0x400   : > { %5474 = vmatprep.mubr.bf16.mxu1 %v7993_v20  ;;  %v5124_v15 = vpop.f32.mrf.mxu0  ;;  %v3463_v43 = vadd.f32 %v5013_v57, %v8165_v9 }
 0x401   : > { %v5015_v44 = vpop.f32.mrf.mxu1  ;;  %v5125_v42 = vadd.f32 %v5124_v15, %v5123_v52 }
 0x402   : > { %v5016_v13 = vadd.f32 %v5015_v44, %v5014_v0  ;;  %v5126_v51 = vpop.f32.mrf.mxu0 }
 0x403   : > { %v8293_v2 = vadd.f32 %v5125_v42, %v3463_v43  ;;  %v5017_v4 = vpop.f32.mrf.mxu1 }
 0x404   : > { %v5127_v3 = vpop.f32.mrf.mxu0  ;;  %v3468_v40 = vadd.f32 %v5016_v13, %v8165_v9 }
 0x405   : > { %v5018_v32 = vpop.f32.mrf.mxu1  ;;  %v5128_v5 = vadd.f32 %v5127_v3, %v5126_v51 }
 0x406   : > { %v5019_v27 = vadd.f32 %v5018_v32, %v5017_v4  ;;  %v5129_v28 = vpop.f32.mrf.mxu0 }
 0x407   : > { %v8296_v39 = vadd.f32 %v5128_v5, %v3468_v40  ;;  %v5020_v20 = vpop.f32.mrf.mxu1  ;;  %5475 = vmatmul.mubr.bf16.gmra.mxu1 %v8028_v59  ;;  %v8927_v40 = vld [vmem:[#allocation40_spill] sm:$0xff] }
 0x408   : > { %5478 = vmatprep.mubr.bf16.mxu1 %v8054_v16  ;;  %v5130_v38 = vpop.f32.mrf.mxu0  ;;  %v3471_v22 = vadd.f32 %v5019_v27, %v8165_v9 }
 0x409   : > { %v5021_v60 = vpop.f32.mrf.mxu1  ;;  %v5131_v23 = vadd.f32 %v5130_v38, %v5129_v28 }
 0x40a   : > { %v5022_v53 = vadd.f32 %v5021_v60, %v5020_v20  ;;  %v5132_v11 = vpop.f32.mrf.mxu0 }
 0x40b   : > { %v8301_v37 = vadd.f32 %v5131_v23, %v3471_v22  ;;  %v5023_v62 = vpop.f32.mrf.mxu1 }
 0x40c   : > { %v5133_v8 = vpop.f32.mrf.mxu0  ;;  %v3476_v25 = vadd.f32 %v5022_v53, %v8165_v9 }
 0x40d   : > { %v5024_v24 = vpop.f32.mrf.mxu1  ;;  %v5134_v21 = vadd.f32 %v5133_v8, %v5132_v11 }
 0x40e   : > { %v5025_v18 = vadd.f32 %v5024_v24, %v5023_v62  ;;  %v5135_v48 = vpop.f32.mrf.mxu0 }
 0x40f   : > { %v8304_v59 = vadd.f32 %v5134_v21, %v3476_v25  ;;  %v5026_v16 = vpop.f32.mrf.mxu1  ;;  %5479 = vmatmul.mubr.bf16.gmra.mxu1 %v8080_v19 }
 0x410   : > { %5482 = vmatprep.mubr.bf16.mxu1 %v8100_v54  ;;  %v5136_v56 = vpop.f32.mrf.mxu0  ;;  %v3479_v10 = vadd.f32 %v5025_v18, %v8165_v9 }
 0x411   : > { %v5027_v61 = vpop.f32.mrf.mxu1  ;;  %v5137_v57 = vadd.f32 %v5136_v56, %v5135_v48 }
 0x412   : > { %v5028_v52 = vadd.f32 %v5027_v61, %v5026_v16  ;;  %v5138_v0 = vpop.f32.mrf.mxu0 }
 0x413   : > { %v8309_v15 = vadd.f32 %v5137_v57, %v3479_v10  ;;  %v5029_v43 = vpop.f32.mrf.mxu1 }
 0x414   : > { %v5139_v44 = vpop.f32.mrf.mxu0  ;;  %v3484_v42 = vadd.f32 %v5028_v52, %v8165_v9 }
 0x415   : > { %v5030_v13 = vpop.f32.mrf.mxu1  ;;  %v5140_v51 = vadd.f32 %v5139_v44, %v5138_v0 }
 0x416   : > { %v5031_v4 = vadd.f32 %v5030_v13, %v5029_v43  ;;  %v5141_v3 = vpop.f32.mrf.mxu0 }
 0x417   : > { %v8312_v19 = vadd.f32 %v5140_v51, %v3484_v42  ;;  %v5032_v54 = vpop.f32.mrf.mxu1  ;;  %5483 = vmatmul.mubr.bf16.gmra.mxu1 %v8927_v40 }
 0x418   : > { %v5142_v32 = vpop.f32.mrf.mxu0  ;;  %v3487_v5 = vadd.f32 %v5031_v4, %v8165_v9 }
 0x419   : > { %v5033_v27 = vpop.f32.mrf.mxu1  ;;  %v5143_v28 = vadd.f32 %v5142_v32, %v5141_v3 }
 0x41a   : > { %v5034_v20 = vadd.f32 %v5033_v27, %v5032_v54  ;;  %v5144_v38 = vpop.f32.mrf.mxu0 }
 0x41b   : > { %v8316_v22 = vadd.f32 %v5143_v28, %v3487_v5  ;;  %v5035_v60 = vpop.f32.mrf.mxu1 }
 0x41c   : > { %v5145_v23 = vpop.f32.mrf.mxu0  ;;  %v3492_v53 = vadd.f32 %v5034_v20, %v8165_v9 }
 0x41d   : > { %v5036_v11 = vpop.f32.mrf.mxu1  ;;  %v5146_v62 = vadd.f32 %v5145_v23, %v5144_v38 }
 0x41e   : > { %v5037_v8 = vadd.f32 %v5036_v11, %v5035_v60  ;;  %v5147_v25 = vpop.f32.mrf.mxu0 }
 0x41f   : > { %v8319_v24 = vadd.f32 %v5146_v62, %v3492_v53  ;;  %v5166_v21 = vpop.f32.mrf.mxu1 }
 0x420   : > { %v5148_v18 = vpop.f32.mrf.mxu0  ;;  %v3495_v48 = vadd.f32 %v5037_v8, %v8165_v9 }
 0x421   : > { %8928 = vst [vmem:[#allocation32_spill] sm:$0xff] %v8319_v24  ;;  %v5167_v16 = vpop.f32.mrf.mxu1  ;;  %v5149_v56 = vadd.f32 %v5148_v18, %v5147_v25 }
 0x422   : > { %v5168_v10 = vadd.f32 %v5167_v16, %v5166_v21  ;;  %v5278_v61 = vpop.f32.mrf.mxu0 }
 0x423   : > { %v8322_v57 = vadd.f32 %v5149_v56, %v3495_v48  ;;  %v5169_v52 = vpop.f32.mrf.mxu1 }
 0x424   : > { %v3694_v0 = vadd.f32 %v5168_v10, %v8173_v1  ;;  %v5279_v43 = vpop.f32.mrf.mxu0 }
 0x425   : > { %8929 = vst [vmem:[#allocation33_spill] sm:$0xff] %v8322_v57  ;;  %v5170_v44 = vpop.f32.mrf.mxu1  ;;  %v5280_v42 = vadd.f32 %v5279_v43, %v5278_v61 }
 0x426   : > { %v5171_v13 = vadd.f32 %v5170_v44, %v5169_v52  ;;  %v5281_v51 = vpop.f32.mrf.mxu0 }
 0x427   : > { %v5172_v4 = vpop.f32.mrf.mxu1  ;;  %v8325_v3 = vadd.f32 %v5280_v42, %v3694_v0 }
 0x428   : > { %v3697_v54 = vadd.f32 %v5171_v13, %v8181_v58  ;;  %v5282_v9 = vpop.f32.mrf.mxu0 }
 0x429   : > { %v5173_v40 = vpop.f32.mrf.mxu1  ;;  %v5283_v32 = vadd.f32 %v5282_v9, %v5281_v51 }
 0x42a   : > { %v5174_v5 = vadd.f32 %v5173_v40, %v5172_v4  ;;  %v8328_v27 = vpop.f32.mrf.mxu0 }
 0x42b   : > { %v5175_v28 = vpop.f32.mrf.mxu1  ;;  %v8330_v20 = vadd.f32 %v5283_v32, %v3697_v54 }
 0x42c   : > { %v8333_v1 = vadd.f32 %v5174_v5, %v8185_v45  ;;  %v8335_v38 = vpop.f32.mrf.mxu0 }
 0x42d   : > { %v5176_v60 = vpop.f32.mrf.mxu1 }
 0x42e   : > { %v5177_v23 = vadd.f32 %v5176_v60, %v5175_v28  ;;  %v8337_v53 = vpop.f32.mrf.mxu0 }
 0x42f   : > { %v5178_v11 = vpop.f32.mrf.mxu1 }
 0x430   : > { %v8340_v58 = vadd.f32 %v5177_v23, %v8193_v30  ;;  %v8342_v62 = vpop.f32.mrf.mxu0 }
 0x431   : > { %v5179_v8 = vpop.f32.mrf.mxu1 }
 0x432   : > { %v5180_v25 = vadd.f32 %v5179_v8, %v5178_v11  ;;  %v8344_v21 = vpop.f32.mrf.mxu0 }
 0x433   : > { %v5181_v18 = vpop.f32.mrf.mxu1 }
 0x434   : > { %v8347_v45 = vadd.f32 %v5180_v25, %v8197_v29  ;;  %v8349_v48 = vpop.f32.mrf.mxu0 }
 0x435   : > { %v5182_v16 = vpop.f32.mrf.mxu1 }
 0x436   : > { %v5183_v56 = vadd.f32 %v5182_v16, %v5181_v18  ;;  %v8351_v10 = vpop.f32.mrf.mxu0 }
 0x437   : > { %v5184_v61 = vpop.f32.mrf.mxu1 }
 0x438   : > { %v8354_v30 = vadd.f32 %v5183_v56, %v8205_v26  ;;  %v8356_v52 = vpop.f32.mrf.mxu0 }
 0x439   : > { %v5185_v0 = vpop.f32.mrf.mxu1 }
 0x43a   : > { %v5186_v43 = vadd.f32 %v5185_v0, %v5184_v61  ;;  %v8358_v44 = vpop.f32.mrf.mxu0 }
 0x43b   : > { %v5187_v42 = vpop.f32.mrf.mxu1 }
 0x43c   : > { %v8361_v29 = vadd.f32 %v5186_v43, %v8209_v34  ;;  %v8363_v13 = vpop.f32.mrf.mxu0 }
 0x43d   : > { %v5188_v51 = vpop.f32.mrf.mxu1 }
 0x43e   : > { %v5189_v4 = vadd.f32 %v5188_v51, %v5187_v42  ;;  %v8365_v54 = vpop.f32.mrf.mxu0 }
 0x43f   : > { %v5190_v9 = vpop.f32.mrf.mxu1 }
 0x440   : > { %v8368_v26 = vadd.f32 %v5189_v4, %v8217_v50  ;;  %v8370_v40 = vpop.f32.mrf.mxu0 }
 0x441   : > { %v5191_v32 = vpop.f32.mrf.mxu1 }
 0x442   : > { %v5192_v5 = vadd.f32 %v5191_v32, %v5190_v9  ;;  %v8372_v28 = vpop.f32.mrf.mxu0 }
 0x443   : > { %v5193_v60 = vpop.f32.mrf.mxu1 }
 0x444   : > { %v8375_v34 = vadd.f32 %v5192_v5, %v8221_v12  ;;  %v8377_v23 = vpop.f32.mrf.mxu0 }
 0x445   : > { %v5194_v11 = vpop.f32.mrf.mxu1 }
 0x446   : > { %v5195_v8 = vadd.f32 %v5194_v11, %v5193_v60  ;;  %v8379_v25 = vpop.f32.mrf.mxu0 }
 0x447   : > { %v5196_v18 = vpop.f32.mrf.mxu1 }
 0x448   : > { %v8382_v50 = vadd.f32 %v5195_v8, %v8229_v14  ;;  %v8384_v16 = vpop.f32.mrf.mxu0 }
 0x449   : > { %v5197_v56 = vpop.f32.mrf.mxu1 }
 0x44a   : > { %8930 = vst [vmem:[#allocation34_spill] sm:$0xff] %v8382_v50  ;;  %v5198_v61 = vadd.f32 %v5197_v56, %v5196_v18  ;;  %v8386_v0 = vpop.f32.mrf.mxu0 }
 0x44b   : > { %v5199_v43 = vpop.f32.mrf.mxu1 }
 0x44c   : > { %v8389_v12 = vadd.f32 %v5198_v61, %v8233_v55  ;;  %v8391_v42 = vpop.f32.mrf.mxu0 }
 0x44d   : > { %v5200_v51 = vpop.f32.mrf.mxu1 }
 0x44e   : > { %v5201_v4 = vadd.f32 %v5200_v51, %v5199_v43  ;;  %v8393_v9 = vpop.f32.mrf.mxu0 }
 0x44f   : > { %v5202_v32 = vpop.f32.mrf.mxu1 }
 0x450   : > { %v8396_v14 = vadd.f32 %v5201_v4, %v8241_v35  ;;  %v8398_v5 = vpop.f32.mrf.mxu0 }
 0x451   : > { %v5203_v60 = vpop.f32.mrf.mxu1 }
 0x452   : > { %v5204_v11 = vadd.f32 %v5203_v60, %v5202_v32  ;;  %v8400_v8 = vpop.f32.mrf.mxu0 }
 0x453   : > { %v5205_v18 = vpop.f32.mrf.mxu1 }
 0x454   : > { %v8403_v55 = vadd.f32 %v5204_v11, %v8245_v17  ;;  %v8405_v56 = vpop.f32.mrf.mxu0 }
 0x455   : > { %v5206_v61 = vpop.f32.mrf.mxu1 }
 0x456   : > { %8931 = vst [vmem:[#allocation35_spill] sm:$0xff] %v8403_v55  ;;  %v5207_v43 = vadd.f32 %v5206_v61, %v5205_v18  ;;  %v8407_v51 = vpop.f32.mrf.mxu0 }
 0x457   : > { %8932 = vst [vmem:[#allocation38_spill] sm:$0xff] %v8407_v51  ;;  %v5208_v57 = vpop.f32.mrf.mxu1 }
 0x458   : > { %v8410_v35 = vadd.f32 %v5207_v43, %v8253_v41  ;;  %v8412_v4 = vpop.f32.mrf.mxu0 }
 0x459   : > { %8934 = vst [vmem:[#allocation41_spill] sm:$0xff] %v8412_v4  ;;  %v5209_v24 = vpop.f32.mrf.mxu1 }
 0x45a   : > { %8933 = vst [vmem:[#allocation39_spill] sm:$0xff] %v8410_v35  ;;  %v5210_v32 = vadd.f32 %v5209_v24, %v5208_v57  ;;  %v8414_v60 = vpop.f32.mrf.mxu0 }
 0x45b   : > { %v5211_v50 = vpop.f32.mrf.mxu1 }
 0x45c   : > { %v8417_v17 = vadd.f32 %v5210_v32, %v8256_v33  ;;  %v8419_v11 = vpop.f32.mrf.mxu0 }
 0x45d   : > { %v5212_v55 = vpop.f32.mrf.mxu1 }
 0x45e   : > { %8935 = vst [vmem:[#allocation42_spill] sm:$0xff] %v8417_v17  ;;  %v5213_v18 = vadd.f32 %v5212_v55, %v5211_v50  ;;  %v8421_v61 = vpop.f32.mrf.mxu0 }
 0x45f   : > { %8936 = vst [vmem:[#allocation44_spill] sm:$0xff] %v8421_v61  ;;  %v5214_v51 = vpop.f32.mrf.mxu1 }
 0x460   : > { %v8424_v41 = vadd.f32 %v5213_v18, %v8261_v47  ;;  %v8426_v43 = vpop.f32.mrf.mxu0 }
 0x461   : > { %v5215_v35 = vpop.f32.mrf.mxu1 }
 0x462   : > { %8937 = vst [vmem:[#allocation45_spill] sm:$0xff] %v8424_v41  ;;  %v5216_v24 = vadd.f32 %v5215_v35, %v5214_v51  ;;  %v8428_v57 = vpop.f32.mrf.mxu0 }
 0x463   : > { %8938 = vst [vmem:[#allocation46_spill] sm:$0xff] %v8428_v57  ;;  %v5217_v4 = vpop.f32.mrf.mxu1 }
 0x464   : > { %v8431_v33 = vadd.f32 %v5216_v24, %v8264_v7  ;;  %v8433_v32 = vpop.f32.mrf.mxu0 }
 0x465   : > { %8940 = vst [vmem:[#allocation49_spill] sm:$0xff] %v8433_v32  ;;  %v5218_v17 = vpop.f32.mrf.mxu1 }
 0x466   : > { %8939 = vst [vmem:[#allocation47_spill] sm:$0xff] %v8431_v33  ;;  %v5219_v50 = vadd.f32 %v5218_v17, %v5217_v4  ;;  %v8435_v55 = vpop.f32.mrf.mxu0 }
 0x467   : > { %8941 = vst [vmem:[#allocation50_spill] sm:$0xff] %v8435_v55  ;;  %v5220_v61 = vpop.f32.mrf.mxu1 }
 0x468   : > { %v8438_v47 = vadd.f32 %v5219_v50, %v8269_v36  ;;  %v8440_v18 = vpop.f32.mrf.mxu0 }
 0x469   : > { %8943 = vst [vmem:[#allocation51_spill] sm:$0xff] %v8440_v18  ;;  %v5221_v41 = vpop.f32.mrf.mxu1 }
 0x46a   : > { %8942 = vst [vmem:[#allocation53_spill] sm:$0xff] %v8438_v47  ;;  %v5222_v51 = vadd.f32 %v5221_v41, %v5220_v61  ;;  %v8442_v35 = vpop.f32.mrf.mxu0 }
 0x46b   : > { %v5223_v57 = vpop.f32.mrf.mxu1 }
 0x46c   : > { %v8445_v7 = vadd.f32 %v5222_v51, %v8272_v49  ;;  %v8447_v24 = vpop.f32.mrf.mxu0 }
 0x46d   : > { %v5224_v33 = vpop.f32.mrf.mxu1 }
 0x46e   : > { %8944 = vst [vmem:[#allocation52_spill] sm:$0xff] %v8445_v7  ;;  %v5225_v4 = vadd.f32 %v5224_v33, %v5223_v57  ;;  %v8449_v55 = vpop.f32.mrf.mxu0 }
 0x46f   : > { %v5226_v17 = vpop.f32.mrf.mxu1  ;;  %8945 = vst [vmem:[#allocation36_spill] sm:$0xff] %v8449_v55 }
 0x470   : > { %v8452_v36 = vadd.f32 %v5225_v4, %v8277_v31  ;;  %v8454_v18 = vpop.f32.mrf.mxu0 }
 0x471   : > { %v5227_v50 = vpop.f32.mrf.mxu1 }
 0x472   : > { %8946 = vst [vmem:[#allocation29_spill] sm:$0xff] %v8452_v36  ;;  %v5228_v47 = vadd.f32 %v5227_v50, %v5226_v17  ;;  %v8459_v7 = vpop.f32.mrf.mxu0 }
 0x473   : > { %v5229_v61 = vpop.f32.mrf.mxu1 }
 0x474   : > { %v8457_v41 = vadd.f32 %v5228_v47, %v8280_v63  ;;  %v8464_v31 = vpop.f32.mrf.mxu0 }
 0x475   : > { %v5230_v49 = vpop.f32.mrf.mxu1 }
 0x476   : > { %8947 = vst [vmem:[#allocation37_spill] sm:$0xff] %v8457_v41  ;;  %v5231_v51 = vadd.f32 %v5230_v49, %v5229_v61  ;;  %v8469_v63 = vpop.f32.mrf.mxu0 }
 0x477   : > { %v5232_v32 = vpop.f32.mrf.mxu1  ;;  %8949 = vst [vmem:[#allocation14_spill] sm:$0xff] %v8469_v63 }
 0x478   : > { %v8462_v57 = vadd.f32 %v5231_v51, %v8285_v6  ;;  %v8474_v6 = vpop.f32.mrf.mxu0 }
 0x479   : > { %v5233_v33 = vpop.f32.mrf.mxu1 }
 0x47a   : > { %8948 = vst [vmem:[#allocation13_spill] sm:$0xff] %v8462_v57  ;;  %v5234_v55 = vadd.f32 %v5233_v33, %v5232_v32 }
 0x47b   : > { %v5235_v4 = vpop.f32.mrf.mxu1 }
 0x47c   : > { %v8467_v17 = vadd.f32 %v5234_v55, %v8288_v46  ;;  %v8479_v46 = vpop.f32.mrf.mxu0 }
 0x47d   : > { %v5236_v50 = vpop.f32.mrf.mxu1 }
 0x47e   : > { %v5237_v36 = vadd.f32 %v5236_v50, %v5235_v4 }
 0x47f   : > { %v5238_v47 = vpop.f32.mrf.mxu1 }
 0x480   : > { %v8472_v61 = vadd.f32 %v5237_v36, %v8293_v2  ;;  %v8484_v2 = vpop.f32.mrf.mxu0 }
 0x481   : > { %v5239_v49 = vpop.f32.mrf.mxu1 }
 0x482   : > { %8950 = vst [vmem:[#allocation12_spill] sm:$0xff] %v8472_v61  ;;  %v5240_v41 = vadd.f32 %v5239_v49, %v5238_v47 }
 0x483   : > { %v5241_v51 = vpop.f32.mrf.mxu1 }
 0x484   : > { %v8477_v32 = vadd.f32 %v5240_v41, %v8296_v39  ;;  %v8489_v39 = vpop.f32.mrf.mxu0 }
 0x485   : > { %v5242_v33 = vpop.f32.mrf.mxu1 }
 0x486   : > { %v5243_v57 = vadd.f32 %v5242_v33, %v5241_v51 }
 0x487   : > { %v5244_v55 = vpop.f32.mrf.mxu1 }
 0x488   : > { %v8482_v4 = vadd.f32 %v5243_v57, %v8301_v37  ;;  %v8494_v57 = vpop.f32.mrf.mxu0 }
 0x489   : > { %v5245_v50 = vpop.f32.mrf.mxu1 }
 0x48a   : > { %8951 = vst [vmem:[#allocation43_spill] sm:$0xff] %v8482_v4  ;;  %v5246_v63 = vadd.f32 %v5245_v50, %v5244_v55 }
 0x48b   : > { %v5247_v36 = vpop.f32.mrf.mxu1 }
 0x48c   : > { %v8487_v47 = vadd.f32 %v5246_v63, %v8304_v59  ;;  %v8499_v63 = vpop.f32.mrf.mxu0 }
 0x48d   : > { %v5248_v49 = vpop.f32.mrf.mxu1 }
 0x48e   : > { %v5249_v61 = vadd.f32 %v5248_v49, %v5247_v36 }
 0x48f   : > { %v5250_v41 = vpop.f32.mrf.mxu1 }
 0x490   : > { %v8492_v51 = vadd.f32 %v5249_v61, %v8309_v15  ;;  %v5286_v61 = vadd.f32 %v8335_v38, %v8328_v27  ;;  %v5298_v27 = vadd.f32 %v8363_v13, %v8358_v44 }
 0x491   : > { %v5251_v33 = vpop.f32.mrf.mxu1 }
 0x492   : > { %8952 = vst [vmem:[#allocation17_spill] sm:$0xff] %v8492_v51  ;;  %v5252_v37 = vadd.f32 %v5251_v33, %v5250_v41  ;;  %v8510_v41 = vpop.f32.mrf.mxu0 }
 0x493   : > { %v5253_v55 = vpop.f32.mrf.mxu1 }
 0x494   : > { %v8497_v50 = vadd.f32 %v5252_v37, %v8312_v19  ;;  %v3863_v37 = vadd.f32 %v5286_v61, %v8333_v1  ;;  %v5295_v61 = vadd.f32 %v8356_v52, %v8351_v10  ;;  %v5304_v10 = vadd.f32 %v8377_v23, %v8372_v28 }
 0x495   : > { %v5254_v4 = vpop.f32.mrf.mxu1  ;;  %v5307_v28 = vadd.f32 %v8384_v16, %v8379_v25  ;;  %v5316_v25 = vadd.f32 %v8405_v56, %v8400_v8  ;;  %v8960_v8 = vld [vmem:[#allocation38_spill] sm:$0xff]  ;;  %v8961_v56 = vld [vmem:[#allocation41_spill] sm:$0xff] }
 0x496   : > { %8953 = vst [vmem:[#allocation18_spill] sm:$0xff] %v8497_v50  ;;  %v5255_v59 = vadd.f32 %v5254_v4, %v5253_v55  ;;  %v5289_v4 = vadd.f32 %v8342_v62, %v8337_v53  ;;  %v8520_v55 = vpop.f32.mrf.mxu0  ;;  %v5292_v53 = vadd.f32 %v8349_v48, %v8344_v21 }
 0x497   : > { %v8501_v36 = vpop.f32.mrf.mxu1 }
 0x498   : > { %v8504_v49 = vadd.f32 %v5255_v59, %v8316_v22 }
 0x499   : > { %v8506_v15 = vpop.f32.mrf.mxu1 }
 0x49a   : > { %8954 = vst [vmem:[#allocation48_spill] sm:$0xff] %v8504_v49 }
 0x49b   : > { %v8512_v33 = vpop.f32.mrf.mxu1 }
 0x49c   : > { %8955 = vst [vmem:[#allocation19_spill] sm:$0xff] %v8512_v33  ;;  %v3866_v33 = vadd.f32 %v5289_v4, %v8340_v58 }
 0x49d   : > { %v8514_v19 = vpop.f32.mrf.mxu1 }
 0x49e   : > { %8956 = vst [vmem:[#allocation20_spill] sm:$0xff] %v8514_v19  ;;  %v8526_v19 = vpop.f32.mrf.mxu0 }
 0x49f   : > { %v5456_v22 = vpop.f32.mrf.mxu1 }
 0x4a0   : > { %v4024_v59 = vadd.f32 %v5456_v22, %v3863_v37  ;;  %v8538_v21 = vpop.f32.mrf.mxu0 }
 0x4a1   : > { %v4015_v49 = vpop.f32.mrf.mxu1 }
 0x4a2   : > { %v4144_v38 = vmax.f32 %v4024_v59, 0.0  ;;  %v4016_v50 = vadd.f32 %v4015_v49, %v8325_v3  ;;  %v5301_v3 = vadd.f32 %v8370_v40, %v8365_v54  ;;  %v3879_v49 = vadd.f32 %v5298_v27, %v8361_v29  ;;  %v8548_v37 = vpop.f32.mrf.mxu0 }
 0x4a3   : > { %v5457_v51 = vpop.f32.mrf.mxu1  ;;  %v5310_v40 = vadd.f32 %v8391_v42, %v8386_v0  ;;  %v3874_v59 = vadd.f32 %v5295_v61, %v8354_v30  ;;  %v5313_v0 = vadd.f32 %v8398_v5, %v8393_v9  ;;  %v5322_v9 = vadd.f32 %v8419_v11, %v8414_v60  ;;  %v8958_v60 = vld [vmem:[#allocation44_spill] sm:$0xff] }
 0x4a4   : > { %4176 = vst [vmem:[%s8530_s7 + $0x10] sm:$0xff] %v4144_v38  ;;  %v4142_v1 = vmax.f32 %v4016_v50, 0.0  ;;  %v4027_v62 = vadd.f32 %v5457_v51, %v3866_v33  ;;  %v3871_v33 = vadd.f32 %v5292_v53, %v8347_v45  ;;  %v3882_v4 = vadd.f32 %v5301_v3, %v8368_v26  ;;  %v8558_v53 = vpop.f32.mrf.mxu0 }
 0x4a5   : > { %v4018_v44 = vpop.f32.mrf.mxu1  ;;  %v3895_v38 = vadd.f32 %v5310_v40, %v8389_v12  ;;  %v3898_v3 = vadd.f32 %v5313_v0, %v8396_v14  ;;  %v5325_v11 = vadd.f32 %v8426_v43, %v8958_v60  ;;  %v5334_v43 = vadd.f32 %v8447_v24, %v8442_v35  ;;  %v8967_v35 = vld [vmem:[#allocation36_spill] sm:$0xff] }
 0x4a6   : > { %4174 = vst [vmem:[%s8530_s7] sm:$0xff] %v4142_v1  ;;  %v4145_v58 = vmax.f32 %v4027_v62, 0.0  ;;  %v4019_v13 = vadd.f32 %v4018_v44, %v8330_v20  ;;  %v3887_v62 = vadd.f32 %v5304_v10, %v8375_v34  ;;  %v5337_v24 = vadd.f32 %v8454_v18, %v8967_v35 }
 0x4a7   : > { %v5460_v48 = vpop.f32.mrf.mxu1  ;;  %v5346_v18 = vadd.f32 %v8484_v2, %v8479_v46  ;;  %v5349_v46 = vadd.f32 %v8494_v57, %v8489_v39  ;;  %v5358_v39 = vadd.f32 %v8548_v37, %v8538_v21 }
 0x4a8   : > { %4177 = vst [vmem:[%s8530_s7 + $0x18] sm:$0xff] %v4145_v58  ;;  %v4143_v51 = vmax.f32 %v4019_v13, 0.0  ;;  %v4040_v50 = vadd.f32 %v5460_v48, %v3879_v49  ;;  %v8568_v58 = vpop.f32.mrf.mxu0  ;;  %v8957_v49 = vld [vmem:[#allocation34_spill] sm:$0xff] }
 0x4a9   : > { %v4031_v54 = vpop.f32.mrf.mxu1  ;;  %v3890_v48 = vadd.f32 %v5307_v28, %v8957_v49  ;;  %v8970_v49 = vld [vmem:[#allocation51_spill] sm:$0xff]  ;;  %v5361_v21 = vadd.f32 %v8568_v58, %v8558_v53 }
 0x4aa   : > { %4175 = vst [vmem:[%s8530_s7 + $0x8] sm:$0xff] %v4143_v51  ;;  %v4148_v20 = vmax.f32 %v4040_v50, 0.0  ;;  %v4032_v29 = vadd.f32 %v4031_v54, %v3871_v33  ;;  %v8959_v50 = vld [vmem:[#allocation42_spill] sm:$0xff]  ;;  %v8578_v54 = vpop.f32.mrf.mxu0 }
 0x4ab   : > { %v5461_v22 = vpop.f32.mrf.mxu1  ;;  %v3911_v33 = vadd.f32 %v5322_v9, %v8959_v50 }
 0x4ac   : > { %4180 = vst [vmem:[%s8530_s7 + $0x30] sm:$0xff] %v4148_v20  ;;  %v4146_v52 = vmax.f32 %v4032_v29, 0.0  ;;  %v4043_v45 = vadd.f32 %v5461_v22, %v3882_v4  ;;  %v5319_v20 = vadd.f32 %v8961_v56, %v8960_v8  ;;  %v8962_v22 = vld [vmem:[#allocation35_spill] sm:$0xff] }
 0x4ad   : > { %v4034_v27 = vpop.f32.mrf.mxu1  ;;  %v3903_v10 = vadd.f32 %v5316_v25, %v8962_v22 }
 0x4ae   : > { %4178 = vst [vmem:[%s8530_s7 + $0x20] sm:$0xff] %v4146_v52  ;;  %v4149_v42 = vmax.f32 %v4043_v45, 0.0  ;;  %v4035_v26 = vadd.f32 %v4034_v27, %v3874_v59  ;;  %v8963_v27 = vld [vmem:[#allocation45_spill] sm:$0xff] }
 0x4af   : > { %v5464_v1 = vpop.f32.mrf.mxu1  ;;  %v3914_v0 = vadd.f32 %v5325_v11, %v8963_v27  ;;  %v8971_v11 = vld [vmem:[#allocation47_spill] sm:$0xff] }
 0x4b0   : > { %4181 = vst [vmem:[%s8530_s7 + $0x38] sm:$0xff] %v4149_v42  ;;  %v4147_v23 = vmax.f32 %v4035_v26, 0.0  ;;  %v4056_v30 = vadd.f32 %v5464_v1, %v3895_v38  ;;  %v8588_v42 = vpop.f32.mrf.mxu0  ;;  %v8964_v38 = vld [vmem:[#allocation46_spill] sm:$0xff]  ;;  %v8965_v1 = vld [vmem:[#allocation49_spill] sm:$0xff] }
 0x4b1   : > { %v4047_v44 = vpop.f32.mrf.mxu1  ;;  %v5328_v28 = vadd.f32 %v8965_v1, %v8964_v38  ;;  %v8975_v1 = vld [vmem:[#allocation37_spill] sm:$0xff] }
 0x4b2   : > { %4179 = vst [vmem:[%s8530_s7 + $0x28] sm:$0xff] %v4147_v23  ;;  %v4152_v5 = vmax.f32 %v4056_v30, 0.0  ;;  %v4048_v12 = vadd.f32 %v4047_v44, %v3887_v62  ;;  %v8966_v62 = vld [vmem:[#allocation39_spill] sm:$0xff]  ;;  %v8598_v25 = vpop.f32.mrf.mxu0 }
 0x4b3   : > { %v5465_v13 = vpop.f32.mrf.mxu1  ;;  %v3906_v44 = vadd.f32 %v5319_v20, %v8966_v62 }
 0x4b4   : > { %4184 = vst [vmem:[%s8530_s7 + $0x50] sm:$0xff] %v4152_v5  ;;  %v4150_v16 = vmax.f32 %v4048_v12, 0.0  ;;  %v4059_v34 = vadd.f32 %v5465_v13, %v3898_v3  ;;  %v8968_v3 = vld [vmem:[#allocation52_spill] sm:$0xff]  ;;  %v8608_v56 = vpop.f32.mrf.mxu0 }
 0x4b5   : > { %v4050_v61 = vpop.f32.mrf.mxu1  ;;  %v3927_v13 = vadd.f32 %v5334_v43, %v8968_v3 }
 0x4b6   : > { %4182 = vst [vmem:[%s8530_s7 + $0x40] sm:$0xff] %v4150_v16  ;;  %v4153_v51 = vmax.f32 %v4059_v34, 0.0  ;;  %v4051_v14 = vadd.f32 %v4050_v61, %v3890_v48  ;;  %v8969_v34 = vld [vmem:[#allocation50_spill] sm:$0xff]  ;;  %v5368_v27 = vpop.f32.mrf.mxu0 }
 0x4b7   : > { %v5468_v40 = vpop.f32.mrf.mxu1  ;;  %v5331_v48 = vadd.f32 %v8970_v49, %v8969_v34  ;;  %v5355_v34 = vadd.f32 %v8526_v19, %v8520_v55  ;;  %v5364_v19 = vadd.f32 %v8588_v42, %v8578_v54 }
 0x4b8   : > { %4185 = vst [vmem:[%s8530_s7 + $0x58] sm:$0xff] %v4153_v51  ;;  %v4151_v29 = vmax.f32 %v4051_v14, 0.0  ;;  %v4072_v4 = vadd.f32 %v5468_v40, %v3911_v33  ;;  %v3919_v51 = vadd.f32 %v5328_v28, %v8971_v11  ;;  %v8972_v40 = vld [vmem:[#allocation29_spill] sm:$0xff] }
 0x4b9   : > { %v4063_v52 = vpop.f32.mrf.mxu1  ;;  %v3930_v8 = vadd.f32 %v5337_v24, %v8972_v40  ;;  %v8981_v40 = vld [vmem:[#allocation19_spill] sm:$0xff] }
 0x4ba   : > { %4183 = vst [vmem:[%s8530_s7 + $0x48] sm:$0xff] %v4151_v29  ;;  %v4156_v45 = vmax.f32 %v4072_v4, 0.0  ;;  %v4064_v59 = vadd.f32 %v4063_v52, %v3903_v10  ;;  %v5340_v29 = vadd.f32 %v8464_v31, %v8459_v7  ;;  %v8973_v10 = vld [vmem:[#allocation53_spill] sm:$0xff] }
 0x4bb   : > { %v5469_v26 = vpop.f32.mrf.mxu1  ;;  %v3922_v52 = vadd.f32 %v5331_v48, %v8973_v10 }
 0x4bc   : > { %4188 = vst [vmem:[%s8530_s7 + $0x70] sm:$0xff] %v4156_v45  ;;  %v4154_v23 = vmax.f32 %v4064_v59, 0.0  ;;  %v4075_v30 = vadd.f32 %v5469_v26, %v3914_v0  ;;  %v3943_v59 = vadd.f32 %v5346_v18, %v8467_v17  ;;  %v8974_v26 = vld [vmem:[#allocation14_spill] sm:$0xff]  ;;  %v3935_v28 = vadd.f32 %v5340_v29, %v8975_v1  ;;  %v8976_v17 = vld [vmem:[#allocation12_spill] sm:$0xff] }
 0x4bd   : > { %v4066_v9 = vpop.f32.mrf.mxu1  ;;  %v5343_v7 = vadd.f32 %v8474_v6, %v8974_v26  ;;  %v3946_v62 = vadd.f32 %v5349_v46, %v8976_v17  ;;  %v5352_v6 = vadd.f32 %v8510_v41, %v8499_v63  ;;  %v5258_v41 = vadd.f32 %v8506_v15, %v8501_v36  ;;  %v8979_v36 = vld [vmem:[#allocation43_spill] sm:$0xff] }
 0x4be   : > { %4186 = vst [vmem:[%s8530_s7 + $0x60] sm:$0xff] %v4154_v23  ;;  %v4157_v5 = vmax.f32 %v4075_v30, 0.0  ;;  %v4067_v12 = vadd.f32 %v4066_v9, %v3906_v44  ;;  %v5369_v44 = vpop.f32.mrf.mxu0  ;;  %v3954_v15 = vadd.f32 %v5355_v34, %v8979_v36 }
 0x4bf   : > { %v5472_v16 = vpop.f32.mrf.mxu1  ;;  %v5370_v58 = vadd.f32 %v5369_v44, %v5368_v27 }
 0x4c0   : > { %4189 = vst [vmem:[%s8530_s7 + $0x78] sm:$0xff] %v4157_v5  ;;  %v4155_v61 = vmax.f32 %v4067_v12, 0.0  ;;  %v4088_v60 = vadd.f32 %v5472_v16, %v3927_v13  ;;  %v8977_v5 = vld [vmem:[#allocation13_spill] sm:$0xff]  ;;  %v3959_v16 = vadd.f32 %v5358_v39, %v8487_v47  ;;  %v5371_v49 = vpop.f32.mrf.mxu0 }
 0x4c1   : > { %v4079_v14 = vpop.f32.mrf.mxu1  ;;  %v3938_v12 = vadd.f32 %v5343_v7, %v8977_v5 }
 0x4c2   : > { %4187 = vst [vmem:[%s8530_s7 + $0x68] sm:$0xff] %v4155_v61  ;;  %v4160_v50 = vmax.f32 %v4088_v60, 0.0  ;;  %v4080_v33 = vadd.f32 %v4079_v14, %v3919_v51  ;;  %v3951_v60 = vadd.f32 %v5352_v6, %v8477_v32  ;;  %v8978_v51 = vld [vmem:[#allocation17_spill] sm:$0xff]  ;;  %v5372_v55 = vpop.f32.mrf.mxu0  ;;  %v8982_v32 = vld [vmem:[#allocation20_spill] sm:$0xff] }
 0x4c3   : > { %v5473_v20 = vpop.f32.mrf.mxu1  ;;  %v3962_v14 = vadd.f32 %v5361_v21, %v8978_v51 }
 0x4c4   : > { %4192 = vst [vmem:[%s8530_s7 + $0x90] sm:$0xff] %v4160_v50  ;;  %v4158_v4 = vmax.f32 %v4080_v33, 0.0  ;;  %v4091_v22 = vadd.f32 %v5473_v20, %v3930_v8  ;;  %v8980_v50 = vld [vmem:[#allocation32_spill] sm:$0xff]  ;;  %v5261_v8 = vadd.f32 %v8982_v32, %v8981_v40 }
 0x4c5   : > { %v4082_v43 = vpop.f32.mrf.mxu1  ;;  %v3814_v33 = vadd.f32 %v5258_v41, %v8980_v50 }
 0x4c6   : > { %4190 = vst [vmem:[%s8530_s7 + $0x80] sm:$0xff] %v4158_v4  ;;  %v4161_v2 = vmax.f32 %v4091_v22, 0.0  ;;  %v4083_v45 = vadd.f32 %v4082_v43, %v3922_v52  ;;  %v5373_v22 = vadd.f32 %v5372_v55, %v5371_v49  ;;  %v8983_v43 = vld [vmem:[#allocation18_spill] sm:$0xff] }
 0x4c7   : > { %v5476_v0 = vpop.f32.mrf.mxu1  ;;  %v3975_v42 = vadd.f32 %v5370_v58, %v3814_v33  ;;  %v3967_v46 = vadd.f32 %v5364_v19, %v8983_v43 }
 0x4c8   : > { %4193 = vst [vmem:[%s8530_s7 + $0x98] sm:$0xff] %v4161_v2  ;;  %v4159_v31 = vmax.f32 %v4083_v45, 0.0  ;;  %v4104_v38 = vadd.f32 %v5476_v0, %v3943_v59  ;;  %v5367_v2 = vadd.f32 %v8608_v56, %v8598_v25  ;;  %v8984_v45 = vld [vmem:[#allocation33_spill] sm:$0xff]  ;;  %v8985_v25 = vld [vmem:[#allocation48_spill] sm:$0xff] }
 0x4c9   : > { %v4095_v23 = vpop.f32.mrf.mxu1  ;;  %v3817_v59 = vadd.f32 %v5261_v8, %v8984_v45 }
 0x4ca   : > { %4191 = vst [vmem:[%s8530_s7 + $0x88] sm:$0xff] %v4159_v31  ;;  %v4164_v57 = vmax.f32 %v4104_v38, 0.0  ;;  %v4096_v30 = vadd.f32 %v4095_v23, %v3935_v28  ;;  %v3970_v56 = vadd.f32 %v5367_v2, %v8985_v25 }
 0x4cb   : > { %v5477_v9 = vpop.f32.mrf.mxu1  ;;  %v3978_v38 = vadd.f32 %v5373_v22, %v3817_v59 }
 0x4cc   : > { %4196 = vst [vmem:[%s8530_s7 + $0xb0] sm:$0xff] %v4164_v57  ;;  %v4162_v35 = vmax.f32 %v4096_v30, 0.0  ;;  %v4107_v24 = vadd.f32 %v5477_v9, %v3946_v62 }
 0x4cd   : > { %v4098_v3 = vpop.f32.mrf.mxu1 }
 0x4ce   : > { %4194 = vst [vmem:[%s8530_s7 + $0xa0] sm:$0xff] %v4162_v35  ;;  %v4165_v37 = vmax.f32 %v4107_v24, 0.0  ;;  %v4099_v13 = vadd.f32 %v4098_v3, %v3938_v12 }
 0x4cf   : > { %v5480_v63 = vpop.f32.mrf.mxu1 }
 0x4d0   : > { %4197 = vst [vmem:[%s8530_s7 + $0xb8] sm:$0xff] %v4165_v37  ;;  %v4163_v48 = vmax.f32 %v4099_v13, 0.0  ;;  %v4120_v61 = vadd.f32 %v5480_v63, %v3959_v16 }
 0x4d1   : > { %v4111_v53 = vpop.f32.mrf.mxu1 }
 0x4d2   : > { %4195 = vst [vmem:[%s8530_s7 + $0xa8] sm:$0xff] %v4163_v48  ;;  %v4168_v11 = vmax.f32 %v4120_v61, 0.0  ;;  %v4112_v47 = vadd.f32 %v4111_v53, %v3951_v60 }
 0x4d3   : > { %v5481_v18 = vpop.f32.mrf.mxu1 }
 0x4d4   : > { %4200 = vst [vmem:[%s8530_s7 + $0xd0] sm:$0xff] %v4168_v11  ;;  %v4166_v20 = vmax.f32 %v4112_v47, 0.0  ;;  %v4123_v29 = vadd.f32 %v5481_v18, %v3962_v14 }
 0x4d5   : > { %v4114_v4 = vpop.f32.mrf.mxu1 }
 0x4d6   : > { %4198 = vst [vmem:[%s8530_s7 + $0xc0] sm:$0xff] %v4166_v20  ;;  %v4169_v10 = vmax.f32 %v4123_v29, 0.0  ;;  %v4115_v54 = vadd.f32 %v4114_v4, %v3954_v15 }
 0x4d7   : > { %v5484_v52 = vpop.f32.mrf.mxu1 }
 0x4d8   : > { %4201 = vst [vmem:[%s8530_s7 + $0xd8] sm:$0xff] %v4169_v10  ;;  %v4167_v27 = vmax.f32 %v4115_v54, 0.0  ;;  %v4136_v0 = vadd.f32 %v5484_v52, %v3975_v42 }
 0x4d9   : > { %v4127_v26 = vpop.f32.mrf.mxu1 }
 0x4da   : > { %4199 = vst [vmem:[%s8530_s7 + $0xc8] sm:$0xff] %v4167_v27  ;;  %v4172_v7 = vmax.f32 %v4136_v0, 0.0  ;;  %v4128_v31 = vadd.f32 %v4127_v26, %v3967_v46 }
 0x4db   : > { %v5485_v1 = vpop.f32.mrf.mxu1 }
 0x4dc   : > { %4204 = vst [vmem:[%s8530_s7 + $0xf0] sm:$0xff] %v4172_v7  ;;  %v4170_v28 = vmax.f32 %v4128_v31, 0.0  ;;  %v4139_v23 = vadd.f32 %v5485_v1, %v3978_v38 }
 0x4dd   : > { %v4130_v39 = vpop.f32.mrf.mxu1 }
 0x4de   : > { %4202 = vst [vmem:[%s8530_s7 + $0xe0] sm:$0xff] %v4170_v28  ;;  %v4173_v57 = vmax.f32 %v4139_v23, 0.0  ;;  %v4131_v30 = vadd.f32 %v4130_v39, %v3970_v56 }
 0x4e0   : > { %4205 = vst [vmem:[%s8530_s7 + $0xf8] sm:$0xff] %v4173_v57  ;;  %v4171_v17 = vmax.f32 %v4131_v30, 0.0 }
 0x4e2   : > { %4203 = vst [vmem:[%s8530_s7 + $0xe8] sm:$0xff] %v4171_v17 }
 0x4e3   : > { %6090 = shalt.err (!%p6087_p9)
}
 0x4e4   : > { %s6091_s10 = scalar_lea.hbm %s8664_s29, 4096  ;;  %s6095_s28 = scalar_lea.hbm %s8716_s5, 8192 }
 0x4e5   : > { %p6092_p13 = scmp.ne.s32.totalorder %s8664_s29, %s6091_s10  ;;  %p6096_p4 = scmp.lt.s32.totalorder %s8664_s29, %s8716_s5 }
 0x4e6   : > { %p6097_p8 = scmp.lt.s32.totalorder %s6095_s28, %s6091_s10 }
 0x4e7   : > { %p6093_p5 = pnand %p6092_p13, %p8986_p10 }
 0x4e8   : > { %p6098_p3 = por %p6097_p8, %p6096_p4 }
 0x4e9   : > { %p6094_p0 = pneg %p6093_p5 }
 0x4eb   : > { %p6099_p11 = pnand %p6098_p3, %p6094_p0 }
 0x4ed   : > { %6102 = shalt.err (!%p6099_p11)
}
 0x4ee   : > { %s6158_s9 = smov 128   ;;  %s6159_s14 = smov 8  }
 0x4ef   : > { %5496 = dma.vmem_to_hbm [thread:$0]  (%p8986_p10), %s8666_s13, 4096, %s8664_s29, %s4207_s30, %s6158_s9, %s6158_s9, %s6159_s14  }
 0x4f0 PF: > { %s4235_s17 = sand.u32 1, %s6133_s18   ;;  %p8987_p1 = scmp.ne.s32.totalorder %s8778_s25, 0 }
 0x4f1   : > { %p8988_p2 = scmp.ge.s32.totalorder %s6145_s21, 2  ;;  %s4236_s22 = scalar_lea.sflag [#allocation4], %s4235_s17 }
 0x4f3   : > { %p5510_p6 = pnand %p8988_p2, %p8987_p1 }
 0x4f5   : > { %p5511_p12 = pneg %p5510_p6 }
 0x4f7   : > { %6128 = dma.done.wait (%p5511_p12), %s4236_s22, 4096  }
 0x4f8   : > { %6130 = vsyncadd (%p5511_p12), %s4236_s22, 4294963200  ;;  %p19_p7 = scmp.ge.s32.totalorder %s6262_s15, 4   ;;  %s8989_s18 = smov %s6137_s19 }
 0x4f9   : > { %s8990_s19 = smov %s6141_s20  ;;  %s8991_s20 = smov %s6278_s27 }
 0x4fa   : > { %s8992_s21 = smov %s6262_s15  ;;  %21 = sbr.rel (!%p19_p7) target bundleno = 6 (0x6), region = 94 }
 0x4ff   :  { %4241 = vsyncpa [#allocation3], 1 }
 0x500   :  { %4243 = vsyncpa [#allocation3 + $0x1], 1 }
 0x501   :  { %4244 = vsyncpa [#allocation6], 1 }
 0x502   :  { %4245 = vsyncpa [#allocation4], 1 }
 0x503   :  { %4247 = vsyncpa [#allocation4 + $0x1], 1 }

</bundles_post_ra>
